<compile_context>
chip_gen: v6e
topology: v6e:2x2x1
jax: 0.10.0
libtpu: 0.0.40
codegen_flags: <defaults>
</compile_context>

<pallas_src>
import math
import functools

import jax
import jax.numpy as jnp
from jax.experimental import pallas as pl
from jax.experimental.pallas import tpu as pltpu


# ----------------------------- helpers --------------------------------------
def _layernorm(x, gamma, beta, eps=1e-5):
    mu = jnp.mean(x, axis=-1, keepdims=True)
    var = jnp.mean((x - mu) ** 2, axis=-1, keepdims=True)
    return (x - mu) * jax.lax.rsqrt(var + eps) * gamma + beta


# --------------------------- fused forward kernel ----------------------------
def fused_transformer_kernel(num_heads, num_layers,
                             x_ref, wmap_ref, bmap_ref, cls_ref, pos_ref,
                             wq_ref, bq_ref, wk_ref, bk_ref, wvo_ref, bvo_ref,
                             g1_ref, be1_ref,
                             w1_ref, bf1_ref, w2_ref, bf2_ref,
                             g2_ref, be2_ref,
                             wc_ref, bc_ref,
                             out_ref):
    B, P, Din = x_ref.shape
    H = wmap_ref.shape[1]
    S = P + 1

    # ---- patch embedding: batch folded into the matmul M dimension ----
    x_flat = x_ref[...].reshape(B * P, Din)
    patches = (jnp.dot(x_flat, wmap_ref[...], preferred_element_type=jnp.float32)
               + bmap_ref[...])                                    # (B*P, H)
    patches = patches.reshape(B, P, H) + pos_ref[1:, :][None]      # + pos[1:]
    cls_tok = jnp.broadcast_to((cls_ref[...] + pos_ref[0:1, :])[None], (B, 1, H))

    # Token stream built once in registers (no VMEM scratch round-trip),
    # then carried flat (B*S, H) for every projection / FF matmul.
    tok = jnp.concatenate([cls_tok, patches], axis=1).reshape(B * S, H)

    for l in range(num_layers):          # static unroll; weights resident in VMEM
        # --- multi-head self attention ---
        # Weights are pre-split head-major: wq/wk are (nh, H, hd) with the
        # 1/sqrt(hd) scale folded into Q; wvo is (nh, H, H) = Wv_h @ Wo_h so
        # each head's PV product lands directly at residual width H and the
        # head outputs simply accumulate (no lane slicing, no concat, no
        # separate output projection).
        attn = jnp.zeros((B, S, H), jnp.float32)
        for h in range(num_heads):       # static; nh is tiny
            qh = (jnp.dot(tok, wq_ref[l, h], preferred_element_type=jnp.float32)
                  + bq_ref[l, h]).reshape(B, S, -1)                # (B, S, hd)
            kh = (jnp.dot(tok, wk_ref[l, h], preferred_element_type=jnp.float32)
                  + bk_ref[l, h]).reshape(B, S, -1)                # (B, S, hd)
            vh = jnp.dot(tok, wvo_ref[l, h],
                         preferred_element_type=jnp.float32).reshape(B, S, H)

            s = jnp.einsum('bqd,bkd->bqk', qh, kh,
                           preferred_element_type=jnp.float32)     # (B, S, S)
            s = s - jnp.max(s, axis=-1, keepdims=True)
            p = jnp.exp(s)
            p = p / jnp.sum(p, axis=-1, keepdims=True)             # exact softmax
            attn = attn + jnp.einsum('bqk,bkd->bqd', p, vh,
                                     preferred_element_type=jnp.float32)
        attn_flat = attn.reshape(B * S, H) + bvo_ref[l]            # folded bv@Wo + bo

        x1 = _layernorm(tok + attn_flat, g1_ref[l], be1_ref[l])

        # --- feed-forward: Linear -> ReLU -> Linear -> ReLU (dropout = 0) ---
        h1 = jnp.maximum(
            jnp.dot(x1, w1_ref[l], preferred_element_type=jnp.float32) + bf1_ref[l],
            0.0)
        h2 = jnp.maximum(
            jnp.dot(h1, w2_ref[l], preferred_element_type=jnp.float32) + bf2_ref[l],
            0.0)

        tok = _layernorm(x1 + h2, g2_ref[l], be2_ref[l])

    # ---- classifier on token 0 (row b*S of the flat stream) ----
    cls_out = tok.reshape(B, S, H)[:, 0, :]                        # (B, H)
    out_ref[...] = (jnp.dot(cls_out, wc_ref[...], preferred_element_type=jnp.float32)
                    + bc_ref[...]).astype(out_ref.dtype)


def transformer_forward(x, packed, num_heads, num_layers):
    if x.ndim == 2:                               # mirrors torch `x.unsqueeze(1)`
        x = x[:, None, :]
    B, _, _ = x.shape
    O = packed["w_c"].shape[1]
    kernel = functools.partial(fused_transformer_kernel, num_heads, num_layers)
    return pl.pallas_call(
        kernel,
        out_shape=jax.ShapeDtypeStruct((B, O), jnp.float32),
        # All weights are VMEM-resident; footprint here is <1 MiB.  The limit
        # documents the residency budget (re-derive / stream per layer before
        # scaling this design into v7x's 64 MiB physical VMEM).
        compiler_params=pltpu.CompilerParams(vmem_limit_bytes=32 * 1024 * 1024),
    )(x, packed["w_map"], packed["b_map"], packed["cls"], packed["pos"],
      packed["wq"], packed["bq"], packed["wk"], packed["bk"],
      packed["wvo"], packed["bvo"],
      packed["g1"], packed["be1"], packed["w1"], packed["bf1"],
      packed["w2"], packed["bf2"], packed["g2"], packed["be2"],
      packed["w_c"], packed["b_c"])


# ------------------------- one-time weight packing ----------------------------
def pack_params(params, num_heads):
    """Stack per-layer weights, split Q/K head-major (scale folded into Q),
    and fold V-projection + output-projection into one (H, H) weight per head
    plus a single (1, H) bias per layer."""
    H = params["w_map"].shape[1]
    hd = H // num_heads
    scale = 1.0 / math.sqrt(hd)
    Ls = params["layers"]

    def heads_w(w):   # (H, H) -> (nh, H, hd): per-head output columns
        return jnp.stack([w[:, h * hd:(h + 1) * hd] for h in range(num_heads)])

    def heads_b(b):   # (1, H) -> (nh, 1, hd)
        return jnp.stack([b[:, h * hd:(h + 1) * hd] for h in range(num_heads)])

    def fold_vo(lp):  # (nh, H, H): Wv_h @ Wo_h
        return jnp.stack([
            lp["wv"][:, h * hd:(h + 1) * hd] @ lp["wo"][h * hd:(h + 1) * hd, :]
            for h in range(num_heads)])

    packed = {
        "w_map": params["w_map"], "b_map": params["b_map"],
        "cls": params["cls"], "pos": params["pos"],
        "w_c": params["w_c"], "b_c": params["b_c"],
        "wq": jnp.stack([heads_w(lp["wq"] * scale) for lp in Ls]),
        "bq": jnp.stack([heads_b(lp["bq"] * scale) for lp in Ls]),
        "wk": jnp.stack([heads_w(lp["wk"]) for lp in Ls]),
        "bk": jnp.stack([heads_b(lp["bk"]) for lp in Ls]),
        "wvo": jnp.stack([fold_vo(lp) for lp in Ls]),
        "bvo": jnp.stack([lp["bv"] @ lp["wo"] + lp["bo"] for lp in Ls]),
        "g1": jnp.stack([lp["g1"] for lp in Ls]),
        "be1": jnp.stack([lp["be1"] for lp in Ls]),
        "w1": jnp.stack([lp["w1"] for lp in Ls]),
        "bf1": jnp.stack([lp["bf1"] for lp in Ls]),
        "w2": jnp.stack([lp["w2"] for lp in Ls]),
        "bf2": jnp.stack([lp["bf2"] for lp in Ls]),
        "g2": jnp.stack([lp["g2"] for lp in Ls]),
        "be2": jnp.stack([lp["be2"] for lp in Ls]),
    }
    return packed


# --------------------------- pure-JAX reference -------------------------------
def reference_forward(x, params, num_heads):
    if x.ndim == 2:
        x = x[:, None, :]
    B = x.shape[0]
    H = params["w_map"].shape[1]
    hd = H // num_heads
    tok = x @ params["w_map"] + params["b_map"]
    cls = jnp.broadcast_to(params["cls"][None], (B, 1, H))
    tok = jnp.concatenate([cls, tok], axis=1) + params["pos"][None]
    for lp in params["layers"]:
        S = tok.shape[1]
        q = (tok @ lp["wq"] + lp["bq"]).reshape(B, S, num_heads, hd)
        k = (tok @ lp["wk"] + lp["bk"]).reshape(B, S, num_heads, hd)
        v = (tok @ lp["wv"] + lp["bv"]).reshape(B, S, num_heads, hd)
        s = jnp.einsum("bqhd,bkhd->bhqk", q, k) / math.sqrt(hd)
        p = jax.nn.softmax(s, axis=-1)
        o = jnp.einsum("bhqk,bkhd->bqhd", p, v).reshape(B, S, H)
        attn = o @ lp["wo"] + lp["bo"]
        x1 = _layernorm(tok + attn, lp["g1"], lp["be1"])
        h1 = jax.nn.relu(x1 @ lp["w1"] + lp["bf1"])
        h2 = jax.nn.relu(h1 @ lp["w2"] + lp["bf2"])
        tok = _layernorm(x1 + h2, lp["g2"], lp["be2"])
    return tok[:, 0] @ params["w_c"] + params["b_c"]


# ------------------------------ param init ------------------------------------
def init_params(key, input_dim, num_patches, output_dim, hidden_dim, num_layers):
    counter = [0]

    def nrm(shape, s=0.05):
        counter[0] += 1
        k = jax.random.fold_in(key, counter[0])
        return jax.random.normal(k, shape, jnp.float32) * s

    params = {
        "w_map": nrm((input_dim, hidden_dim)),        # pre-transposed (Din, H)
        "b_map": nrm((1, hidden_dim)),
        "cls":   nrm((1, hidden_dim), 1.0),
        "pos":   nrm((num_patches + 1, hidden_dim), 1.0),
        "w_c":   nrm((hidden_dim, output_dim)),
        "b_c":   nrm((1, output_dim)),
        "layers": [],
    }
    for _ in range(num_layers):
        lp = {
            "wq": nrm((hidden_dim, hidden_dim)), "bq": nrm((1, hidden_dim)),
            "wk": nrm((hidden_dim, hidden_dim)), "bk": nrm((1, hidden_dim)),
            "wv": nrm((hidden_dim, hidden_dim)), "bv": nrm((1, hidden_dim)),
            "wo": nrm((hidden_dim, hidden_dim)), "bo": nrm((1, hidden_dim)),
            "g1": jnp.ones((1, hidden_dim), jnp.float32),
            "be1": jnp.zeros((1, hidden_dim), jnp.float32),
            "w1": nrm((hidden_dim, hidden_dim)), "bf1": nrm((1, hidden_dim)),
            "w2": nrm((hidden_dim, hidden_dim)), "bf2": nrm((1, hidden_dim)),
            "g2": jnp.ones((1, hidden_dim), jnp.float32),
            "be2": jnp.zeros((1, hidden_dim), jnp.float32),
        }
        params["layers"].append(lp)
    return params


# --------------------------------- main ---------------------------------------
if __name__ == "__main__":
    BATCH = 2
    INPUT_DIM = 16
    NUM_PATCHES = 8
    OUTPUT_DIM = 4
    NUM_HEADS = 2
    HIDDEN_DIM = 32
    NUM_LAYERS = 2

    key = jax.random.PRNGKey(0)
    k_x, k_p = jax.random.split(key)
    x = jax.random.normal(k_x, (BATCH, NUM_PATCHES, INPUT_DIM), jnp.float32)
    params = init_params(k_p, INPUT_DIM, NUM_PATCHES, OUTPUT_DIM,
                         HIDDEN_DIM, NUM_LAYERS)
    packed = pack_params(params, NUM_HEADS)

    out = transformer_forward(x, packed, NUM_HEADS, NUM_LAYERS)
    out = jax.block_until_ready(out)

    ref = reference_forward(x, params, NUM_HEADS)
    assert out.shape == (BATCH, OUTPUT_DIM)
    assert jnp.allclose(out, ref, rtol=1e-3, atol=1e-3), (
        f"mismatch: max err {jnp.max(jnp.abs(out - ref))}")

    print("KERNEL_OK")
</pallas_src>

<mosaic_0001>
module attributes {stable_mosaic.version = 11 : i64} {
  func.func @fused_transformer_kernel(%arg0: memref<2x8x16xf32, #tpu.memory_space<vmem>>, %arg1: memref<16x32xf32, #tpu.memory_space<vmem>>, %arg2: memref<1x32xf32, #tpu.memory_space<vmem>>, %arg3: memref<1x32xf32, #tpu.memory_space<vmem>>, %arg4: memref<9x32xf32, #tpu.memory_space<vmem>>, %arg5: memref<2x2x32x16xf32, #tpu.memory_space<vmem>>, %arg6: memref<2x2x1x16xf32, #tpu.memory_space<vmem>>, %arg7: memref<2x2x32x16xf32, #tpu.memory_space<vmem>>, %arg8: memref<2x2x1x16xf32, #tpu.memory_space<vmem>>, %arg9: memref<2x2x32x32xf32, #tpu.memory_space<vmem>>, %arg10: memref<2x1x32xf32, #tpu.memory_space<vmem>>, %arg11: memref<2x1x32xf32, #tpu.memory_space<vmem>>, %arg12: memref<2x1x32xf32, #tpu.memory_space<vmem>>, %arg13: memref<2x32x32xf32, #tpu.memory_space<vmem>>, %arg14: memref<2x1x32xf32, #tpu.memory_space<vmem>>, %arg15: memref<2x32x32xf32, #tpu.memory_space<vmem>>, %arg16: memref<2x1x32xf32, #tpu.memory_space<vmem>>, %arg17: memref<2x1x32xf32, #tpu.memory_space<vmem>>, %arg18: memref<2x1x32xf32, #tpu.memory_space<vmem>>, %arg19: memref<32x4xf32, #tpu.memory_space<vmem>>, %arg20: memref<1x4xf32, #tpu.memory_space<vmem>>, %arg21: memref<2x4xf32, #tpu.memory_space<vmem>>) attributes {dimension_semantics = [], scalar_prefetch = 0 : i64, scratch_operands = 0 : i64, tpu.core_type = #tpu.core_type<tc>} {
    %c0 = arith.constant 0 : index
    %c0_0 = arith.constant 0 : index
    %c0_1 = arith.constant 0 : index
    %0 = vector.load %arg0[%c0, %c0_0, %c0_1] : memref<2x8x16xf32, #tpu.memory_space<vmem>>, vector<2x8x16xf32>
    %1 = vector.shape_cast %0 : vector<2x8x16xf32> to vector<16x16xf32>
    %c0_2 = arith.constant 0 : index
    %c0_3 = arith.constant 0 : index
    %2 = vector.load %arg1[%c0_2, %c0_3] : memref<16x32xf32, #tpu.memory_space<vmem>>, vector<16x32xf32>
    %cst = arith.constant dense<0.000000e+00> : vector<16x32xf32>
    %3 = tpu.matmul %1, %2, %cst {dimension_numbers = #tpu.dot_dimension_numbers<[1], [0], [0], [1], [0, 0, 1, 1], [], []>} : vector<16x16xf32>, vector<16x32xf32>, vector<16x32xf32> -> vector<16x32xf32>
    %c0_4 = arith.constant 0 : index
    %c0_5 = arith.constant 0 : index
    %4 = vector.load %arg2[%c0_4, %c0_5] : memref<1x32xf32, #tpu.memory_space<vmem>>, vector<1x32xf32>
    %5 = vector.broadcast %4 : vector<1x32xf32> to vector<16x32xf32>
    %6 = arith.addf %3, %5 : vector<16x32xf32>
    %7 = vector.shape_cast %6 : vector<16x32xf32> to vector<2x8x32xf32>
    %c1 = arith.constant 1 : index
    %c0_6 = arith.constant 0 : index
    %8 = vector.load %arg4[%c1, %c0_6] : memref<9x32xf32, #tpu.memory_space<vmem>>, vector<8x32xf32>
    %9 = vector.shape_cast %8 : vector<8x32xf32> to vector<1x8x32xf32>
    %10 = vector.broadcast %9 : vector<1x8x32xf32> to vector<2x8x32xf32>
    %11 = arith.addf %7, %10 : vector<2x8x32xf32>
    %c0_7 = arith.constant 0 : index
    %c0_8 = arith.constant 0 : index
    %12 = vector.load %arg3[%c0_7, %c0_8] : memref<1x32xf32, #tpu.memory_space<vmem>>, vector<1x32xf32>
    %c0_9 = arith.constant 0 : index
    %c0_10 = arith.constant 0 : index
    %13 = vector.load %arg4[%c0_9, %c0_10] : memref<9x32xf32, #tpu.memory_space<vmem>>, vector<1x32xf32>
    %14 = arith.addf %12, %13 : vector<1x32xf32>
    %15 = vector.shape_cast %14 : vector<1x32xf32> to vector<1x1x32xf32>
    %16 = vector.shape_cast %15 : vector<1x1x32xf32> to vector<1x1x32xf32>
    %17 = vector.broadcast %16 : vector<1x1x32xf32> to vector<2x1x32xf32>
    %18 = tpu.concatenate %17, %11 in 1 : vector<2x1x32xf32>, vector<2x8x32xf32> -> vector<2x9x32xf32>
    %19 = vector.shape_cast %18 : vector<2x9x32xf32> to vector<18x32xf32>
    %cst_11 = arith.constant 0.000000e+00 : f32
    %20 = vector.broadcast %cst_11 : f32 to vector<2x9x32xf32>
    %c0_12 = arith.constant 0 : index
    %c0_13 = arith.constant 0 : index
    %c0_14 = arith.constant 0 : index
    %c0_15 = arith.constant 0 : index
    %21 = vector.load %arg5[%c0_12, %c0_13, %c0_14, %c0_15] : memref<2x2x32x16xf32, #tpu.memory_space<vmem>>, vector<1x1x32x16xf32>
    %22 = vector.shape_cast %21 : vector<1x1x32x16xf32> to vector<32x16xf32>
    %cst_16 = arith.constant dense<0.000000e+00> : vector<18x16xf32>
    %23 = tpu.matmul %19, %22, %cst_16 {dimension_numbers = #tpu.dot_dimension_numbers<[1], [0], [0], [1], [0, 0, 1, 1], [], []>} : vector<18x32xf32>, vector<32x16xf32>, vector<18x16xf32> -> vector<18x16xf32>
    %c0_17 = arith.constant 0 : index
    %c0_18 = arith.constant 0 : index
    %c0_19 = arith.constant 0 : index
    %c0_20 = arith.constant 0 : index
    %24 = vector.load %arg6[%c0_17, %c0_18, %c0_19, %c0_20] : memref<2x2x1x16xf32, #tpu.memory_space<vmem>>, vector<1x1x1x16xf32>
    %25 = vector.shape_cast %24 : vector<1x1x1x16xf32> to vector<1x16xf32>
    %26 = vector.broadcast %25 : vector<1x16xf32> to vector<18x16xf32>
    %27 = arith.addf %23, %26 : vector<18x16xf32>
    %28 = vector.shape_cast %27 : vector<18x16xf32> to vector<2x9x16xf32>
    %c0_21 = arith.constant 0 : index
    %c0_22 = arith.constant 0 : index
    %c0_23 = arith.constant 0 : index
    %c0_24 = arith.constant 0 : index
    %29 = vector.load %arg7[%c0_21, %c0_22, %c0_23, %c0_24] : memref<2x2x32x16xf32, #tpu.memory_space<vmem>>, vector<1x1x32x16xf32>
    %30 = vector.shape_cast %29 : vector<1x1x32x16xf32> to vector<32x16xf32>
    %cst_25 = arith.constant dense<0.000000e+00> : vector<18x16xf32>
    %31 = tpu.matmul %19, %30, %cst_25 {dimension_numbers = #tpu.dot_dimension_numbers<[1], [0], [0], [1], [0, 0, 1, 1], [], []>} : vector<18x32xf32>, vector<32x16xf32>, vector<18x16xf32> -> vector<18x16xf32>
    %c0_26 = arith.constant 0 : index
    %c0_27 = arith.constant 0 : index
    %c0_28 = arith.constant 0 : index
    %c0_29 = arith.constant 0 : index
    %32 = vector.load %arg8[%c0_26, %c0_27, %c0_28, %c0_29] : memref<2x2x1x16xf32, #tpu.memory_space<vmem>>, vector<1x1x1x16xf32>
    %33 = vector.shape_cast %32 : vector<1x1x1x16xf32> to vector<1x16xf32>
    %34 = vector.broadcast %33 : vector<1x16xf32> to vector<18x16xf32>
    %35 = arith.addf %31, %34 : vector<18x16xf32>
    %36 = vector.shape_cast %35 : vector<18x16xf32> to vector<2x9x16xf32>
    %c0_30 = arith.constant 0 : index
    %c0_31 = arith.constant 0 : index
    %c0_32 = arith.constant 0 : index
    %c0_33 = arith.constant 0 : index
    %37 = vector.load %arg9[%c0_30, %c0_31, %c0_32, %c0_33] : memref<2x2x32x32xf32, #tpu.memory_space<vmem>>, vector<1x1x32x32xf32>
    %38 = vector.shape_cast %37 : vector<1x1x32x32xf32> to vector<32x32xf32>
    %cst_34 = arith.constant dense<0.000000e+00> : vector<18x32xf32>
    %39 = tpu.matmul %19, %38, %cst_34 {dimension_numbers = #tpu.dot_dimension_numbers<[1], [0], [0], [1], [0, 0, 1, 1], [], []>} : vector<18x32xf32>, vector<32x32xf32>, vector<18x32xf32> -> vector<18x32xf32>
    %40 = vector.shape_cast %39 : vector<18x32xf32> to vector<2x9x32xf32>
    "tpu.trace_start"() <{level = 10 : i32, message = "bqd,bkd->bqk"}> : () -> ()
    %cst_35 = arith.constant dense<0.000000e+00> : vector<2x9x9xf32>
    %41 = tpu.matmul %28, %36, %cst_35 {dimension_numbers = #tpu.dot_dimension_numbers<[2], [2], [1], [1], [0, 0, 0, 1, 1, 1], [0], [0]>} : vector<2x9x16xf32>, vector<2x9x16xf32>, vector<2x9x9xf32> -> vector<2x9x9xf32>
    "tpu.trace_stop"() : () -> ()
    %cst_36 = arith.constant dense<0xFF800000> : vector<2x9xf32>
    %42 = vector.multi_reduction <maximumf>, %41, %cst_36 [2] : vector<2x9x9xf32> to vector<2x9xf32>
    %43 = vector.shape_cast %42 : vector<2x9xf32> to vector<2x9x1xf32>
    %44 = vector.broadcast %43 : vector<2x9x1xf32> to vector<2x9x9xf32>
    %45 = arith.subf %41, %44 : vector<2x9x9xf32>
    %46 = math.exp %45 : vector<2x9x9xf32>
    %cst_37 = arith.constant dense<0.000000e+00> : vector<2x9xf32>
    %47 = vector.multi_reduction <add>, %46, %cst_37 [2] : vector<2x9x9xf32> to vector<2x9xf32>
    %48 = vector.shape_cast %47 : vector<2x9xf32> to vector<2x9x1xf32>
    %49 = vector.broadcast %48 : vector<2x9x1xf32> to vector<2x9x9xf32>
    %50 = arith.divf %46, %49 : vector<2x9x9xf32>
    "tpu.trace_start"() <{level = 10 : i32, message = "bqk,bkd->bqd"}> : () -> ()
    %cst_38 = arith.constant dense<0.000000e+00> : vector<2x9x32xf32>
    %51 = tpu.matmul %50, %40, %cst_38 {dimension_numbers = #tpu.dot_dimension_numbers<[2], [1], [1], [2], [0, 0, 0, 1, 1, 2], [0], [0]>} : vector<2x9x9xf32>, vector<2x9x32xf32>, vector<2x9x32xf32> -> vector<2x9x32xf32>
    "tpu.trace_stop"() : () -> ()
    %52 = arith.addf %20, %51 : vector<2x9x32xf32>
    %c0_39 = arith.constant 0 : index
    %c1_40 = arith.constant 1 : index
    %c0_41 = arith.constant 0 : index
    %c0_42 = arith.constant 0 : index
    %53 = vector.load %arg5[%c0_39, %c1_40, %c0_41, %c0_42] : memref<2x2x32x16xf32, #tpu.memory_space<vmem>>, vector<1x1x32x16xf32>
    %54 = vector.shape_cast %53 : vector<1x1x32x16xf32> to vector<32x16xf32>
    %cst_43 = arith.constant dense<0.000000e+00> : vector<18x16xf32>
    %55 = tpu.matmul %19, %54, %cst_43 {dimension_numbers = #tpu.dot_dimension_numbers<[1], [0], [0], [1], [0, 0, 1, 1], [], []>} : vector<18x32xf32>, vector<32x16xf32>, vector<18x16xf32> -> vector<18x16xf32>
    %c0_44 = arith.constant 0 : index
    %c1_45 = arith.constant 1 : index
    %c0_46 = arith.constant 0 : index
    %c0_47 = arith.constant 0 : index
    %56 = vector.load %arg6[%c0_44, %c1_45, %c0_46, %c0_47] : memref<2x2x1x16xf32, #tpu.memory_space<vmem>>, vector<1x1x1x16xf32>
    %57 = vector.shape_cast %56 : vector<1x1x1x16xf32> to vector<1x16xf32>
    %58 = vector.broadcast %57 : vector<1x16xf32> to vector<18x16xf32>
    %59 = arith.addf %55, %58 : vector<18x16xf32>
    %60 = vector.shape_cast %59 : vector<18x16xf32> to vector<2x9x16xf32>
    %c0_48 = arith.constant 0 : index
    %c1_49 = arith.constant 1 : index
    %c0_50 = arith.constant 0 : index
    %c0_51 = arith.constant 0 : index
    %61 = vector.load %arg7[%c0_48, %c1_49, %c0_50, %c0_51] : memref<2x2x32x16xf32, #tpu.memory_space<vmem>>, vector<1x1x32x16xf32>
    %62 = vector.shape_cast %61 : vector<1x1x32x16xf32> to vector<32x16xf32>
    %cst_52 = arith.constant dense<0.000000e+00> : vector<18x16xf32>
    %63 = tpu.matmul %19, %62, %cst_52 {dimension_numbers = #tpu.dot_dimension_numbers<[1], [0], [0], [1], [0, 0, 1, 1], [], []>} : vector<18x32xf32>, vector<32x16xf32>, vector<18x16xf32> -> vector<18x16xf32>
    %c0_53 = arith.constant 0 : index
    %c1_54 = arith.constant 1 : index
    %c0_55 = arith.constant 0 : index
    %c0_56 = arith.constant 0 : index
    %64 = vector.load %arg8[%c0_53, %c1_54, %c0_55, %c0_56] : memref<2x2x1x16xf32, #tpu.memory_space<vmem>>, vector<1x1x1x16xf32>
    %65 = vector.shape_cast %64 : vector<1x1x1x16xf32> to vector<1x16xf32>
    %66 = vector.broadcast %65 : vector<1x16xf32> to vector<18x16xf32>
    %67 = arith.addf %63, %66 : vector<18x16xf32>
    %68 = vector.shape_cast %67 : vector<18x16xf32> to vector<2x9x16xf32>
    %c0_57 = arith.constant 0 : index
    %c1_58 = arith.constant 1 : index
    %c0_59 = arith.constant 0 : index
    %c0_60 = arith.constant 0 : index
    %69 = vector.load %arg9[%c0_57, %c1_58, %c0_59, %c0_60] : memref<2x2x32x32xf32, #tpu.memory_space<vmem>>, vector<1x1x32x32xf32>
    %70 = vector.shape_cast %69 : vector<1x1x32x32xf32> to vector<32x32xf32>
    %cst_61 = arith.constant dense<0.000000e+00> : vector<18x32xf32>
    %71 = tpu.matmul %19, %70, %cst_61 {dimension_numbers = #tpu.dot_dimension_numbers<[1], [0], [0], [1], [0, 0, 1, 1], [], []>} : vector<18x32xf32>, vector<32x32xf32>, vector<18x32xf32> -> vector<18x32xf32>
    %72 = vector.shape_cast %71 : vector<18x32xf32> to vector<2x9x32xf32>
    "tpu.trace_start"() <{level = 10 : i32, message = "bqd,bkd->bqk"}> : () -> ()
    %cst_62 = arith.constant dense<0.000000e+00> : vector<2x9x9xf32>
    %73 = tpu.matmul %60, %68, %cst_62 {dimension_numbers = #tpu.dot_dimension_numbers<[2], [2], [1], [1], [0, 0, 0, 1, 1, 1], [0], [0]>} : vector<2x9x16xf32>, vector<2x9x16xf32>, vector<2x9x9xf32> -> vector<2x9x9xf32>
    "tpu.trace_stop"() : () -> ()
    %cst_63 = arith.constant dense<0xFF800000> : vector<2x9xf32>
    %74 = vector.multi_reduction <maximumf>, %73, %cst_63 [2] : vector<2x9x9xf32> to vector<2x9xf32>
    %75 = vector.shape_cast %74 : vector<2x9xf32> to vector<2x9x1xf32>
    %76 = vector.broadcast %75 : vector<2x9x1xf32> to vector<2x9x9xf32>
    %77 = arith.subf %73, %76 : vector<2x9x9xf32>
    %78 = math.exp %77 : vector<2x9x9xf32>
    %cst_64 = arith.constant dense<0.000000e+00> : vector<2x9xf32>
    %79 = vector.multi_reduction <add>, %78, %cst_64 [2] : vector<2x9x9xf32> to vector<2x9xf32>
    %80 = vector.shape_cast %79 : vector<2x9xf32> to vector<2x9x1xf32>
    %81 = vector.broadcast %80 : vector<2x9x1xf32> to vector<2x9x9xf32>
    %82 = arith.divf %78, %81 : vector<2x9x9xf32>
    "tpu.trace_start"() <{level = 10 : i32, message = "bqk,bkd->bqd"}> : () -> ()
    %cst_65 = arith.constant dense<0.000000e+00> : vector<2x9x32xf32>
    %83 = tpu.matmul %82, %72, %cst_65 {dimension_numbers = #tpu.dot_dimension_numbers<[2], [1], [1], [2], [0, 0, 0, 1, 1, 2], [0], [0]>} : vector<2x9x9xf32>, vector<2x9x32xf32>, vector<2x9x32xf32> -> vector<2x9x32xf32>
    "tpu.trace_stop"() : () -> ()
    %84 = arith.addf %52, %83 : vector<2x9x32xf32>
    %85 = vector.shape_cast %84 : vector<2x9x32xf32> to vector<18x32xf32>
    %c0_66 = arith.constant 0 : index
    %c0_67 = arith.constant 0 : index
    %c0_68 = arith.constant 0 : index
    %86 = vector.load %arg10[%c0_66, %c0_67, %c0_68] : memref<2x1x32xf32, #tpu.memory_space<vmem>>, vector<1x1x32xf32>
    %87 = vector.shape_cast %86 : vector<1x1x32xf32> to vector<1x32xf32>
    %88 = vector.broadcast %87 : vector<1x32xf32> to vector<18x32xf32>
    %89 = arith.addf %85, %88 : vector<18x32xf32>
    %90 = arith.addf %19, %89 : vector<18x32xf32>
    %c0_69 = arith.constant 0 : index
    %c0_70 = arith.constant 0 : index
    %c0_71 = arith.constant 0 : index
    %91 = vector.load %arg11[%c0_69, %c0_70, %c0_71] : memref<2x1x32xf32, #tpu.memory_space<vmem>>, vector<1x1x32xf32>
    %92 = vector.shape_cast %91 : vector<1x1x32xf32> to vector<1x32xf32>
    %c0_72 = arith.constant 0 : index
    %c0_73 = arith.constant 0 : index
    %c0_74 = arith.constant 0 : index
    %93 = vector.load %arg12[%c0_72, %c0_73, %c0_74] : memref<2x1x32xf32, #tpu.memory_space<vmem>>, vector<1x1x32xf32>
    %94 = vector.shape_cast %93 : vector<1x1x32xf32> to vector<1x32xf32>
    %cst_75 = arith.constant dense<0.000000e+00> : vector<18xf32>
    %95 = vector.multi_reduction <add>, %90, %cst_75 [1] : vector<18x32xf32> to vector<18xf32>
    %96 = vector.shape_cast %95 : vector<18xf32> to vector<18x1xf32>
    %cst_76 = arith.constant 3.200000e+01 : f32
    %97 = vector.broadcast %cst_76 : f32 to vector<18x1xf32>
    %98 = arith.divf %96, %97 : vector<18x1xf32>
    %99 = vector.broadcast %98 : vector<18x1xf32> to vector<18x32xf32>
    %100 = arith.subf %90, %99 : vector<18x32xf32>
    %101 = arith.mulf %100, %100 : vector<18x32xf32>
    %cst_77 = arith.constant dense<0.000000e+00> : vector<18xf32>
    %102 = vector.multi_reduction <add>, %101, %cst_77 [1] : vector<18x32xf32> to vector<18xf32>
    %103 = vector.shape_cast %102 : vector<18xf32> to vector<18x1xf32>
    %cst_78 = arith.constant 3.200000e+01 : f32
    %104 = vector.broadcast %cst_78 : f32 to vector<18x1xf32>
    %105 = arith.divf %103, %104 : vector<18x1xf32>
    %106 = vector.broadcast %98 : vector<18x1xf32> to vector<18x32xf32>
    %107 = arith.subf %90, %106 : vector<18x32xf32>
    %cst_79 = arith.constant 9.99999974E-6 : f32
    %108 = vector.broadcast %cst_79 : f32 to vector<18x1xf32>
    %109 = arith.addf %105, %108 : vector<18x1xf32>
    %110 = math.rsqrt %109 : vector<18x1xf32>
    %111 = vector.broadcast %110 : vector<18x1xf32> to vector<18x32xf32>
    %112 = arith.mulf %107, %111 : vector<18x32xf32>
    %113 = vector.broadcast %92 : vector<1x32xf32> to vector<18x32xf32>
    %114 = arith.mulf %112, %113 : vector<18x32xf32>
    %115 = vector.broadcast %94 : vector<1x32xf32> to vector<18x32xf32>
    %116 = arith.addf %114, %115 : vector<18x32xf32>
    %c0_80 = arith.constant 0 : index
    %c0_81 = arith.constant 0 : index
    %c0_82 = arith.constant 0 : index
    %117 = vector.load %arg13[%c0_80, %c0_81, %c0_82] : memref<2x32x32xf32, #tpu.memory_space<vmem>>, vector<1x32x32xf32>
    %118 = vector.shape_cast %117 : vector<1x32x32xf32> to vector<32x32xf32>
    %cst_83 = arith.constant dense<0.000000e+00> : vector<18x32xf32>
    %119 = tpu.matmul %116, %118, %cst_83 {dimension_numbers = #tpu.dot_dimension_numbers<[1], [0], [0], [1], [0, 0, 1, 1], [], []>} : vector<18x32xf32>, vector<32x32xf32>, vector<18x32xf32> -> vector<18x32xf32>
    %c0_84 = arith.constant 0 : index
    %c0_85 = arith.constant 0 : index
    %c0_86 = arith.constant 0 : index
    %120 = vector.load %arg14[%c0_84, %c0_85, %c0_86] : memref<2x1x32xf32, #tpu.memory_space<vmem>>, vector<1x1x32xf32>
    %121 = vector.shape_cast %120 : vector<1x1x32xf32> to vector<1x32xf32>
    %122 = vector.broadcast %121 : vector<1x32xf32> to vector<18x32xf32>
    %123 = arith.addf %119, %122 : vector<18x32xf32>
    %cst_87 = arith.constant 0.000000e+00 : f32
    %124 = vector.broadcast %cst_87 : f32 to vector<18x32xf32>
    %125 = arith.maximumf %123, %124 : vector<18x32xf32>
    %c0_88 = arith.constant 0 : index
    %c0_89 = arith.constant 0 : index
    %c0_90 = arith.constant 0 : index
    %126 = vector.load %arg15[%c0_88, %c0_89, %c0_90] : memref<2x32x32xf32, #tpu.memory_space<vmem>>, vector<1x32x32xf32>
    %127 = vector.shape_cast %126 : vector<1x32x32xf32> to vector<32x32xf32>
    %cst_91 = arith.constant dense<0.000000e+00> : vector<18x32xf32>
    %128 = tpu.matmul %125, %127, %cst_91 {dimension_numbers = #tpu.dot_dimension_numbers<[1], [0], [0], [1], [0, 0, 1, 1], [], []>} : vector<18x32xf32>, vector<32x32xf32>, vector<18x32xf32> -> vector<18x32xf32>
    %c0_92 = arith.constant 0 : index
    %c0_93 = arith.constant 0 : index
    %c0_94 = arith.constant 0 : index
    %129 = vector.load %arg16[%c0_92, %c0_93, %c0_94] : memref<2x1x32xf32, #tpu.memory_space<vmem>>, vector<1x1x32xf32>
    %130 = vector.shape_cast %129 : vector<1x1x32xf32> to vector<1x32xf32>
    %131 = vector.broadcast %130 : vector<1x32xf32> to vector<18x32xf32>
    %132 = arith.addf %128, %131 : vector<18x32xf32>
    %cst_95 = arith.constant 0.000000e+00 : f32
    %133 = vector.broadcast %cst_95 : f32 to vector<18x32xf32>
    %134 = arith.maximumf %132, %133 : vector<18x32xf32>
    %135 = arith.addf %116, %134 : vector<18x32xf32>
    %c0_96 = arith.constant 0 : index
    %c0_97 = arith.constant 0 : index
    %c0_98 = arith.constant 0 : index
    %136 = vector.load %arg17[%c0_96, %c0_97, %c0_98] : memref<2x1x32xf32, #tpu.memory_space<vmem>>, vector<1x1x32xf32>
    %137 = vector.shape_cast %136 : vector<1x1x32xf32> to vector<1x32xf32>
    %c0_99 = arith.constant 0 : index
    %c0_100 = arith.constant 0 : index
    %c0_101 = arith.constant 0 : index
    %138 = vector.load %arg18[%c0_99, %c0_100, %c0_101] : memref<2x1x32xf32, #tpu.memory_space<vmem>>, vector<1x1x32xf32>
    %139 = vector.shape_cast %138 : vector<1x1x32xf32> to vector<1x32xf32>
    %cst_102 = arith.constant dense<0.000000e+00> : vector<18xf32>
    %140 = vector.multi_reduction <add>, %135, %cst_102 [1] : vector<18x32xf32> to vector<18xf32>
    %141 = vector.shape_cast %140 : vector<18xf32> to vector<18x1xf32>
    %cst_103 = arith.constant 3.200000e+01 : f32
    %142 = vector.broadcast %cst_103 : f32 to vector<18x1xf32>
    %143 = arith.divf %141, %142 : vector<18x1xf32>
    %144 = vector.broadcast %143 : vector<18x1xf32> to vector<18x32xf32>
    %145 = arith.subf %135, %144 : vector<18x32xf32>
    %146 = arith.mulf %145, %145 : vector<18x32xf32>
    %cst_104 = arith.constant dense<0.000000e+00> : vector<18xf32>
    %147 = vector.multi_reduction <add>, %146, %cst_104 [1] : vector<18x32xf32> to vector<18xf32>
    %148 = vector.shape_cast %147 : vector<18xf32> to vector<18x1xf32>
    %cst_105 = arith.constant 3.200000e+01 : f32
    %149 = vector.broadcast %cst_105 : f32 to vector<18x1xf32>
    %150 = arith.divf %148, %149 : vector<18x1xf32>
    %151 = vector.broadcast %143 : vector<18x1xf32> to vector<18x32xf32>
    %152 = arith.subf %135, %151 : vector<18x32xf32>
    %cst_106 = arith.constant 9.99999974E-6 : f32
    %153 = vector.broadcast %cst_106 : f32 to vector<18x1xf32>
    %154 = arith.addf %150, %153 : vector<18x1xf32>
    %155 = math.rsqrt %154 : vector<18x1xf32>
    %156 = vector.broadcast %155 : vector<18x1xf32> to vector<18x32xf32>
    %157 = arith.mulf %152, %156 : vector<18x32xf32>
    %158 = vector.broadcast %137 : vector<1x32xf32> to vector<18x32xf32>
    %159 = arith.mulf %157, %158 : vector<18x32xf32>
    %160 = vector.broadcast %139 : vector<1x32xf32> to vector<18x32xf32>
    %161 = arith.addf %159, %160 : vector<18x32xf32>
    %cst_107 = arith.constant 0.000000e+00 : f32
    %162 = vector.broadcast %cst_107 : f32 to vector<2x9x32xf32>
    %c1_108 = arith.constant 1 : index
    %c0_109 = arith.constant 0 : index
    %c0_110 = arith.constant 0 : index
    %c0_111 = arith.constant 0 : index
    %163 = vector.load %arg5[%c1_108, %c0_109, %c0_110, %c0_111] : memref<2x2x32x16xf32, #tpu.memory_space<vmem>>, vector<1x1x32x16xf32>
    %164 = vector.shape_cast %163 : vector<1x1x32x16xf32> to vector<32x16xf32>
    %cst_112 = arith.constant dense<0.000000e+00> : vector<18x16xf32>
    %165 = tpu.matmul %161, %164, %cst_112 {dimension_numbers = #tpu.dot_dimension_numbers<[1], [0], [0], [1], [0, 0, 1, 1], [], []>} : vector<18x32xf32>, vector<32x16xf32>, vector<18x16xf32> -> vector<18x16xf32>
    %c1_113 = arith.constant 1 : index
    %c0_114 = arith.constant 0 : index
    %c0_115 = arith.constant 0 : index
    %c0_116 = arith.constant 0 : index
    %166 = vector.load %arg6[%c1_113, %c0_114, %c0_115, %c0_116] : memref<2x2x1x16xf32, #tpu.memory_space<vmem>>, vector<1x1x1x16xf32>
    %167 = vector.shape_cast %166 : vector<1x1x1x16xf32> to vector<1x16xf32>
    %168 = vector.broadcast %167 : vector<1x16xf32> to vector<18x16xf32>
    %169 = arith.addf %165, %168 : vector<18x16xf32>
    %170 = vector.shape_cast %169 : vector<18x16xf32> to vector<2x9x16xf32>
    %c1_117 = arith.constant 1 : index
    %c0_118 = arith.constant 0 : index
    %c0_119 = arith.constant 0 : index
    %c0_120 = arith.constant 0 : index
    %171 = vector.load %arg7[%c1_117, %c0_118, %c0_119, %c0_120] : memref<2x2x32x16xf32, #tpu.memory_space<vmem>>, vector<1x1x32x16xf32>
    %172 = vector.shape_cast %171 : vector<1x1x32x16xf32> to vector<32x16xf32>
    %cst_121 = arith.constant dense<0.000000e+00> : vector<18x16xf32>
    %173 = tpu.matmul %161, %172, %cst_121 {dimension_numbers = #tpu.dot_dimension_numbers<[1], [0], [0], [1], [0, 0, 1, 1], [], []>} : vector<18x32xf32>, vector<32x16xf32>, vector<18x16xf32> -> vector<18x16xf32>
    %c1_122 = arith.constant 1 : index
    %c0_123 = arith.constant 0 : index
    %c0_124 = arith.constant 0 : index
    %c0_125 = arith.constant 0 : index
    %174 = vector.load %arg8[%c1_122, %c0_123, %c0_124, %c0_125] : memref<2x2x1x16xf32, #tpu.memory_space<vmem>>, vector<1x1x1x16xf32>
    %175 = vector.shape_cast %174 : vector<1x1x1x16xf32> to vector<1x16xf32>
    %176 = vector.broadcast %175 : vector<1x16xf32> to vector<18x16xf32>
    %177 = arith.addf %173, %176 : vector<18x16xf32>
    %178 = vector.shape_cast %177 : vector<18x16xf32> to vector<2x9x16xf32>
    %c1_126 = arith.constant 1 : index
    %c0_127 = arith.constant 0 : index
    %c0_128 = arith.constant 0 : index
    %c0_129 = arith.constant 0 : index
    %179 = vector.load %arg9[%c1_126, %c0_127, %c0_128, %c0_129] : memref<2x2x32x32xf32, #tpu.memory_space<vmem>>, vector<1x1x32x32xf32>
    %180 = vector.shape_cast %179 : vector<1x1x32x32xf32> to vector<32x32xf32>
    %cst_130 = arith.constant dense<0.000000e+00> : vector<18x32xf32>
    %181 = tpu.matmul %161, %180, %cst_130 {dimension_numbers = #tpu.dot_dimension_numbers<[1], [0], [0], [1], [0, 0, 1, 1], [], []>} : vector<18x32xf32>, vector<32x32xf32>, vector<18x32xf32> -> vector<18x32xf32>
    %182 = vector.shape_cast %181 : vector<18x32xf32> to vector<2x9x32xf32>
    "tpu.trace_start"() <{level = 10 : i32, message = "bqd,bkd->bqk"}> : () -> ()
    %cst_131 = arith.constant dense<0.000000e+00> : vector<2x9x9xf32>
    %183 = tpu.matmul %170, %178, %cst_131 {dimension_numbers = #tpu.dot_dimension_numbers<[2], [2], [1], [1], [0, 0, 0, 1, 1, 1], [0], [0]>} : vector<2x9x16xf32>, vector<2x9x16xf32>, vector<2x9x9xf32> -> vector<2x9x9xf32>
    "tpu.trace_stop"() : () -> ()
    %cst_132 = arith.constant dense<0xFF800000> : vector<2x9xf32>
    %184 = vector.multi_reduction <maximumf>, %183, %cst_132 [2] : vector<2x9x9xf32> to vector<2x9xf32>
    %185 = vector.shape_cast %184 : vector<2x9xf32> to vector<2x9x1xf32>
    %186 = vector.broadcast %185 : vector<2x9x1xf32> to vector<2x9x9xf32>
    %187 = arith.subf %183, %186 : vector<2x9x9xf32>
    %188 = math.exp %187 : vector<2x9x9xf32>
    %cst_133 = arith.constant dense<0.000000e+00> : vector<2x9xf32>
    %189 = vector.multi_reduction <add>, %188, %cst_133 [2] : vector<2x9x9xf32> to vector<2x9xf32>
    %190 = vector.shape_cast %189 : vector<2x9xf32> to vector<2x9x1xf32>
    %191 = vector.broadcast %190 : vector<2x9x1xf32> to vector<2x9x9xf32>
    %192 = arith.divf %188, %191 : vector<2x9x9xf32>
    "tpu.trace_start"() <{level = 10 : i32, message = "bqk,bkd->bqd"}> : () -> ()
    %cst_134 = arith.constant dense<0.000000e+00> : vector<2x9x32xf32>
    %193 = tpu.matmul %192, %182, %cst_134 {dimension_numbers = #tpu.dot_dimension_numbers<[2], [1], [1], [2], [0, 0, 0, 1, 1, 2], [0], [0]>} : vector<2x9x9xf32>, vector<2x9x32xf32>, vector<2x9x32xf32> -> vector<2x9x32xf32>
    "tpu.trace_stop"() : () -> ()
    %194 = arith.addf %162, %193 : vector<2x9x32xf32>
    %c1_135 = arith.constant 1 : index
    %c1_136 = arith.constant 1 : index
    %c0_137 = arith.constant 0 : index
    %c0_138 = arith.constant 0 : index
    %195 = vector.load %arg5[%c1_135, %c1_136, %c0_137, %c0_138] : memref<2x2x32x16xf32, #tpu.memory_space<vmem>>, vector<1x1x32x16xf32>
    %196 = vector.shape_cast %195 : vector<1x1x32x16xf32> to vector<32x16xf32>
    %cst_139 = arith.constant dense<0.000000e+00> : vector<18x16xf32>
    %197 = tpu.matmul %161, %196, %cst_139 {dimension_numbers = #tpu.dot_dimension_numbers<[1], [0], [0], [1], [0, 0, 1, 1], [], []>} : vector<18x32xf32>, vector<32x16xf32>, vector<18x16xf32> -> vector<18x16xf32>
    %c1_140 = arith.constant 1 : index
    %c1_141 = arith.constant 1 : index
    %c0_142 = arith.constant 0 : index
    %c0_143 = arith.constant 0 : index
    %198 = vector.load %arg6[%c1_140, %c1_141, %c0_142, %c0_143] : memref<2x2x1x16xf32, #tpu.memory_space<vmem>>, vector<1x1x1x16xf32>
    %199 = vector.shape_cast %198 : vector<1x1x1x16xf32> to vector<1x16xf32>
    %200 = vector.broadcast %199 : vector<1x16xf32> to vector<18x16xf32>
    %201 = arith.addf %197, %200 : vector<18x16xf32>
    %202 = vector.shape_cast %201 : vector<18x16xf32> to vector<2x9x16xf32>
    %c1_144 = arith.constant 1 : index
    %c1_145 = arith.constant 1 : index
    %c0_146 = arith.constant 0 : index
    %c0_147 = arith.constant 0 : index
    %203 = vector.load %arg7[%c1_144, %c1_145, %c0_146, %c0_147] : memref<2x2x32x16xf32, #tpu.memory_space<vmem>>, vector<1x1x32x16xf32>
    %204 = vector.shape_cast %203 : vector<1x1x32x16xf32> to vector<32x16xf32>
    %cst_148 = arith.constant dense<0.000000e+00> : vector<18x16xf32>
    %205 = tpu.matmul %161, %204, %cst_148 {dimension_numbers = #tpu.dot_dimension_numbers<[1], [0], [0], [1], [0, 0, 1, 1], [], []>} : vector<18x32xf32>, vector<32x16xf32>, vector<18x16xf32> -> vector<18x16xf32>
    %c1_149 = arith.constant 1 : index
    %c1_150 = arith.constant 1 : index
    %c0_151 = arith.constant 0 : index
    %c0_152 = arith.constant 0 : index
    %206 = vector.load %arg8[%c1_149, %c1_150, %c0_151, %c0_152] : memref<2x2x1x16xf32, #tpu.memory_space<vmem>>, vector<1x1x1x16xf32>
    %207 = vector.shape_cast %206 : vector<1x1x1x16xf32> to vector<1x16xf32>
    %208 = vector.broadcast %207 : vector<1x16xf32> to vector<18x16xf32>
    %209 = arith.addf %205, %208 : vector<18x16xf32>
    %210 = vector.shape_cast %209 : vector<18x16xf32> to vector<2x9x16xf32>
    %c1_153 = arith.constant 1 : index
    %c1_154 = arith.constant 1 : index
    %c0_155 = arith.constant 0 : index
    %c0_156 = arith.constant 0 : index
    %211 = vector.load %arg9[%c1_153, %c1_154, %c0_155, %c0_156] : memref<2x2x32x32xf32, #tpu.memory_space<vmem>>, vector<1x1x32x32xf32>
    %212 = vector.shape_cast %211 : vector<1x1x32x32xf32> to vector<32x32xf32>
    %cst_157 = arith.constant dense<0.000000e+00> : vector<18x32xf32>
    %213 = tpu.matmul %161, %212, %cst_157 {dimension_numbers = #tpu.dot_dimension_numbers<[1], [0], [0], [1], [0, 0, 1, 1], [], []>} : vector<18x32xf32>, vector<32x32xf32>, vector<18x32xf32> -> vector<18x32xf32>
    %214 = vector.shape_cast %213 : vector<18x32xf32> to vector<2x9x32xf32>
    "tpu.trace_start"() <{level = 10 : i32, message = "bqd,bkd->bqk"}> : () -> ()
    %cst_158 = arith.constant dense<0.000000e+00> : vector<2x9x9xf32>
    %215 = tpu.matmul %202, %210, %cst_158 {dimension_numbers = #tpu.dot_dimension_numbers<[2], [2], [1], [1], [0, 0, 0, 1, 1, 1], [0], [0]>} : vector<2x9x16xf32>, vector<2x9x16xf32>, vector<2x9x9xf32> -> vector<2x9x9xf32>
    "tpu.trace_stop"() : () -> ()
    %cst_159 = arith.constant dense<0xFF800000> : vector<2x9xf32>
    %216 = vector.multi_reduction <maximumf>, %215, %cst_159 [2] : vector<2x9x9xf32> to vector<2x9xf32>
    %217 = vector.shape_cast %216 : vector<2x9xf32> to vector<2x9x1xf32>
    %218 = vector.broadcast %217 : vector<2x9x1xf32> to vector<2x9x9xf32>
    %219 = arith.subf %215, %218 : vector<2x9x9xf32>
    %220 = math.exp %219 : vector<2x9x9xf32>
    %cst_160 = arith.constant dense<0.000000e+00> : vector<2x9xf32>
    %221 = vector.multi_reduction <add>, %220, %cst_160 [2] : vector<2x9x9xf32> to vector<2x9xf32>
    %222 = vector.shape_cast %221 : vector<2x9xf32> to vector<2x9x1xf32>
    %223 = vector.broadcast %222 : vector<2x9x1xf32> to vector<2x9x9xf32>
    %224 = arith.divf %220, %223 : vector<2x9x9xf32>
    "tpu.trace_start"() <{level = 10 : i32, message = "bqk,bkd->bqd"}> : () -> ()
    %cst_161 = arith.constant dense<0.000000e+00> : vector<2x9x32xf32>
    %225 = tpu.matmul %224, %214, %cst_161 {dimension_numbers = #tpu.dot_dimension_numbers<[2], [1], [1], [2], [0, 0, 0, 1, 1, 2], [0], [0]>} : vector<2x9x9xf32>, vector<2x9x32xf32>, vector<2x9x32xf32> -> vector<2x9x32xf32>
    "tpu.trace_stop"() : () -> ()
    %226 = arith.addf %194, %225 : vector<2x9x32xf32>
    %227 = vector.shape_cast %226 : vector<2x9x32xf32> to vector<18x32xf32>
    %c1_162 = arith.constant 1 : index
    %c0_163 = arith.constant 0 : index
    %c0_164 = arith.constant 0 : index
    %228 = vector.load %arg10[%c1_162, %c0_163, %c0_164] : memref<2x1x32xf32, #tpu.memory_space<vmem>>, vector<1x1x32xf32>
    %229 = vector.shape_cast %228 : vector<1x1x32xf32> to vector<1x32xf32>
    %230 = vector.broadcast %229 : vector<1x32xf32> to vector<18x32xf32>
    %231 = arith.addf %227, %230 : vector<18x32xf32>
    %232 = arith.addf %161, %231 : vector<18x32xf32>
    %c1_165 = arith.constant 1 : index
    %c0_166 = arith.constant 0 : index
    %c0_167 = arith.constant 0 : index
    %233 = vector.load %arg11[%c1_165, %c0_166, %c0_167] : memref<2x1x32xf32, #tpu.memory_space<vmem>>, vector<1x1x32xf32>
    %234 = vector.shape_cast %233 : vector<1x1x32xf32> to vector<1x32xf32>
    %c1_168 = arith.constant 1 : index
    %c0_169 = arith.constant 0 : index
    %c0_170 = arith.constant 0 : index
    %235 = vector.load %arg12[%c1_168, %c0_169, %c0_170] : memref<2x1x32xf32, #tpu.memory_space<vmem>>, vector<1x1x32xf32>
    %236 = vector.shape_cast %235 : vector<1x1x32xf32> to vector<1x32xf32>
    %cst_171 = arith.constant dense<0.000000e+00> : vector<18xf32>
    %237 = vector.multi_reduction <add>, %232, %cst_171 [1] : vector<18x32xf32> to vector<18xf32>
    %238 = vector.shape_cast %237 : vector<18xf32> to vector<18x1xf32>
    %cst_172 = arith.constant 3.200000e+01 : f32
    %239 = vector.broadcast %cst_172 : f32 to vector<18x1xf32>
    %240 = arith.divf %238, %239 : vector<18x1xf32>
    %241 = vector.broadcast %240 : vector<18x1xf32> to vector<18x32xf32>
    %242 = arith.subf %232, %241 : vector<18x32xf32>
    %243 = arith.mulf %242, %242 : vector<18x32xf32>
    %cst_173 = arith.constant dense<0.000000e+00> : vector<18xf32>
    %244 = vector.multi_reduction <add>, %243, %cst_173 [1] : vector<18x32xf32> to vector<18xf32>
    %245 = vector.shape_cast %244 : vector<18xf32> to vector<18x1xf32>
    %cst_174 = arith.constant 3.200000e+01 : f32
    %246 = vector.broadcast %cst_174 : f32 to vector<18x1xf32>
    %247 = arith.divf %245, %246 : vector<18x1xf32>
    %248 = vector.broadcast %240 : vector<18x1xf32> to vector<18x32xf32>
    %249 = arith.subf %232, %248 : vector<18x32xf32>
    %cst_175 = arith.constant 9.99999974E-6 : f32
    %250 = vector.broadcast %cst_175 : f32 to vector<18x1xf32>
    %251 = arith.addf %247, %250 : vector<18x1xf32>
    %252 = math.rsqrt %251 : vector<18x1xf32>
    %253 = vector.broadcast %252 : vector<18x1xf32> to vector<18x32xf32>
    %254 = arith.mulf %249, %253 : vector<18x32xf32>
    %255 = vector.broadcast %234 : vector<1x32xf32> to vector<18x32xf32>
    %256 = arith.mulf %254, %255 : vector<18x32xf32>
    %257 = vector.broadcast %236 : vector<1x32xf32> to vector<18x32xf32>
    %258 = arith.addf %256, %257 : vector<18x32xf32>
    %c1_176 = arith.constant 1 : index
    %c0_177 = arith.constant 0 : index
    %c0_178 = arith.constant 0 : index
    %259 = vector.load %arg13[%c1_176, %c0_177, %c0_178] : memref<2x32x32xf32, #tpu.memory_space<vmem>>, vector<1x32x32xf32>
    %260 = vector.shape_cast %259 : vector<1x32x32xf32> to vector<32x32xf32>
    %cst_179 = arith.constant dense<0.000000e+00> : vector<18x32xf32>
    %261 = tpu.matmul %258, %260, %cst_179 {dimension_numbers = #tpu.dot_dimension_numbers<[1], [0], [0], [1], [0, 0, 1, 1], [], []>} : vector<18x32xf32>, vector<32x32xf32>, vector<18x32xf32> -> vector<18x32xf32>
    %c1_180 = arith.constant 1 : index
    %c0_181 = arith.constant 0 : index
    %c0_182 = arith.constant 0 : index
    %262 = vector.load %arg14[%c1_180, %c0_181, %c0_182] : memref<2x1x32xf32, #tpu.memory_space<vmem>>, vector<1x1x32xf32>
    %263 = vector.shape_cast %262 : vector<1x1x32xf32> to vector<1x32xf32>
    %264 = vector.broadcast %263 : vector<1x32xf32> to vector<18x32xf32>
    %265 = arith.addf %261, %264 : vector<18x32xf32>
    %cst_183 = arith.constant 0.000000e+00 : f32
    %266 = vector.broadcast %cst_183 : f32 to vector<18x32xf32>
    %267 = arith.maximumf %265, %266 : vector<18x32xf32>
    %c1_184 = arith.constant 1 : index
    %c0_185 = arith.constant 0 : index
    %c0_186 = arith.constant 0 : index
    %268 = vector.load %arg15[%c1_184, %c0_185, %c0_186] : memref<2x32x32xf32, #tpu.memory_space<vmem>>, vector<1x32x32xf32>
    %269 = vector.shape_cast %268 : vector<1x32x32xf32> to vector<32x32xf32>
    %cst_187 = arith.constant dense<0.000000e+00> : vector<18x32xf32>
    %270 = tpu.matmul %267, %269, %cst_187 {dimension_numbers = #tpu.dot_dimension_numbers<[1], [0], [0], [1], [0, 0, 1, 1], [], []>} : vector<18x32xf32>, vector<32x32xf32>, vector<18x32xf32> -> vector<18x32xf32>
    %c1_188 = arith.constant 1 : index
    %c0_189 = arith.constant 0 : index
    %c0_190 = arith.constant 0 : index
    %271 = vector.load %arg16[%c1_188, %c0_189, %c0_190] : memref<2x1x32xf32, #tpu.memory_space<vmem>>, vector<1x1x32xf32>
    %272 = vector.shape_cast %271 : vector<1x1x32xf32> to vector<1x32xf32>
    %273 = vector.broadcast %272 : vector<1x32xf32> to vector<18x32xf32>
    %274 = arith.addf %270, %273 : vector<18x32xf32>
    %cst_191 = arith.constant 0.000000e+00 : f32
    %275 = vector.broadcast %cst_191 : f32 to vector<18x32xf32>
    %276 = arith.maximumf %274, %275 : vector<18x32xf32>
    %277 = arith.addf %258, %276 : vector<18x32xf32>
    %c1_192 = arith.constant 1 : index
    %c0_193 = arith.constant 0 : index
    %c0_194 = arith.constant 0 : index
    %278 = vector.load %arg17[%c1_192, %c0_193, %c0_194] : memref<2x1x32xf32, #tpu.memory_space<vmem>>, vector<1x1x32xf32>
    %279 = vector.shape_cast %278 : vector<1x1x32xf32> to vector<1x32xf32>
    %c1_195 = arith.constant 1 : index
    %c0_196 = arith.constant 0 : index
    %c0_197 = arith.constant 0 : index
    %280 = vector.load %arg18[%c1_195, %c0_196, %c0_197] : memref<2x1x32xf32, #tpu.memory_space<vmem>>, vector<1x1x32xf32>
    %281 = vector.shape_cast %280 : vector<1x1x32xf32> to vector<1x32xf32>
    %cst_198 = arith.constant dense<0.000000e+00> : vector<18xf32>
    %282 = vector.multi_reduction <add>, %277, %cst_198 [1] : vector<18x32xf32> to vector<18xf32>
    %283 = vector.shape_cast %282 : vector<18xf32> to vector<18x1xf32>
    %cst_199 = arith.constant 3.200000e+01 : f32
    %284 = vector.broadcast %cst_199 : f32 to vector<18x1xf32>
    %285 = arith.divf %283, %284 : vector<18x1xf32>
    %286 = vector.broadcast %285 : vector<18x1xf32> to vector<18x32xf32>
    %287 = arith.subf %277, %286 : vector<18x32xf32>
    %288 = arith.mulf %287, %287 : vector<18x32xf32>
    %cst_200 = arith.constant dense<0.000000e+00> : vector<18xf32>
    %289 = vector.multi_reduction <add>, %288, %cst_200 [1] : vector<18x32xf32> to vector<18xf32>
    %290 = vector.shape_cast %289 : vector<18xf32> to vector<18x1xf32>
    %cst_201 = arith.constant 3.200000e+01 : f32
    %291 = vector.broadcast %cst_201 : f32 to vector<18x1xf32>
    %292 = arith.divf %290, %291 : vector<18x1xf32>
    %293 = vector.broadcast %285 : vector<18x1xf32> to vector<18x32xf32>
    %294 = arith.subf %277, %293 : vector<18x32xf32>
    %cst_202 = arith.constant 9.99999974E-6 : f32
    %295 = vector.broadcast %cst_202 : f32 to vector<18x1xf32>
    %296 = arith.addf %292, %295 : vector<18x1xf32>
    %297 = math.rsqrt %296 : vector<18x1xf32>
    %298 = vector.broadcast %297 : vector<18x1xf32> to vector<18x32xf32>
    %299 = arith.mulf %294, %298 : vector<18x32xf32>
    %300 = vector.broadcast %279 : vector<1x32xf32> to vector<18x32xf32>
    %301 = arith.mulf %299, %300 : vector<18x32xf32>
    %302 = vector.broadcast %281 : vector<1x32xf32> to vector<18x32xf32>
    %303 = arith.addf %301, %302 : vector<18x32xf32>
    %304 = vector.shape_cast %303 : vector<18x32xf32> to vector<2x9x32xf32>
    %305 = vector.extract_strided_slice %304 {offsets = [0, 0, 0], sizes = [2, 1, 32], strides = [1, 1, 1]} : vector<2x9x32xf32> to vector<2x1x32xf32>
    %306 = vector.shape_cast %305 : vector<2x1x32xf32> to vector<2x32xf32>
    %c0_203 = arith.constant 0 : index
    %c0_204 = arith.constant 0 : index
    %307 = vector.load %arg19[%c0_203, %c0_204] : memref<32x4xf32, #tpu.memory_space<vmem>>, vector<32x4xf32>
    %cst_205 = arith.constant dense<0.000000e+00> : vector<2x4xf32>
    %308 = tpu.matmul %306, %307, %cst_205 {dimension_numbers = #tpu.dot_dimension_numbers<[1], [0], [0], [1], [0, 0, 1, 1], [], []>} : vector<2x32xf32>, vector<32x4xf32>, vector<2x4xf32> -> vector<2x4xf32>
    %c0_206 = arith.constant 0 : index
    %c0_207 = arith.constant 0 : index
    %309 = vector.load %arg20[%c0_206, %c0_207] : memref<1x4xf32, #tpu.memory_space<vmem>>, vector<1x4xf32>
    %310 = vector.broadcast %309 : vector<1x4xf32> to vector<2x4xf32>
    %311 = arith.addf %308, %310 : vector<2x4xf32>
    %c0_208 = arith.constant 0 : index
    %c0_209 = arith.constant 0 : index
    %312 = vector.load %arg21[%c0_208, %c0_209] : memref<2x4xf32, #tpu.memory_space<vmem>>, vector<2x4xf32>
    tpu.vector_store %arg21[%c0_208, %c0_209], %311 {strides = array<i32>} : memref<2x4xf32, #tpu.memory_space<vmem>>, vector<2x4xf32>,
    return
  }
}

</mosaic_0001>

<bundles_post_ra>
// kernel: tpu_custom_call.1
= control target key start
LH: loop header
LB: loop body
LE: loop exit
PB: predicated region body
PF: predicated region fallthrough
CT: control target
= control target key end

     0   :  { %s14293_s0 = inlined_call_operand.vmem [shape: f32[2,8,16], index: 0, kind: input, shape index: {}]   ;;  %s14294_s1 = inlined_call_operand.vmem [shape: f32[16,32], index: 1, kind: input, shape index: {}]   ;;  %s14295_s2 = inlined_call_operand.vmem [shape: f32[1,32], index: 2, kind: input, shape index: {}]   ;;  %s14296_s3 = inlined_call_operand.vmem [shape: f32[1,32], index: 3, kind: input, shape index: {}]   ;;  %s14297_s4 = inlined_call_operand.vmem [shape: f32[9,32], index: 4, kind: input, shape index: {}]   ;;  %s14298_s5 = inlined_call_operand.vmem [shape: f32[2,2,32,16], index: 5, kind: input, shape index: {}]   ;;  %s14299_s6 = inlined_call_operand.vmem [shape: f32[2,2,1,16], index: 6, kind: input, shape index: {}]   ;;  %s14300_s7 = inlined_call_operand.vmem [shape: f32[2,2,32,16], index: 7, kind: input, shape index: {}]   ;;  %s14301_s8 = inlined_call_operand.vmem [shape: f32[2,2,1,16], index: 8, kind: input, shape index: {}]   ;;  %s14302_s9 = inlined_call_operand.vmem [shape: f32[2,2,32,32], index: 9, kind: input, shape index: {}]   ;;  %s14303_s10 = inlined_call_operand.vmem [shape: f32[2,1,32], index: 10, kind: input, shape index: {}]   ;;  %s14304_s11 = inlined_call_operand.vmem [shape: f32[2,1,32], index: 11, kind: input, shape index: {}]   ;;  %s14305_s12 = inlined_call_operand.vmem [shape: f32[2,1,32], index: 12, kind: input, shape index: {}]   ;;  %s14306_s13 = inlined_call_operand.vmem [shape: f32[2,32,32], index: 13, kind: input, shape index: {}]   ;;  %s14307_s14 = inlined_call_operand.vmem [shape: f32[2,1,32], index: 14, kind: input, shape index: {}]   ;;  %s14308_s15 = inlined_call_operand.vmem [shape: f32[2,32,32], index: 15, kind: input, shape index: {}]   ;;  %s14309_s16 = inlined_call_operand.vmem [shape: f32[2,1,32], index: 16, kind: input, shape index: {}]   ;;  %s14310_s17 = inlined_call_operand.vmem [shape: f32[2,1,32], index: 17, kind: input, shape index: {}]   ;;  %s14311_s18 = inlined_call_operand.vmem [shape: f32[2,1,32], index: 18, kind: input, shape index: {}]   ;;  %s14312_s19 = inlined_call_operand.vmem [shape: f32[32,4], index: 19, kind: input, shape index: {}]   ;;  %s14313_s20 = inlined_call_operand.vmem [shape: f32[1,4], index: 20, kind: input, shape index: {}]   ;;  %s14314_s21 = inlined_call_operand.hbm [shape: f32[2,4], index: 21, kind: output, shape index: {}]  }
   0x1   :  { %14340 = sst [smem:[#allocation14_spill]] %s14293_s0 }
   0x2   :  { %14341 = sst [smem:[#allocation15_spill]] %s14294_s1 }
   0x3   :  { %14342 = sst [smem:[#allocation16_spill]] %s14295_s2 }
   0x4   :  { %14343 = sst [smem:[#allocation17_spill]] %s14296_s3 }
   0x5   :  { %14344 = sst [smem:[#allocation18_spill]] %s14297_s4 }
   0x6   :  { %14345 = sst [smem:[#allocation19_spill]] %s14298_s5 }
   0x7   :  { %s14346_s26 = sld [smem:[#allocation15_spill]]  ;;  %vm80_vm0 = vcmask 130048  }
   0x8   :  { %s14347_s0 = sld [smem:[#allocation14_spill]] }
   0xd   :  { %v72_v0 = vld [vmem:[%s14346_s26 + $0x8] sm:$0xff]  ;;  %v71_v1 = vld [vmem:[%s14346_s26] sm:$0xff] }
   0xe   :  { %v69_v2 = vld [vmem:[%s14347_s0] sm:$0xff]  ;;  %10682 = vmatprep.subr.mxu0 %v72_v0 }
   0xf   :  { %10686 = vmatprep.mubr.msk.f32.mxu0 %vm80_vm0, %v69_v2 }
  0x10   :  { %26 = vsyncpa [#allocation3], 0  ;;  %10683 = vmatpush3.msra.mxu0 %v72_v0  ;;  %v70_v3 = vld [vmem:[%s14347_s0 + $0x8] sm:$0xff]  ;;  %v14319_v4 = vmov 0.0   ;;  %s14348_s23 = sld [smem:[#allocation19_spill]]  ;;  %v660_v6 = vld [vmem:[%s14300_s7 + $0x18] sm:$0xff]  ;;  %v183_v15 = vlaneseq }
  0x11   :  { %10684 = vmatprep.subr.mxu0 %v71_v1  ;;  %10689 = vmatprep.subr.mxu1 %v14319_v4  ;;  %v659_v8 = vld [vmem:[%s14300_s7 + $0x10] sm:$0xff]  ;;  %v658_v10 = vld [vmem:[%s14300_s7 + $0x8] sm:$0xff]  ;;  %v657_v12 = vld [vmem:[%s14300_s7] sm:$0xff]  ;;  %vm11197_vm1 = vmmov 0   ;;  %v11198_v13 = vmov 1966171168  }
  0x12   :  { %10685 = vmatpush3.msra.mxu0 %v71_v1  ;;  %10697 = vmatprep.mubr.msk.f32.mxu1 %vm11197_vm1, %v14319_v4  ;;  %v181_v14 = vunpack.c.l.s4 %v11198_v13  ;;  %s14349_s2 = sld [smem:[#allocation16_spill]]  ;;  %v11373_v22 = vshrl.u32 %v183_v15, 7  ;;  %vm174_vm2 = vcmask 1040384   ;;  %vm447_vm3 = vcmask 261120  }
  0x13   :  { %10687 = vmatmul.mubr.msk.f32.vlgmr.msra.gmra.mxu0 %vm80_vm0, %v70_v3  ;;  %10706 = vmatprep.subr.mxu0 %v14319_v4  ;;  %s14350_s27 = sld [smem:[#allocation18_spill]]  ;;  %vm1500_vm4 = vcmask 65536   ;;  %vm1496_vm5 = vcmask 72704   ;;  %vm3621_vm6 = vcmask 254976   ;;  %vm10267_vm7 = vcmask 25600  }
  0x14   :  { %10707 = vmatpush3.msra.mxu0 %v660_v6  ;;  %10714 = vmatprep.mubr.msk.f32.mxu0 %vm11197_vm1, %v14319_v4  ;;  %s14351_s29 = sld [smem:[#allocation17_spill]]  ;;  %v182_v21 = vunpack.c.0.s8 %v181_v14 }
  0x15   :  { %10708 = vmatprep.subr.mxu0 %v14319_v4 }
  0x16   :  { %v326_v5 = vld [vmem:[%s14348_s23 + $0x18] sm:$0xff]  ;;  %v325_v7 = vld [vmem:[%s14348_s23 + $0x10] sm:$0xff]  ;;  %10709 = vmatpush3.msra.mxu0 %v659_v8  ;;  %v324_v9 = vld [vmem:[%s14348_s23 + $0x8] sm:$0xff]  ;;  %v11376_v28 = vsub.s32 %v182_v21, %v11373_v22 }
  0x17   :  { %10690 = vmatpush3.msra.mxu1 %v326_v5  ;;  %10710 = vmatprep.subr.mxu0 %v14319_v4  ;;  %v323_v11 = vld [vmem:[%s14348_s23] sm:$0xff] }
  0x18   :  { %10691 = vmatprep.subr.mxu1 %v14319_v4  ;;  %10711 = vmatpush3.msra.mxu0 %v658_v10  ;;  %v10283_v16 = vld [vmem:[%s14349_s2] ss:$0 sm:$0xff] }
  0x19   :  { %10692 = vmatpush3.msra.mxu1 %v325_v7  ;;  %10712 = vmatprep.subr.mxu0 %v14319_v4  ;;  %v162_v18 = vld [vmem:[%s14350_s27 + $0x1] sm:$0xff]  ;;  %v166_v20 = vld [vmem:[%s14350_s27] sm:$0x1] }
  0x1a   :  { %10693 = vmatprep.subr.mxu1 %v14319_v4  ;;  %10713 = vmatpush3.msra.mxu0 %v657_v12  ;;  %v165_v19 = vld [vmem:[%s14351_s29] sm:$0x1] }
  0x1b   :  { %10694 = vmatpush3.msra.mxu1 %v324_v9  ;;  %v167_v26 = vadd.f32 %v166_v20, %v165_v19 }
  0x1c   :  { %10695 = vmatprep.subr.mxu1 %v14319_v4 }
  0x1d   :  { %10696 = vmatpush3.msra.mxu1 %v323_v11 }
  0x1e   :  { %10723 = vmatprep.subr.mxu1 %v14319_v4 }
  0xd3   :  { %v10688_v17 = vpop.f32.mrf.mxu0 }
  0xd4   :  { %v159_v23 = vadd.f32 %v10688_v17, %v10283_v16 }
  0xd5   :  { %v153_v24 = vpop.f32.mrf.mxu0 }
  0xd6   :  { %v164_v25 = vadd.f32 %v162_v18, %v159_v23  ;;  %v154_v27 = vadd.f32 %v10283_v16, %v153_v24  ;;  %v874_v23 = vld [vmem:[%s14302_s9 + $0x18] sm:$0xff] }
  0xd8   :  { %v171_v29 = vrot.slane %v164_v25, 7  ;;  %v163_v30 = vadd.f32 %v162_v18, %v154_v27  ;;  %v873_v27 = vld [vmem:[%s14302_s9 + $0x10] sm:$0xff] }
  0xda   :  { %v176_v31 = vsel %vm174_vm2, %v167_v26, %v171_v29  ;;  %v170_v32 = vrot.slane %v163_v30, 7  ;;  %v297_v6 = vrot.slane %v171_v29, %v11376_v28  ;;  %v872_v30 = vld [vmem:[%s14302_s9 + $0x8] sm:$0xff] }
  0xdb   :  { %v242_v33 = vcombine.high %v176_v31, %v176_v31  ;;  %v249_v34 = vrot.slane %v176_v31, %v11376_v28  ;;  %v871_v31 = vld [vmem:[%s14302_s9] sm:$0xff] }
  0xdc   :  { %v175_v35 = vsel %vm174_vm2, %v167_v26, %v170_v32  ;;  %v234_v36 = vrot.slane %v170_v32, %v11376_v28  ;;  %v11454_v15 = vrot.slane %v297_v6, %v11376_v28  ;;  %v10314_v32 = vld [vmem:[%s14348_s23 + $0x38] sm:$0xff] }
  0xdd   :  { %v256_v37 = vrot.slane %v242_v33, %v11376_v28  ;;  %v257_v38 = vcombine.high %v249_v34, %v249_v34  ;;  %v11384_v39 = vrot.slane %v249_v34, %v11376_v28  ;;  %v179_v40 = vcombine.high %v175_v35, %v175_v35  ;;  %v10313_v33 = vld [vmem:[%s14348_s23 + $0x30] sm:$0xff]  ;;  %v10312_v34 = vld [vmem:[%s14348_s23 + $0x28] sm:$0xff] }
  0xde   :  { %v186_v41 = vrot.slane %v175_v35, %v11376_v28  ;;  %v11388_v42 = vrot.slane %v234_v36, %v11376_v28  ;;  %v10311_v35 = vld [vmem:[%s14348_s23 + $0x20] sm:$0xff]  ;;  %v10332_v36 = vld [vmem:[%s14302_s9 + $0x38] sm:$0xff] }
  0xdf   :  { %v258_v43 = vcombine.high %v256_v37, %v256_v37  ;;  %v11391_v44 = vrot.slane %v256_v37, %v11376_v28  ;;  %v11394_v45 = vrot.slane %v257_v38, %v11376_v28  ;;  %v11398_v46 = vcombine.high %v11384_v39, %v11384_v39  ;;  %v10331_v37 = vld [vmem:[%s14302_s9 + $0x30] sm:$0xff]  ;;  %v10330_v38 = vld [vmem:[%s14302_s9 + $0x28] sm:$0xff] }
  0xe0   :  { %v193_v47 = vrot.slane %v179_v40, %v11376_v28  ;;  %v194_v48 = vcombine.high %v186_v41, %v186_v41  ;;  %v11413_v53 = vrot.slane %v186_v41, %v11376_v28  ;;  %v383_v57 = vcombine.low %v11388_v42, %v11384_v39  ;;  %v10329_v40 = vld [vmem:[%s14302_s9 + $0x20] sm:$0xff] }
  0xe1   :  { %v11402_v49 = vrot.slane %v258_v43, %v11376_v28  ;;  %v11406_v50 = vcombine.high %v11391_v44, %v11391_v44  ;;  %v11410_v51 = vcombine.high %v11394_v45, %v11394_v45  ;;  %v384_v58 = vcombine.low %v11394_v45, %v11398_v46  ;;  %v10286_v41 = vld [vmem:[%s14299_s6] ss:$0 sm:$0xff] }
  0xe2   :  { %v195_v52 = vcombine.high %v193_v47, %v193_v47  ;;  %v11416_v54 = vrot.slane %v194_v48, %v11376_v28  ;;  %v11427_v59 = vrot.slane %v193_v47, %v11376_v28  ;;  %v393_v7 = vrot.slane %v383_v57, %v11376_v28  ;;  %v11579_v43 = vld [vmem:[%s14301_s8] ss:$0 sm:$0xff] }
  0xe3   :  { %v385_v55 = vcombine.low %v11410_v51, %v11391_v44  ;;  %v386_v56 = vcombine.low %v11402_v49, %v11406_v50  ;;  %v400_v10 = vrot.slane %v384_v58, %v11376_v28  ;;  %v11451_v12 = vcombine.high %v11402_v49, %v11402_v49 }
  0xe4   :  { %v11430_v60 = vrot.slane %v195_v52, %v11376_v28  ;;  %v334_v61 = vcombine.low %v11413_v53, %v11416_v54  ;;  %v10287_v62 = vcombine.high %v11413_v53, %v11416_v54 }
  0xe5   :  { %v407_v63 = vrot.slane %v385_v55, %v11376_v28  ;;  %v414_v0 = vrot.slane %v386_v56, %v11376_v28  ;;  %v415_v16 = vcombine.low %v393_v7, %v400_v10  ;;  %v432_v19 = vcombine.low %v11451_v12, %v11454_v15 }
  0xe6   :  { %v336_v1 = vcombine.low %v11427_v59, %v11430_v60  ;;  %v10288_v2 = vcombine.high %v11427_v59, %v11430_v60  ;;  %v344_v3 = vrot.slane %v334_v61, %v11376_v28  ;;  %v351_v5 = vrot.slane %v10287_v62, %v11376_v28 }
  0xe7   :  { %v416_v13 = vcombine.low %v407_v63, %v414_v0  ;;  %v423_v24 = vrot.slane %v415_v16, %v11376_v28  ;;  %v439_v25 = vrot.slane %v432_v19, %v11376_v28 }
  0xe8   :  { %v358_v8 = vrot.slane %v336_v1, %v11376_v28  ;;  %v365_v9 = vrot.slane %v10288_v2, %v11376_v28  ;;  %v366_v11 = vcombine.low %v344_v3, %v351_v5 }
  0xe9   :  { %v430_v20 = vrot.slane %v416_v13, %v11376_v28  ;;  %v11491_v29 = vrot.slane %v439_v25, %v11376_v28 }
  0xea   :  { %v367_v14 = vcombine.low %v358_v8, %v365_v9  ;;  %v374_v17 = vrot.slane %v366_v11, %v11376_v28 }
  0xeb   :  { %v11476_v26 = vcombine.low %v423_v24, %v430_v20 }
  0xec   :  { %v381_v18 = vrot.slane %v367_v14, %v11376_v28 }
  0xee   :  { %v11461_v21 = vcombine.low %v374_v17, %v381_v18 }
  0xf0   :  { %10698 = vmatmul.mubr.msk.f32.vlgmr.msra.gmra.mxu1 %vm447_vm3, %v11461_v21  ;;  %10715 = vmatmul.mubr.msk.f32.vlgmr.msra.gmra.mxu0 %vm447_vm3, %v11461_v21 }
  0xf1   :  { %10700 = vmatprep.mubr.msk.f32.mxu1 %vm11197_vm1, %v14319_v4  ;;  %10717 = vmatprep.mubr.msk.f32.mxu0 %vm11197_vm1, %v14319_v4 }
  0xf2   :  { %10724 = vmatpush3.msra.mxu1 %v874_v23 }
  0xf3   :  { %10725 = vmatprep.subr.mxu1 %v14319_v4 }
  0xf4   :  { %10701 = vmatmul.mubr.msk.f32.gmra.mxu1 %vm447_vm3, %v11476_v26  ;;  %10718 = vmatmul.mubr.msk.f32.gmra.mxu0 %vm447_vm3, %v11476_v26 }
  0xf5   :  { %10703 = vmatprep.mubr.msk.f32.mxu1 %vm11197_vm1, %v14319_v4  ;;  %10720 = vmatprep.mubr.msk.f32.mxu0 %vm11197_vm1, %v14319_v4 }
  0xf6   :  { %10726 = vmatpush3.msra.mxu1 %v873_v27 }
  0xf7   :  { %10727 = vmatprep.subr.mxu1 %v14319_v4 }
  0xf8   :  { %10704 = vmatmul.mubr.msk.f32.gmra.mxu1 %vm447_vm3, %v11491_v29  ;;  %10721 = vmatmul.mubr.msk.f32.gmra.mxu0 %vm447_vm3, %v11491_v29 }
  0xf9   :  { %10728 = vmatpush3.msra.mxu1 %v872_v30  ;;  %10731 = vmatprep.mubr.msk.f32.mxu1 %vm11197_vm1, %v14319_v4 }
  0xfa   :  { %10729 = vmatprep.subr.mxu1 %v14319_v4 }
  0xfb   :  { %10730 = vmatpush3.msra.mxu1 %v871_v31 }
  0xfc   :  { %10732 = vmatmul.mubr.msk.f32.vlgmr.msra.gmra.mxu1 %vm447_vm3, %v11461_v21  ;;  %10754 = vmatprep.subr.mxu1 %v14319_v4 }
  0xfd   :  { %10734 = vmatprep.mubr.msk.f32.mxu1 %vm11197_vm1, %v14319_v4  ;;  %10755 = vmatpush3.msra.mxu1 %v10314_v32 }
  0xfe   :  { %10756 = vmatprep.subr.mxu1 %v14319_v4 }
  0xff   :  { %10757 = vmatpush3.msra.mxu1 %v10313_v33 }
 0x100   :  { %10735 = vmatmul.mubr.msk.f32.gmra.mxu1 %vm447_vm3, %v11476_v26  ;;  %10758 = vmatprep.subr.mxu1 %v14319_v4 }
 0x101   :  { %10737 = vmatprep.mubr.msk.f32.mxu1 %vm11197_vm1, %v14319_v4  ;;  %10759 = vmatpush3.msra.mxu1 %v10312_v34 }
 0x102   :  { %10760 = vmatprep.subr.mxu1 %v14319_v4 }
 0x103   :  { %10761 = vmatpush3.msra.mxu1 %v10311_v35 }
 0x104   :  { %10738 = vmatmul.mubr.msk.f32.gmra.mxu1 %vm447_vm3, %v11491_v29  ;;  %10788 = vmatprep.subr.mxu1 %v14319_v4 }
 0x105   :  { %10762 = vmatprep.mubr.msk.f32.mxu1 %vm11197_vm1, %v14319_v4 }
 0x108   :  { %10763 = vmatmul.mubr.msk.f32.vlgmr.msra.gmra.mxu1 %vm447_vm3, %v11461_v21 }
 0x109   :  { %10765 = vmatprep.mubr.msk.f32.mxu1 %vm11197_vm1, %v14319_v4  ;;  %10789 = vmatpush3.msra.mxu1 %v10332_v36 }
 0x10a   :  { %10790 = vmatprep.subr.mxu1 %v14319_v4 }
 0x10b   :  { %10791 = vmatpush3.msra.mxu1 %v10331_v37 }
 0x10c   :  { %10766 = vmatmul.mubr.msk.f32.gmra.mxu1 %vm447_vm3, %v11476_v26  ;;  %10792 = vmatprep.subr.mxu1 %v14319_v4 }
 0x10d   :  { %10768 = vmatprep.mubr.msk.f32.mxu1 %vm11197_vm1, %v14319_v4  ;;  %10793 = vmatpush3.msra.mxu1 %v10330_v38 }
 0x10e   :  { %10794 = vmatprep.subr.mxu1 %v14319_v4 }
 0x10f   :  { %10795 = vmatpush3.msra.mxu1 %v10329_v40 }
 0x110   :  { %10769 = vmatmul.mubr.msk.f32.gmra.mxu1 %vm447_vm3, %v11491_v29 }
 0x111   :  { %10796 = vmatprep.mubr.msk.f32.mxu1 %vm11197_vm1, %v14319_v4 }
 0x114   :  { %10797 = vmatmul.mubr.msk.f32.vlgmr.msra.gmra.mxu1 %vm447_vm3, %v11461_v21 }
 0x115   :  { %10799 = vmatprep.mubr.msk.f32.mxu1 %vm11197_vm1, %v14319_v4 }
 0x118   :  { %10800 = vmatmul.mubr.msk.f32.gmra.mxu1 %vm447_vm3, %v11476_v26 }
 0x119   :  { %10802 = vmatprep.mubr.msk.f32.mxu1 %vm11197_vm1, %v14319_v4 }
 0x11c   :  { %10803 = vmatmul.mubr.msk.f32.gmra.mxu1 %vm447_vm3, %v11491_v29 }
 0x1b0   :  { %v520_v47 = vpop.f32.mrf.mxu1  ;;  %v734_v48 = vpop.f32.mrf.mxu0 }
 0x1b1   :  { %v521_v52 = vadd.f32 %v10286_v41, %v520_v47  ;;  %v735_v55 = vadd.f32 %v11579_v43, %v734_v48 }
 0x1b2   :  { %v10699_v56 = vpop.f32.mrf.mxu1  ;;  %v10716_v57 = vpop.f32.mrf.mxu0 }
 0x1b3   :  { %v537_v58 = vcombine.high %v521_v52, %v521_v52  ;;  %v544_v61 = vrot.slane %v521_v52, %v11376_v28  ;;  %v751_v0 = vcombine.high %v735_v55, %v735_v55  ;;  %v758_v5 = vrot.slane %v735_v55, %v11376_v28 }
 0x1b4   :  { %v525_v62 = vpop.f32.mrf.mxu1  ;;  %v739_v63 = vpop.f32.mrf.mxu0 }
 0x1b5   :  { %v526_v1 = vadd.f32 %v10286_v41, %v525_v62  ;;  %v551_v6 = vrot.slane %v537_v58, %v11376_v28  ;;  %v552_v7 = vcombine.high %v544_v61, %v544_v61  ;;  %v765_v11 = vrot.slane %v751_v0, %v11376_v28 }
 0x1b6   :  { %v10702_v2 = vpop.f32.mrf.mxu1  ;;  %v10719_v3 = vpop.f32.mrf.mxu0  ;;  %v766_v16 = vcombine.high %v758_v5, %v758_v5  ;;  %v740_v18 = vadd.f32 %v11579_v43, %v739_v63  ;;  %v560_v24 = vrot.slane %v544_v61, %v11376_v28  ;;  %v774_v40 = vrot.slane %v758_v5, %v11376_v28 }
 0x1b7   :  { %v586_v8 = vcombine.high %v526_v1, %v526_v1  ;;  %v553_v19 = vcombine.high %v551_v6, %v551_v6  ;;  %v574_v20 = vrot.slane %v552_v7, %v11376_v28  ;;  %v767_v25 = vcombine.high %v765_v11, %v765_v11 }
 0x1b8   :  { %v530_v9 = vpop.f32.mrf.mxu1  ;;  %v744_v10 = vpop.f32.mrf.mxu0  ;;  %v593_v27 = vrot.slane %v526_v1, %v11376_v28  ;;  %v788_v31 = vrot.slane %v766_v16, %v11376_v28  ;;  %v800_v33 = vcombine.high %v740_v18, %v740_v18  ;;  %v807_v36 = vrot.slane %v740_v18, %v11376_v28 }
 0x1b9   :  { %v600_v17 = vrot.slane %v586_v8, %v11376_v28  ;;  %v581_v34 = vrot.slane %v553_v19, %v11376_v28  ;;  %v1078_v35 = vcombine.low %v560_v24, %v574_v20  ;;  %v567_v38 = vrot.slane %v551_v6, %v11376_v28 }
 0x1ba   :  { %v10705_v13 = vpop.f32.mrf.mxu1  ;;  %v10722_v14 = vpop.f32.mrf.mxu0  ;;  %v814_v47 = vrot.slane %v800_v33, %v11376_v28  ;;  %v531_v48 = vadd.f32 %v10286_v41, %v530_v9  ;;  %v10299_v52 = vcombine.high %v560_v24, %v574_v20  ;;  %v781_v55 = vrot.slane %v765_v11, %v11376_v28 }
 0x1bb   :  { %v602_v32 = vcombine.high %v600_v17, %v600_v17  ;;  %v795_v56 = vrot.slane %v767_v25, %v11376_v28  ;;  %v601_v57 = vcombine.high %v593_v27, %v593_v27  ;;  %v1141_v61 = vcombine.low %v774_v40, %v788_v31 }
 0x1bc   :  { %v11589_v23 = vpop.f32.mrf.mxu1  ;;  %v815_v63 = vcombine.high %v807_v36, %v807_v36  ;;  %v816_v0 = vcombine.high %v814_v47, %v814_v47  ;;  %v1080_v1 = vcombine.low %v567_v38, %v581_v34  ;;  %v10300_v2 = vcombine.high %v567_v38, %v581_v34 }
 0x1bd   :  { %v630_v62 = vrot.slane %v602_v32, %v11376_v28  ;;  %v11605_v3 = vrot.slane %v1078_v35, %v11376_v28  ;;  %v10301_v5 = vcombine.high %v774_v40, %v788_v31  ;;  %v616_v41 = vrot.slane %v600_v17, %v11376_v28 }
 0x1be   :  { %v10733_v30 = vpop.f32.mrf.mxu1  ;;  %v823_v7 = vrot.slane %v807_v36, %v11376_v28  ;;  %v844_v8 = vrot.slane %v816_v0, %v11376_v28  ;;  %v11611_v9 = vrot.slane %v531_v48, %v11376_v28  ;;  %v11614_v11 = vrot.slane %v10299_v52, %v11376_v28 }
 0x1bf   :  { %v623_v13 = vrot.slane %v601_v57, %v11376_v28  ;;  %v830_v14 = vrot.slane %v814_v47, %v11376_v28  ;;  %v745_v16 = vadd.f32 %v11579_v43, %v744_v10  ;;  %v1143_v19 = vcombine.low %v781_v55, %v795_v56 }
 0x1c0   :  { %v11596_v37 = vpop.f32.mrf.mxu1  ;;  %v10302_v20 = vcombine.high %v781_v55, %v795_v56  ;;  %v837_v17 = vrot.slane %v815_v63, %v11376_v28  ;;  %v634_v24 = vcombine.high %v630_v62, %v630_v62  ;;  %v11621_v25 = vrot.slane %v1141_v61, %v11376_v28 }
 0x1c1   :  { %v11624_v30 = vrot.slane %v593_v27, %v11376_v28  ;;  %v848_v31 = vcombine.high %v844_v8, %v844_v8  ;;  %v855_v32 = vrot.slane %v745_v16, %v11376_v28  ;;  %v1158_v34 = vrot.slane %v10301_v5, %v11376_v28 }
 0x1c2   :  { %v10736_v58 = vpop.f32.mrf.mxu1  ;;  %v632_v43 = vcombine.high %v616_v41, %v616_v41  ;;  %v1196_v10 = vrot.slane %v823_v7, %v11376_v28  ;;  %v649_v35 = vrot.slane %v11611_v9, %v11376_v28  ;;  %v11634_v36 = vrot.slane %v1080_v1, %v11376_v28 }
 0x1c3   :  { %v633_v38 = vcombine.high %v623_v13, %v623_v13  ;;  %v846_v40 = vcombine.high %v830_v14, %v830_v14  ;;  %v863_v27 = vrot.slane %v855_v32, %v11376_v28  ;;  %v11638_v48 = vrot.slane %v10300_v2, %v11376_v28 }
 0x1c4   :  { %v951_v6 = vpop.f32.mrf.mxu1  ;;  %v1110_v52 = vcombine.low %v11605_v3, %v11614_v11  ;;  %v847_v55 = vcombine.high %v837_v17, %v837_v17  ;;  %v1290_v56 = vcombine.low %v634_v24, %v649_v35  ;;  %v1165_v57 = vrot.slane %v1143_v19, %v11376_v28 }
 0x1c5   :  { %v631_v58 = vcombine.high %v11624_v30, %v11624_v30  ;;  %v856_v61 = vcombine.high %v855_v32, %v855_v32  ;;  %v1353_v63 = vcombine.low %v848_v31, %v863_v27  ;;  %v1172_v1 = vrot.slane %v10302_v20, %v11376_v28 }
 0x1c6   :  { %v10739_v18 = vpop.f32.mrf.mxu1  ;;  %v1173_v5 = vcombine.low %v11621_v25, %v1158_v34  ;;  %v1289_v2 = vcombine.low %v630_v62, %v632_v43  ;;  %v1203_v16 = vrot.slane %v1196_v10, %v11376_v28  ;;  %v845_v3 = vcombine.high %v823_v7, %v823_v7 }
 0x1c7   :  { %v1288_v18 = vcombine.low %v633_v38, %v616_v41  ;;  %v1352_v11 = vcombine.low %v844_v8, %v846_v40  ;;  %v1007_v19 = vcombine.high %v11596_v37, %v11596_v37  ;;  %v1133_v32 = vrot.slane %v11624_v30, %v11376_v28 }
 0x1c8   :  { %v11627_v33 = vpop.f32.mrf.mxu1  ;;  %v1351_v31 = vcombine.low %v847_v55, %v830_v14  ;;  %v1318_v35 = vrot.slane %v1290_v56, %v11376_v28  ;;  %10740 = vmatprep.subr.msk.mxu0 %vm80_vm0, %v1203_v16  ;;  %v1014_v62 = vrot.slane %v11596_v37, %v11376_v28  ;;  %v1287_v20 = vcombine.low %v623_v13, %v631_v58 }
 0x1c9   :  { %v870_v41 = vrot.slane %v856_v61, %v11376_v28  ;;  %v1381_v7 = vrot.slane %v1353_v63, %v11376_v28  ;;  %v1021_v8 = vrot.slane %v1007_v19, %v11376_v28  ;;  %10741 = vmatpush3.xpose.msk.msra.mxu0 %vm80_vm0, %v1203_v16  ;;  %v1311_v14 = vrot.slane %v1289_v2, %v11376_v28 }
 0x1ca   :  { %v10764_v47 = vpop.f32.mrf.mxu1  ;;  %v1022_v30 = vcombine.high %v1014_v62, %v1014_v62  ;;  %v11666_v34 = vrot.slane %v1014_v62, %v11376_v28  ;;  %v11669_v43 = vrot.slane %v951_v6, %v11376_v28  ;;  %v1304_v37 = vrot.slane %v1288_v18, %v11376_v28 }
 0x1cb   :  { %v1350_v13 = vcombine.low %v837_v17, %v845_v3  ;;  %v1374_v10 = vrot.slane %v1352_v11, %v11376_v28  ;;  %v1023_v38 = vcombine.high %v1021_v8, %v1021_v8  ;;  %v1367_v27 = vrot.slane %v1351_v31, %v11376_v28 }
 0x1cc   :  { %v11645_v0 = vpop.f32.mrf.mxu1  ;;  %v1320_v47 = vcombine.low %v1311_v14, %v1318_v35  ;;  %v1044_v55 = vrot.slane %v1022_v30, %v11376_v28  ;;  %v1052_v56 = vcombine.high %v11666_v34, %v11666_v34  ;;  %v1405_v61 = vrot.slane %v870_v41, %v11376_v28 }
 0x1cd   :  { %v1383_v58 = vcombine.low %v1374_v10, %v1381_v7  ;;  %v11679_v6 = vrot.slane %v1023_v38, %v11376_v28  ;;  %v1174_v63 = vcombine.low %v1165_v57, %v1172_v1  ;;  %v11684_v2 = vrot.slane %v1021_v8, %v11376_v28  ;;  %v10316_v1 = vld [vmem:[%s14299_s6 + $0x1] ss:$0 sm:$0xff] }
 0x1ce   :  { %v10767_v24 = vpop.f32.mrf.mxu1  ;;  %v1054_v16 = vcombine.high %v1044_v55, %v1044_v55  ;;  %v11686_v18 = vcombine.low %v1044_v55, %v1052_v56  ;;  %v1070_v3 = vrot.slane %v11669_v43, %v11376_v28  ;;  %v1181_v19 = vrot.slane %v1173_v5, %v11376_v28 }
 0x1cf   :  { %v1055_v11 = vcombine.high %v11679_v6, %v11679_v6  ;;  %v1188_v24 = vrot.slane %v1174_v63, %v11376_v28  ;;  %v1111_v57 = vcombine.low %v11634_v36, %v11638_v48  ;;  %v1297_v35 = vrot.slane %v1287_v20, %v11376_v28 }
 0x1d0   :  { %v11662_v25 = vpop.f32.mrf.mxu1  ;;  %v1360_v62 = vrot.slane %v1350_v13, %v11376_v28  ;;  %v642_v41 = vcombine.high %v11611_v9, %v11611_v9  ;;  %v11704_v7 = vcombine.low %v1054_v16, %v11684_v2  ;;  %v1118_v36 = vrot.slane %v1110_v52, %v11376_v28 }
 0x1d1   :  { %v11706_v5 = vcombine.low %v1055_v11, %v1070_v3  ;;  %v1189_v8 = vcombine.low %v1181_v19, %v1188_v24  ;;  %v1125_v48 = vrot.slane %v1111_v57, %v11376_v28  ;;  %v1622_v30 = vadd.f32 %v10316_v1, %v11627_v33 }
 0x1d2   :  { %v10770_v40 = vpop.f32.mrf.mxu1  ;;  %v1382_v20 = vcombine.low %v1360_v62, %v1367_v27  ;;  %v1397_v13 = vrot.slane %v1383_v58, %v11376_v28  ;;  %v1412_v10 = vrot.slane %v1405_v61, %v11376_v28  ;;  %v1319_v38 = vcombine.low %v1297_v35, %v1304_v37 }
 0x1d3   :  { %10742 = vmatprep.subr.msk.mxu0 %vm80_vm0, %v1189_v8  ;;  %v1126_v9 = vcombine.low %v1118_v36, %v1125_v48  ;;  %v1334_v40 = vrot.slane %v1320_v47, %v11376_v28  ;;  %v1638_v52 = vcombine.high %v1622_v30, %v1622_v30  ;;  %v1645_v56 = vrot.slane %v1622_v30, %v11376_v28 }
 0x1d4   :  { %v11681_v17 = vpop.f32.mrf.mxu1  ;;  %10743 = vmatpush3.xpose.msk.msra.mxu0 %vm80_vm0, %v1189_v8  ;;  %v1390_v63 = vrot.slane %v1382_v20, %v11376_v28  ;;  %v1627_v33 = vadd.f32 %v10316_v1, %v11645_v0  ;;  %v1140_v27 = vrot.slane %v1133_v32, %v11376_v28  ;;  %v656_v58 = vrot.slane %v642_v41, %v11376_v28  ;;  %v10323_v20 = vld [vmem:[%s14300_s7 + $0x38] sm:$0xff] }
 0x1d5   :  { %10744 = vmatprep.mubr.msk.f32.mxu0 %vm80_vm0, %v1126_v9  ;;  %10747 = vmatprep.subr.msk.mxu0 %vm80_vm0, %v1412_v10  ;;  %v1327_v37 = vrot.slane %v1319_v38, %v11376_v28  ;;  %v1652_v61 = vrot.slane %v1638_v52, %v11376_v28  ;;  %v1653_v19 = vcombine.high %v1645_v56, %v1645_v56  ;;  %v10322_v52 = vld [vmem:[%s14300_s7 + $0x30] sm:$0xff] }
 0x1d6   :  { %v10798_v31 = vpop.f32.mrf.mxu1  ;;  %v1398_v16 = vcombine.low %v1390_v63, %v1397_v13  ;;  %v1687_v11 = vcombine.high %v1627_v33, %v1627_v33  ;;  %v1694_v0 = vrot.slane %v1627_v33, %v11376_v28  ;;  %v1632_v24 = vadd.f32 %v10316_v1, %v11662_v25 }
 0x1d7   :  { %10745 = vmatmul.mubr.msk.f32.vlgmr.msra.gmra.mxu0 %vm80_vm0, %v1140_v27  ;;  %v1335_v3 = vcombine.low %v1327_v37, %v1334_v40  ;;  %v1342_v57 = vrot.slane %v656_v58, %v11376_v28  ;;  %v1654_v62 = vcombine.high %v1652_v61, %v1652_v61  ;;  %v1675_v36 = vrot.slane %v1653_v19, %v11376_v28  ;;  %v10321_v58 = vld [vmem:[%s14300_s7 + $0x28] sm:$0xff] }
 0x1d8   :  { %v11710_v14 = vpop.f32.mrf.mxu1  ;;  %10748 = vmatpush3.xpose.msk.msra.mxu0 %vm80_vm0, %v1412_v10  ;;  %v1701_v31 = vrot.slane %v1687_v11, %v11376_v28  ;;  %v1702_v35 = vcombine.high %v1694_v0, %v1694_v0  ;;  %v11742_v25 = vrot.slane %v1632_v24, %v11376_v28  ;;  %v1661_v13 = vrot.slane %v1645_v56, %v11376_v28 }
 0x1d9   :  { %10749 = vmatprep.subr.msk.mxu0 %vm80_vm0, %v1398_v16  ;;  %10751 = vmatprep.mubr.msk.f32.mxu0 %vm80_vm0, %v1335_v3  ;;  %v1349_v1 = vrot.slane %v1342_v57, %v11376_v28  ;;  %v1682_v9 = vrot.slane %v1654_v62, %v11376_v28  ;;  %v11753_v10 = vrot.slane %v1694_v0, %v11376_v28  ;;  %v10320_v0 = vld [vmem:[%s14300_s7 + $0x20] sm:$0xff] }
 0x1da   :  { %v10801_v55 = vpop.f32.mrf.mxu1  ;;  %v1703_v41 = vcombine.high %v1701_v31, %v1701_v31  ;;  %v1717_v8 = vrot.slane %v1701_v31, %v11376_v28  ;;  %v1724_v48 = vrot.slane %v1702_v35, %v11376_v28  ;;  %v1668_v38 = vrot.slane %v1652_v61, %v11376_v28 }
 0x1db   :  { %v2182_v63 = vcombine.low %v1661_v13, %v1675_v36  ;;  %v10336_v33 = vcombine.high %v1661_v13, %v1675_v36  ;;  %v1750_v56 = vrot.slane %v11742_v25, %v11376_v28  ;;  %v2118_v19 = vrot.slane %v11710_v14, %v11376_v28 }
 0x1dc   :  { %v11726_v47 = vpop.f32.mrf.mxu1  ;;  %10750 = vmatpush3.xpose.msk.msra.mxu0 %vm80_vm0, %v1398_v16  ;;  %v1731_v30 = vrot.slane %v1703_v41, %v11376_v28  ;;  %v1733_v40 = vcombine.high %v1717_v8, %v1717_v8  ;;  %v1734_v27 = vcombine.high %v1724_v48, %v1724_v48  ;;  %v2184_v37 = vcombine.low %v1668_v38, %v1682_v9 }
 0x1dd   :  { %10771 = vmatprep.subr.mxu0 %v14319_v4  ;;  %v10337_v61 = vcombine.high %v1668_v38, %v1682_v9  ;;  %v1732_v16 = vcombine.high %v11753_v10, %v11753_v10  ;;  %v2192_v24 = vrot.slane %v2182_v63, %v11376_v28  ;;  %v2199_v57 = vrot.slane %v10336_v33, %v11376_v28 }
 0x1de   :  { %v10804_v32 = vpop.f32.mrf.mxu1  ;;  %v1735_v55 = vcombine.high %v1731_v30, %v1731_v30  ;;  %v2393_v11 = vcombine.low %v1731_v30, %v1733_v40  ;;  %v2392_v31 = vcombine.low %v1734_v27, %v1717_v8  ;;  %v2126_v41 = vcombine.high %v2118_v19, %v2118_v19 }
 0x1df   :  { %10752 = vmatmul.mubr.msk.f32.vlgmr.msra.gmra.mxu0 %vm80_vm0, %v1349_v1  ;;  %v2111_v32 = vcombine.high %v11710_v14, %v11710_v14  ;;  %v2206_v36 = vrot.slane %v2184_v37, %v11376_v28  ;;  %v2213_v1 = vrot.slane %v10337_v61, %v11376_v28  ;;  %v2391_v30 = vcombine.low %v1724_v48, %v1732_v16 }
 0x1e0   :  { %10772 = vmatpush3.msra.mxu0 %v10323_v20  ;;  %v2394_v3 = vcombine.low %v1735_v55, %v1750_v56  ;;  %10779 = vmatprep.mubr.msk.f32.mxu0 %vm11197_vm1, %v14319_v4  ;;  %v11786_v14 = vrot.slane %v2118_v19, %v11376_v28  ;;  %v2415_v20 = vrot.slane %v2393_v11, %v11376_v28 }
 0x1e1   :  { %10773 = vmatprep.subr.mxu0 %v14319_v4  ;;  %v2125_v62 = vrot.slane %v2111_v32, %v11376_v28  ;;  %v11794_v9 = vrot.slane %v11726_v47, %v11376_v28  ;;  %v2214_v38 = vcombine.low %v2192_v24, %v2199_v57  ;;  %v2408_v40 = vrot.slane %v2392_v31, %v11376_v28 }
 0x1e2   :  { %10774 = vmatpush3.msra.mxu0 %v10322_v52  ;;  %v2422_v35 = vrot.slane %v2394_v3, %v11376_v28  ;;  %v2148_v48 = vrot.slane %v2126_v41, %v11376_v28  ;;  %v2156_v55 = vcombine.high %v11786_v14, %v11786_v14  ;;  %v1053_v52 = vcombine.high %v11684_v2, %v11684_v2 }
 0x1e3   :  { %10775 = vmatprep.subr.mxu0 %v14319_v4  ;;  %v2127_v8 = vcombine.high %v2125_v62, %v2125_v62  ;;  %v2141_v13 = vrot.slane %v2125_v62, %v11376_v28  ;;  %v2401_v47 = vrot.slane %v2391_v30, %v11376_v28  ;;  %v2174_v61 = vrot.slane %v11794_v9, %v11376_v28 }
 0x1e4   :  { %10776 = vmatpush3.msra.mxu0 %v10321_v58  ;;  %v2424_v63 = vcombine.low %v2415_v20, %v2422_v35  ;;  %v2158_v27 = vcombine.high %v2148_v48, %v2148_v48  ;;  %v2791_v56 = vcombine.low %v2148_v48, %v2156_v55  ;;  %v2215_v58 = vcombine.low %v2206_v36, %v2213_v1 }
 0x1e5   :  { %10777 = vmatprep.subr.mxu0 %v14319_v4  ;;  %v2157_v33 = vcombine.high %v2141_v13, %v2141_v13  ;;  %v2222_v2 = vrot.slane %v2214_v38, %v11376_v28  ;;  %v2423_v11 = vcombine.low %v2401_v47, %v2408_v40  ;;  %v3102_v57 = vrot.slane %v11704_v7, %v11376_v28 }
 0x1e6   :  { %10778 = vmatpush3.msra.mxu0 %v10320_v0  ;;  %v2792_v16 = vcombine.low %v2158_v27, %v2141_v13  ;;  %v2229_v3 = vrot.slane %v2215_v58, %v11376_v28  ;;  %v3087_v0 = vcombine.low %v11679_v6, %v1053_v52  ;;  %v2438_v24 = vrot.slane %v2424_v63, %v11376_v28 }
 0x1e7   :  { %10780 = vmatmul.mubr.msk.f32.vlgmr.msra.gmra.mxu0 %vm447_vm3, %v11461_v21  ;;  %v2155_v21 = vrot.slane %v2127_v8, %v11376_v28  ;;  %v2431_v35 = vrot.slane %v2423_v11, %v11376_v28  ;;  %v2801_v62 = vrot.slane %v2791_v56, %v11376_v28  ;;  %v3095_v6 = vrot.slane %v11686_v18, %v11376_v28 }
 0x1e8   :  { %10782 = vmatprep.mubr.msk.f32.mxu0 %vm11197_vm1, %v14319_v4  ;;  %v2230_v31 = vcombine.low %v2222_v2, %v2229_v3  ;;  %v3116_v36 = vrot.slane %v11706_v5, %v11376_v28  ;;  %v3109_v20 = vrot.slane %v3087_v0, %v11376_v28  ;;  %v2062_v47 = vcombine.high %v11681_v17, %v11681_v17 }
 0x1e9   :  { %v2159_v37 = vcombine.high %v2155_v21, %v2155_v21  ;;  %v2793_v32 = vcombine.low %v2155_v21, %v2157_v33  ;;  %v2439_v7 = vcombine.low %v2431_v35, %v2438_v24  ;;  %v3117_v8 = vcombine.low %v3095_v6, %v3102_v57 }
 0x1ea   :  { %v3118_v38 = vcombine.low %v3109_v20, %v3116_v36  ;;  %v958_v27 = vcombine.high %v11589_v23, %v11589_v23  ;;  %v2069_v56 = vrot.slane %v11681_v17, %v11376_v28  ;;  %v965_v58 = vrot.slane %v11589_v23, %v11376_v28  ;;  %v10325_v17 = vld [vmem:[%s14301_s8 + $0x1] ss:$0 sm:$0xff] }
 0x1eb   :  { %10783 = vmatmul.mubr.msk.f32.gmra.mxu0 %vm447_vm3, %v11476_v26  ;;  %v2794_v19 = vcombine.low %v2159_v37, %v2174_v61  ;;  %v2808_v26 = vrot.slane %v2792_v16, %v11376_v28  ;;  %v2815_v1 = vrot.slane %v2793_v32, %v11376_v28  ;;  %10816 = vmatprep.mubr.msk.f32.mxu1 %vm80_vm0, %v2439_v7 }
 0x1ec   :  { %10785 = vmatprep.mubr.msk.f32.mxu0 %vm11197_vm1, %v14319_v4  ;;  %v3125_v40 = vrot.slane %v3117_v8, %v11376_v28  ;;  %v3132_v5 = vrot.slane %v3118_v38, %v11376_v28  ;;  %v2076_v37 = vrot.slane %v2062_v47, %v11376_v28  ;;  %v972_v61 = vrot.slane %v958_v27, %v11376_v28 }
 0x1ed   :  { %v2822_v41 = vrot.slane %v2794_v19, %v11376_v28  ;;  %v2823_v30 = vcombine.low %v2801_v62, %v2808_v26  ;;  %v2077_v16 = vcombine.high %v2069_v56, %v2069_v56  ;;  %v973_v3 = vcombine.high %v965_v58, %v965_v58 }
 0x1ee   :  { %v11838_v55 = vcombine.low %v3125_v40, %v3132_v5  ;;  %v2078_v11 = vcombine.high %v2076_v37, %v2076_v37  ;;  %v974_v0 = vcombine.high %v972_v61, %v972_v61  ;;  %v2085_v24 = vrot.slane %v2069_v56, %v11376_v28 }
 0x1ef   :  { %10786 = vmatmul.mubr.msk.f32.gmra.mxu0 %vm447_vm3, %v11491_v29  ;;  %v2824_v13 = vcombine.low %v2815_v1, %v2822_v41  ;;  %v2831_v29 = vrot.slane %v2823_v30, %v11376_v28  ;;  %v2099_v32 = vrot.slane %v2077_v16, %v11376_v28  ;;  %v11867_v23 = vrot.slane %v973_v3, %v11376_v28 }
 0x1f0   :  { %10809 = vmatprep.mubr.msk.f32.mxu0 %vm80_vm0, %v2230_v31  ;;  %v2106_v57 = vrot.slane %v2078_v11, %v11376_v28  ;;  %v11872_v31 = vrot.slane %v974_v0, %v11376_v28  ;;  %v11875_v62 = vrot.slane %v965_v58, %v11376_v28  ;;  %v2092_v41 = vrot.slane %v2076_v37, %v11376_v28 }
 0x1f1   :  { %v2838_v18 = vrot.slane %v2824_v13, %v11376_v28  ;;  %v2644_v6 = vcombine.low %v2085_v24, %v2099_v32  ;;  %v10348_v36 = vcombine.high %v2085_v24, %v2099_v32  ;;  %v11879_v1 = vrot.slane %v972_v61, %v11376_v28 }
 0x1f2   :  { %v2938_v8 = vcombine.low %v11875_v62, %v11867_v23  ;;  %v10356_v13 = vcombine.high %v11875_v62, %v11867_v23  ;;  %v2646_v38 = vcombine.low %v2092_v41, %v2106_v57  ;;  %v2993_v23 = vrot.slane %v11666_v34, %v11376_v28 }
 0x1f3   :  { %v11836_v48 = vcombine.low %v2831_v29, %v2838_v18  ;;  %v10349_v29 = vcombine.high %v2092_v41, %v2106_v57  ;;  %v2940_v40 = vcombine.low %v11879_v1, %v11872_v31  ;;  %v10357_v47 = vcombine.high %v11879_v1, %v11872_v31 }
 0x1f4   :  { %v11894_v56 = vrot.slane %v2644_v6, %v11376_v28  ;;  %v11897_v58 = vrot.slane %v10348_v36, %v11376_v28  ;;  %v2668_v0 = vrot.slane %v2646_v38, %v11376_v28  ;;  %v2948_v31 = vrot.slane %v2938_v8, %v11376_v28 }
 0x1f5   :  { %v2675_v32 = vrot.slane %v10349_v29, %v11376_v28  ;;  %v2955_v1 = vrot.slane %v10356_v13, %v11376_v28 }
 0x297   :  { %v11840_v52 = vpop.f32.mrf.mxu0 }
 0x298   :  { %v1501_v63 = vsel %vm1500_vm4, %v11840_v52, -inf }
 0x299   :  { %1502 = vmax.xlane.f32.xlu1 %v1501_v63  ;;  %v11844_v21 = vpop.f32.mrf.mxu0 }
 0x29a   :  { %v1497_v33 = vsel %vm1496_vm5, %v11844_v21, -inf }
 0x29b   :  { %1498 = vmax.xlane.f32.xlu0 %v1497_v33 }
 0x29f   :  { %v11858_v2 = vpop.f32.mrf.mxu0 }
 0x2a1   :  { %v11861_v19 = vpop.f32.mrf.mxu0 }
 0x2a7   :  { %v1837_v26 = vpop.f32.mrf.mxu0 }
 0x2a8   :  { %v1838_v35 = vadd.f32 %v10325_v17, %v1837_v26 }
 0x2a9   :  { %v10781_v7 = vpop.f32.mrf.mxu0 }
 0x2aa   :  { %v1854_v30 = vcombine.high %v1838_v35, %v1838_v35  ;;  %v1861_v20 = vrot.slane %v1838_v35, %v11376_v28  ;;  %v2699_v7 = vrot.slane %v11786_v14, %v11376_v28 }
 0x2ab   :  { %v1842_v18 = vpop.f32.mrf.mxu0 }
 0x2ac   :  { %v1868_v5 = vrot.slane %v1854_v30, %v11376_v28  ;;  %v1869_v63 = vcombine.high %v1861_v20, %v1861_v20  ;;  %v1843_v33 = vadd.f32 %v10325_v17, %v1842_v18  ;;  %v1877_v16 = vrot.slane %v1861_v20, %v11376_v28 }
 0x2ad   :  { %v10784_v37 = vpop.f32.mrf.mxu0 }
 0x2ae   :  { %v1870_v61 = vcombine.high %v1868_v5, %v1868_v5  ;;  %v1891_v3 = vrot.slane %v1869_v63, %v11376_v28  ;;  %v1903_v11 = vcombine.high %v1843_v33, %v1843_v33  ;;  %v1884_v24 = vrot.slane %v1868_v5, %v11376_v28 }
 0x2af   :  { %v1910_v57 = vrot.slane %v1843_v33, %v11376_v28  ;;  %v1847_v26 = vpop.f32.mrf.mxu0 }
 0x2b0   :  { %v1898_v35 = vrot.slane %v1870_v61, %v11376_v28  ;;  %v2245_v41 = vcombine.low %v1877_v16, %v1891_v3  ;;  %v10338_v6 = vcombine.high %v1877_v16, %v1891_v3  ;;  %v1917_v36 = vrot.slane %v1903_v11, %v11376_v28 }
 0x2b1   :  { %v1918_v30 = vcombine.high %v1910_v57, %v1910_v57  ;;  %v1926_v20 = vrot.slane %v1910_v57, %v11376_v28  ;;  %v1848_v38 = vadd.f32 %v10325_v17, %v1847_v26  ;;  %v10787_v18 = vpop.f32.mrf.mxu0 }
 0x2b2   :  { %v2247_v29 = vcombine.low %v1884_v24, %v1898_v35  ;;  %v10339_v63 = vcombine.high %v1884_v24, %v1898_v35  ;;  %v2255_v5 = vrot.slane %v2245_v41, %v11376_v28  ;;  %v2262_v33 = vrot.slane %v10338_v6, %v11376_v28 }
 0x2b3   :  { %v1919_v37 = vcombine.high %v1917_v36, %v1917_v36  ;;  %v1933_v61 = vrot.slane %v1917_v36, %v11376_v28  ;;  %v1940_v16 = vrot.slane %v1918_v30, %v11376_v28  ;;  %v1948_v3 = vcombine.high %v1926_v20, %v1926_v20 }
 0x2b4   :  { %v2269_v11 = vrot.slane %v2247_v29, %v11376_v28  ;;  %v2276_v14 = vrot.slane %v10339_v63, %v11376_v28  ;;  %v2277_v4 = vcombine.low %v2255_v5, %v2262_v33  ;;  %v2300_v17 = vrot.slane %v1926_v20, %v11376_v28 }
 0x2b5   :  { %v2167_v24 = vcombine.high %v11794_v9, %v11794_v9  ;;  %v1947_v57 = vrot.slane %v1919_v37, %v11376_v28  ;;  %v1949_v26 = vcombine.high %v1933_v61, %v1933_v61  ;;  %v1950_v35 = vcombine.high %v1940_v16, %v1940_v16 }
 0x2b6   :  { %v2454_v41 = vcombine.low %v1940_v16, %v1948_v3  ;;  %v1958_v6 = vrot.slane %v1848_v38, %v11376_v28  ;;  %v2307_v36 = vrot.slane %v2300_v17, %v11376_v28  ;;  %v2278_v30 = vcombine.low %v2269_v11, %v2276_v14 }
 0x2b7   :  { %v2455_v18 = vcombine.low %v1950_v35, %v1933_v61  ;;  %v1951_v29 = vcombine.high %v1947_v57, %v1947_v57  ;;  %v2285_v63 = vrot.slane %v2277_v4, %v11376_v28  ;;  %v2677_v5 = vcombine.low %v2668_v0, %v2675_v32 }
 0x2b8   :  { %v2456_v33 = vcombine.low %v1947_v57, %v1949_v26  ;;  %v1959_v20 = vcombine.high %v1958_v6, %v1958_v6  ;;  %v1966_v27 = vrot.slane %v1958_v6, %v11376_v28  ;;  %10805 = vmatprep.subr.msk.mxu0 %vm80_vm0, %v2307_v36  ;;  %v2292_v9 = vrot.slane %v2278_v30, %v11376_v28 }
 0x2b9   :  { %v2237_v37 = vrot.slane %v11753_v10, %v11376_v28  ;;  %v2181_v38 = vrot.slane %v2167_v24, %v11376_v28  ;;  %v2471_v16 = vrot.slane %v2455_v18, %v11376_v28  ;;  %10806 = vmatpush3.xpose.msk.msra.mxu0 %vm80_vm0, %v2307_v36  ;;  %v2676_v4 = vcombine.low %v11894_v56, %v11897_v58 }
 0x2ba   :  { %v2464_v0 = vrot.slane %v2454_v41, %v11376_v28  ;;  %v1973_v32 = vrot.slane %v1959_v20, %v11376_v28  ;;  %v2457_v61 = vcombine.low %v1951_v29, %v1966_v27  ;;  %v2293_v3 = vcombine.low %v2285_v63, %v2292_v9 }
 0x2bb   :  { %v2962_v10 = vrot.slane %v2940_v40, %v11376_v28  ;;  %v2969_v11 = vrot.slane %v10357_v47, %v11376_v28  ;;  %v2706_v14 = vrot.slane %v2699_v7, %v11376_v28  ;;  %v2691_v17 = vrot.slane %v2677_v5, %v11376_v28 }
 0x2bc   :  { %v2478_v24 = vrot.slane %v2456_v33, %v11376_v28  ;;  %v2485_v56 = vrot.slane %v2457_v61, %v11376_v28  ;;  %v2509_v58 = vrot.slane %v1973_v32, %v11376_v28  ;;  %10807 = vmatprep.subr.msk.mxu0 %vm80_vm0, %v2293_v3  ;;  %v2486_v27 = vcombine.low %v2464_v0, %v2471_v16 }
 0x2bd   :  { %v2244_v40 = vrot.slane %v2237_v37, %v11376_v28  ;;  %v14352_v47 = vcombine.high %v11742_v25, %v11742_v25  ;;  %10808 = vmatpush3.xpose.msk.msra.mxu0 %vm80_vm0, %v2293_v3  ;;  %v2846_v57 = vrot.slane %v2181_v38, %v11376_v28  ;;  %v2684_v8 = vrot.slane %v2676_v4, %v11376_v28 }
 0x2be   :  { %v2487_v26 = vcombine.low %v2478_v24, %v2485_v56  ;;  %v2516_v35 = vrot.slane %v2509_v58, %v11376_v28  ;;  %10819 = vmatprep.subr.msk.mxu0 %vm174_vm2, %v2706_v14  ;;  %v2971_v62 = vcombine.low %v2962_v10, %v2969_v11  ;;  %v2494_v25 = vrot.slane %v2486_v27, %v11376_v28 }
 0x2bf   :  { %v1757_v7 = vrot.slane %v14352_v47, %v11376_v28  ;;  %v2692_v41 = vcombine.low %v2684_v8, %v2691_v17  ;;  %v11974_v34 = vrot.slane %v2846_v57, %v11376_v28  ;;  %v2970_v30 = vcombine.low %v2948_v31, %v2955_v1 }
 0x2c0   :  { %10812 = vmatprep.subr.msk.mxu1 %vm80_vm0, %v2516_v35  ;;  %10810 = vmatmul.mubr.msk.f32.vlgmr.msra.gmra.mxu0 %vm80_vm0, %v2244_v40  ;;  %v2501_v13 = vrot.slane %v2487_v26, %v11376_v28  ;;  %v3000_v18 = vrot.slane %v2993_v23, %v11376_v28  ;;  %v2985_v29 = vrot.slane %v2971_v62, %v11376_v28  ;;  %v14353_v20 = vmov 0.0  }
 0x2c1   :  { %10813 = vmatpush3.xpose.msk.msra.mxu1 %vm80_vm0, %v2516_v35  ;;  %10820 = vmatpush3.msk.msra.mxu0 %vm174_vm2, %v2706_v14  ;;  %v2446_v6 = vrot.slane %v1757_v7, %v11376_v28  ;;  %v2978_v5 = vrot.slane %v2970_v30, %v11376_v28  ;;  %v1504_v24 = vsel %vm1496_vm5, %v11861_v19, -inf }
 0x2c2   :  { %v2502_v36 = vcombine.low %v2494_v25, %v2501_v13  ;;  %10821 = vmatprep.subr.mxu0 %v2692_v41 }
 0x2c3   :  { %10822 = vmatpush3.msra.mxu0 %v2692_v41  ;;  %v2453_v63 = vrot.slane %v2446_v6, %v11376_v28  ;;  %v2986_v33 = vcombine.low %v2978_v5, %v2985_v29 }
 0x2c4   :  { %10814 = vmatprep.subr.msk.mxu1 %vm80_vm0, %v2502_v36  ;;  %10826 = vmatprep.subr.msk.mxu0 %vm174_vm2, %v11974_v34 }
 0x2c5   :  { %10815 = vmatpush3.xpose.msk.msra.mxu1 %vm80_vm0, %v2502_v36 }
 0x2c6   :  { %10833 = vmatprep.subr.msk.mxu1 %vm174_vm2, %v3000_v18 }
 0x2c8   :  { %10817 = vmatmul.mubr.msk.f32.vlgmr.msra.gmra.mxu1 %vm80_vm0, %v2453_v63 }
 0x2c9   :  { %10834 = vmatpush3.msk.msra.mxu1 %vm174_vm2, %v3000_v18 }
 0x2ca   :  { %10835 = vmatprep.subr.mxu1 %v2986_v33 }
 0x2cb   :  { %10836 = vmatpush3.msra.mxu1 %v2986_v33 }
 0x2cc   :  { %10847 = vmatprep.subr.mxu1 %v14353_v20 }
 0x322   :  { %v1503_v38 = vpop.xlane.xlu1 %1502 }
 0x323   :  { %v1511_v16 = vsub.f32 %v11840_v52, %v1503_v38  ;;  %v1507_v52 = vsel %vm1500_vm4, %v11858_v2, -inf }
 0x324   :  { %v1499_v9 = vpop.xlane.xlu0 %1498 }
 0x325   :  { %v1510_v37 = vsub.f32 %v11844_v21, %v1499_v9  ;;  %v1516_v3 = vmul.f32 1.442695, %v1511_v16 }
 0x327   :  { %v1514_v4 = vmul.f32 1.442695, %v1510_v37 }
 0x329   :  { %11088 = vpow2.f32 %v1514_v4 }
 0x32a   :  { %11090 = vpow2.f32 %v1516_v3 }
 0x336   :  { %v11089_v56 = vpop.eup %11088 }
 0x337   :  { %v1522_v58 = vsel %vm1496_vm5, %v11089_v56, 0.0  ;;  %v11091_v27 = vpop.eup %11090 }
 0x338   :  { %v1525_v31 = vsel %vm1500_vm4, %v11091_v27, 0.0 }
 0x380   :  { %v10811_v0 = vpop.f32.mrf.mxu0 }
 0x381   :  { %v2603_v32 = vsel %vm1500_vm4, %v10811_v0, -inf }
 0x382   :  { %2604 = vmax.xlane.f32.xlu1 %v2603_v32  ;;  %v2382_v61 = vpop.f32.mrf.mxu0 }
 0x383   :  { %v2600_v10 = vsel %vm1496_vm5, %v2382_v61, -inf }
 0x384   :  { %2601 = vmax.xlane.f32.xlu0 %v2600_v10 }
 0x388   :  { %v10818_v11 = vpop.f32.mrf.mxu1 }
 0x389   :  { %v2609_v14 = vsel %vm1500_vm4, %v10818_v11, -inf }
 0x38a   :  { %2610 = vmax.xlane.f32.xlu1 %v2609_v14  ;;  %v2591_v21 = vpop.f32.mrf.mxu1 }
 0x38b   :  { %v2606_v17 = vsel %vm1496_vm5, %v2591_v21, -inf }
 0x38c   :  { %2607 = vmax.xlane.f32.xlu0 %v2606_v17 }
 0x38e   :  { %1508 = vmax.xlane.f32.xlu1 %v1507_v52 }
 0x390   :  { %1505 = vmax.xlane.f32.xlu0 %v1504_v24 }
 0x394   :  { %1523 = vadd.xlane.f32.xlu0 %v1522_v58 }
 0x398   :  { %1526 = vadd.xlane.f32.xlu0 %v1525_v31 }
 0x40b   :  { %v2605_v1 = vpop.xlane.xlu1 %2604 }
 0x40c   :  { %v2613_v40 = vsub.f32 %v10811_v0, %v2605_v1 }
 0x40d   :  { %v2602_v47 = vpop.xlane.xlu0 %2601 }
 0x40e   :  { %v2612_v7 = vsub.f32 %v2382_v61, %v2602_v47  ;;  %v2618_v57 = vmul.f32 1.442695, %v2613_v40 }
 0x410   :  { %v2616_v26 = vmul.f32 1.442695, %v2612_v7 }
 0x412   :  { %11092 = vpow2.f32 %v2616_v26 }
 0x413   :  { %v2611_v35 = vpop.xlane.xlu1 %2610  ;;  %11094 = vpow2.f32 %v2618_v57 }
 0x414   :  { %v2615_v8 = vsub.f32 %v10818_v11, %v2611_v35 }
 0x415   :  { %v2608_v23 = vpop.xlane.xlu0 %2607 }
 0x416   :  { %v2622_v62 = vmul.f32 1.442695, %v2615_v8  ;;  %v2614_v25 = vsub.f32 %v2591_v21, %v2608_v23 }
 0x417   :  { %v1509_v13 = vpop.xlane.xlu1 %1508 }
 0x418   :  { %11096 = vpow2.f32 %v2622_v62  ;;  %v2620_v41 = vmul.f32 1.442695, %v2614_v25  ;;  %v1513_v6 = vsub.f32 %v11858_v2, %v1509_v13 }
 0x419   :  { %v1506_v36 = vpop.xlane.xlu0 %1505 }
 0x41a   :  { %11098 = vpow2.f32 %v2620_v41  ;;  %v1520_v30 = vmul.f32 1.442695, %v1513_v6  ;;  %v1512_v18 = vsub.f32 %v11861_v19, %v1506_v36 }
 0x41c   :  { %11100 = vpow2.f32 %v1520_v30  ;;  %v1518_v29 = vmul.f32 1.442695, %v1512_v18 }
 0x41d   :  { %v1524_v63 = vpop.xlane.xlu0 %1523 }
 0x41e   :  { %11102 = vpow2.f32 %v1518_v29 }
 0x41f   :  { %v11093_v5 = vpop.eup %11092  ;;  %11104 = vrcp.f32 %v1524_v63 }
 0x420   :  { %v2624_v33 = vsel %vm1496_vm5, %v11093_v5, 0.0  ;;  %v11095_v9 = vpop.eup %11094 }
 0x421   :  { %v1527_v37 = vpop.xlane.xlu0 %1526  ;;  %2625 = vadd.xlane.f32.xlu1 %v2624_v33  ;;  %v2627_v38 = vsel %vm1500_vm4, %v11095_v9, 0.0 }
 0x422   :  { %11106 = vrcp.f32 %v1527_v37 }
 0x425   :  { %v11097_v2 = vpop.eup %11096  ;;  %2628 = vadd.xlane.f32.xlu1 %v2627_v38 }
 0x426   :  { %v2633_v19 = vsel %vm1500_vm4, %v11097_v2, 0.0 }
 0x427   :  { %v11099_v16 = vpop.eup %11098 }
 0x428   :  { %v2630_v4 = vsel %vm1496_vm5, %v11099_v16, 0.0 }
 0x429   :  { %v11101_v0 = vpop.eup %11100  ;;  %2631 = vadd.xlane.f32.xlu0 %v2630_v4  ;;  %2634 = vadd.xlane.f32.xlu1 %v2633_v19 }
 0x42a   :  { %v1531_v10 = vsel %vm1500_vm4, %v11101_v0, 0.0 }
 0x42b   :  { %v11103_v32 = vpop.eup %11102 }
 0x42c   :  { %v11105_v61 = vpop.eup %11104  ;;  %v1528_v3 = vsel %vm1496_vm5, %v11103_v32, 0.0 }
 0x42d   :  { %1529 = vadd.xlane.f32.xlu0 %v1528_v3  ;;  %v1535_v11 = vmul.f32 %v11105_v61, %v11089_v56  ;;  %1532 = vadd.xlane.f32.xlu1 %v1531_v10  ;;  %v1063_v56 = vcombine.high %v11669_v43, %v11669_v43  ;;  %v224_v3 = vcombine.high %v11413_v53, %v11413_v53 }
 0x42f   :  { %v11107_v14 = vpop.eup %11106  ;;  %10837 = vmatprep.mubr.msk.f32.mxu1 %vm1496_vm5, %v1535_v11  ;;  %v1077_v40 = vrot.slane %v1063_v56, %v11376_v28  ;;  %v226_v56 = vcombine.high %v11416_v54, %v11416_v54 }
 0x430   :  { %v1537_v21 = vmul.f32 %v11107_v14, %v11091_v27 }
 0x431   :  { %v3140_v57 = vrot.slane %v1077_v40, %v11376_v28 }
 0x432   :  { %10838 = vmatmul.mubr.msk.f32.vlgmr.msra.gmra.mxu1 %vm1496_vm5, %v1537_v21 }
 0x433   :  { %10855 = vmatprep.mubr.msk.f32.mxu1 %vm11197_vm1, %v14353_v20  ;;  %v3147_v23 = vrot.slane %v3140_v57, %v11376_v28 }
 0x4aa   :  { %v2626_v17 = vpop.xlane.xlu1 %2625 }
 0x4ab   :  { %11108 = vrcp.f32 %v2626_v17  ;;  %v225_v17 = vcombine.high %v11427_v59, %v11427_v59 }
 0x4ae   :  { %v2629_v52 = vpop.xlane.xlu1 %2628 }
 0x4af   :  { %11110 = vrcp.f32 %v2629_v52 }
 0x4b2   :  { %v2632_v24 = vpop.xlane.xlu0 %2631  ;;  %v2635_v58 = vpop.xlane.xlu1 %2634 }
 0x4b3   :  { %11112 = vrcp.f32 %v2632_v24 }
 0x4b4   :  { %11114 = vrcp.f32 %v2635_v58 }
 0x4b6   :  { %v1530_v31 = vpop.xlane.xlu0 %1529  ;;  %v1533_v1 = vpop.xlane.xlu1 %1532 }
 0x4b7   :  { %11116 = vrcp.f32 %v1530_v31 }
 0x4b8   :  { %v11109_v27 = vpop.eup %11108  ;;  %11118 = vrcp.f32 %v1533_v1 }
 0x4b9   :  { %v2637_v47 = vmul.f32 %v11109_v27, %v11093_v5 }
 0x4bb   :  { %10823 = vmatprep.mubr.msk.f32.mxu0 %vm1496_vm5, %v2637_v47 }
 0x4bc   :  { %v11111_v7 = vpop.eup %11110 }
 0x4bd   :  { %v2639_v26 = vmul.f32 %v11111_v7, %v11095_v9 }
 0x4bf   :  { %10824 = vmatmul.mubr.msk.f32.vlgmr.msra.gmra.mxu0 %vm1496_vm5, %v2639_v26 }
 0x4c0   :  { %v11113_v35 = vpop.eup %11112  ;;  %10827 = vmatpush3.msk.msra.mxu0 %vm174_vm2, %v11974_v34 }
 0x4c1   :  { %v11115_v43 = vpop.eup %11114  ;;  %10828 = vmatprep.subr.mxu0 %v11836_v48  ;;  %v2641_v8 = vmul.f32 %v11113_v35, %v11099_v16 }
 0x4c2   :  { %10829 = vmatpush3.msra.mxu0 %v11836_v48  ;;  %v2643_v62 = vmul.f32 %v11115_v43, %v11097_v2  ;;  %v10364_v48 = vld [vmem:[%s14303_s10] ss:$0 sm:$0xff] }
 0x4c3   :  { %10830 = vmatprep.mubr.msk.f32.mxu0 %vm1496_vm5, %v2641_v8  ;;  %10840 = vmatprep.subr.msk.mxu0 %vm174_vm2, %v3147_v23  ;;  %v3386_v6 = vcombine.high %v10364_v48, %v10364_v48  ;;  %v3393_v18 = vrot.slane %v10364_v48, %v11376_v28  ;;  %v227_v48 = vcombine.high %v11430_v60, %v11430_v60 }
 0x4c4   :  { %v11117_v25 = vpop.eup %11116  ;;  %10831 = vmatmul.mubr.msk.f32.vlgmr.msra.gmra.mxu0 %vm1496_vm5, %v2643_v62 }
 0x4c5   :  { %v11119_v13 = vpop.eup %11118  ;;  %10841 = vmatpush3.msk.msra.mxu0 %vm174_vm2, %v3147_v23  ;;  %v1539_v34 = vmul.f32 %v11117_v25, %v11103_v32  ;;  %v3400_v36 = vrot.slane %v3386_v6, %v11376_v28  ;;  %v3401_v29 = vcombine.high %v3393_v18, %v3393_v18  ;;  %v12051_v61 = vrot.slane %v3393_v18, %v11376_v28 }
 0x4c6   :  { %10842 = vmatprep.subr.mxu0 %v11838_v55  ;;  %v1541_v41 = vmul.f32 %v11119_v13, %v11101_v0 }
 0x4c7   :  { %10843 = vmatpush3.msra.mxu0 %v11838_v55  ;;  %10844 = vmatprep.mubr.msk.f32.mxu0 %vm1496_vm5, %v1539_v34  ;;  %v3402_v63 = vcombine.high %v3400_v36, %v3400_v36  ;;  %v12040_v38 = vrot.slane %v3400_v36, %v11376_v28  ;;  %v12043_v2 = vrot.slane %v3401_v29, %v11376_v28 }
 0x4c8   :  { %10845 = vmatmul.mubr.msk.f32.vlgmr.msra.gmra.mxu0 %vm1496_vm5, %v1541_v41  ;;  %10864 = vmatprep.subr.mxu0 %v14353_v20  ;;  %v3431_v52 = vcombine.high %v12051_v61, %v12051_v61 }
 0x4c9   :  { %10872 = vmatprep.mubr.msk.f32.mxu0 %vm11197_vm1, %v14353_v20  ;;  %v12047_v19 = vrot.slane %v3402_v63, %v11376_v28  ;;  %v12063_v24 = vcombine.high %v12040_v38, %v12040_v38  ;;  %v3433_v58 = vcombine.high %v12043_v2, %v12043_v2 }
 0x4cb   :  { %v12073_v40 = vcombine.high %v12047_v19, %v12047_v19 }
 0x4f2   :  { %v10839_v30 = vpop.f32.mrf.mxu1 }
 0x4f4   :  { %v3076_v5 = vpop.f32.mrf.mxu1 }
 0x57f   :  { %v10825_v55 = vpop.f32.mrf.mxu0 }
 0x580   :  { %v3082_v33 = vadd.f32 %v10839_v30, %v10825_v55 }
 0x581   :  { %v2782_v9 = vpop.f32.mrf.mxu0 }
 0x582   :  { %v3077_v37 = vadd.f32 %v3076_v5, %v2782_v9  ;;  %v3291_v32 = vrot.slane %v3082_v33, %v11376_v28 }
 0x584   :  { %v3236_v16 = vcombine.high %v3077_v37, %v3077_v37  ;;  %v3243_v4 = vrot.slane %v3077_v37, %v11376_v28  ;;  %v10832_v0 = vpop.f32.mrf.mxu0  ;;  %v3298_v7 = vrot.slane %v3291_v32, %v11376_v28 }
 0x586   :  { %v3250_v10 = vrot.slane %v3236_v16, %v11376_v28  ;;  %v3251_v11 = vcombine.high %v3243_v4, %v3243_v4  ;;  %v3259_v14 = vrot.slane %v3243_v4, %v11376_v28  ;;  %v2929_v21 = vpop.f32.mrf.mxu0  ;;  %v3451_v55 = vadd.f32 %v12051_v61, %v3298_v7 }
 0x588   :  { %v3252_v31 = vcombine.high %v3250_v10, %v3250_v10  ;;  %v3266_v1 = vrot.slane %v3250_v10, %v11376_v28  ;;  %v3273_v27 = vrot.slane %v3251_v11, %v11376_v28  ;;  %v10846_v47 = vpop.f32.mrf.mxu0  ;;  %v3281_v57 = vcombine.high %v3259_v14, %v3259_v14 }
 0x589   :  { %v3443_v26 = vadd.f32 %v12051_v61, %v3259_v14  ;;  %v3229_v35 = vadd.f32 %v10846_v47, %v10832_v0 }
 0x58a   :  { %v3280_v43 = vrot.slane %v3252_v31, %v11376_v28  ;;  %v3282_v8 = vcombine.high %v3266_v1, %v3266_v1  ;;  %v3283_v23 = vcombine.high %v3273_v27, %v3273_v27  ;;  %v3444_v62 = vadd.f32 %v12043_v2, %v3273_v27  ;;  %v3223_v41 = vpop.f32.mrf.mxu0 }
 0x58b   :  { %v3445_v25 = vadd.f32 %v3431_v52, %v3281_v57  ;;  %v3447_v13 = vadd.f32 %v12040_v38, %v3266_v1  ;;  %v3354_v34 = vrot.slane %v3229_v35, %v11376_v28  ;;  %v12087_v29 = vadd.f32 %v3443_v26, %v11413_v53 }
 0x58c   :  { %v3284_v6 = vcombine.high %v3280_v43, %v3280_v43  ;;  %v3446_v36 = vadd.f32 %v3433_v58, %v3283_v23  ;;  %v3448_v30 = vadd.f32 %v12047_v19, %v3280_v43  ;;  %v3449_v18 = vadd.f32 %v12063_v24, %v3282_v8 }
 0x58d   :  { %v12090_v63 = vadd.f32 %v3444_v62, %v11416_v54  ;;  %v12092_v5 = vadd.f32 %v3445_v25, %v224_v3  ;;  %v3224_v9 = vadd.f32 %v3223_v41, %v2929_v21  ;;  %v12101_v4 = vadd.f32 %v3447_v13, %v11427_v59 }
 0x58e   :  { %v3450_v33 = vadd.f32 %v12073_v40, %v3284_v6  ;;  %v12095_v37 = vadd.f32 %v3446_v36, %v226_v56  ;;  %v12098_v16 = vadd.f32 %v3448_v30, %v11430_v60  ;;  %v3361_v0 = vrot.slane %v3354_v34, %v11376_v28 }
 0x58f   :  { %v12104_v53 = vadd.f32 %v3449_v18, %v225_v17  ;;  %v3499_v54 = vcombine.low %v12087_v29, %v12090_v63  ;;  %v3299_v32 = vcombine.high %v3224_v9, %v3224_v9  ;;  %v3306_v3 = vrot.slane %v3224_v9, %v11376_v28 }
 0x590   :  { %v12109_v10 = vadd.f32 %v3450_v33, %v227_v48  ;;  %v3500_v11 = vcombine.low %v12092_v5, %v12095_v37  ;;  %v3501_v60 = vcombine.low %v12101_v4, %v12098_v16  ;;  %v12120_v56 = vadd.f32 %v3451_v55, %v11388_v42 }
 0x591   :  { %v3313_v59 = vrot.slane %v3299_v32, %v11376_v28  ;;  %v3314_v14 = vcombine.high %v3306_v3, %v3306_v3  ;;  %v3322_v21 = vrot.slane %v3306_v3, %v11376_v28  ;;  %v3460_v31 = vadd.f32 %v12043_v2, %v3361_v0 }
 0x592   :  { %v3502_v17 = vcombine.low %v12104_v53, %v12109_v10  ;;  %v3509_v1 = vrot.slane %v3499_v54, %v11376_v28  ;;  %v3516_v27 = vrot.slane %v3500_v11, %v11376_v28  ;;  %v3523_v43 = vrot.slane %v3501_v60, %v11376_v28 }
 0x593   :  { %v3315_v47 = vcombine.high %v3313_v59, %v3313_v59  ;;  %v3329_v7 = vrot.slane %v3313_v59, %v11376_v28  ;;  %v3336_v57 = vrot.slane %v3314_v14, %v11376_v28  ;;  %v3344_v26 = vcombine.high %v3322_v21, %v3322_v21 }
 0x594   :  { %v3452_v35 = vadd.f32 %v12043_v2, %v3322_v21  ;;  %v3530_v8 = vrot.slane %v3502_v17, %v11376_v28  ;;  %v3531_v42 = vcombine.low %v3509_v1, %v3516_v27  ;;  %v12187_v27 = vsub.s32 0, %v11373_v22 }
 0x595   :  { %v3343_v23 = vrot.slane %v3315_v47, %v11376_v28  ;;  %v3345_v62 = vcombine.high %v3329_v7, %v3329_v7  ;;  %v3346_v25 = vcombine.high %v3336_v57, %v3336_v57  ;;  %v3453_v13 = vadd.f32 %v3431_v52, %v3336_v57 }
 0x596   :  { %v3454_v34 = vadd.f32 %v3433_v58, %v3344_v26  ;;  %v3456_v41 = vadd.f32 %v12047_v19, %v3329_v7  ;;  %v12133_v48 = vadd.f32 %v3452_v35, %v11384_v39  ;;  %v3532_v6 = vcombine.low %v3523_v43, %v3530_v8  ;;  %14354 = vst [vmem:[#allocation5_spill] sm:$0xff] %v12187_v27 }
 0x597   :  { %v3347_v36 = vcombine.high %v3343_v23, %v3343_v23  ;;  %v3455_v2 = vadd.f32 %v12040_v38, %v3346_v25  ;;  %v3457_v30 = vadd.f32 %v12063_v24, %v3343_v23  ;;  %v3458_v18 = vadd.f32 %v12073_v40, %v3345_v62 }
 0x598   :  { %v12139_v55 = vadd.f32 %v3453_v13, %v11394_v45  ;;  %v12142_v33 = vadd.f32 %v3454_v34, %v11398_v46  ;;  %v12145_v52 = vadd.f32 %v3456_v41, %v11391_v44  ;;  %v3539_v39 = vrot.slane %v3531_v42, %v11376_v28 }
 0x599   :  { %v3546_v19 = vrot.slane %v3532_v6, %v11376_v28  ;;  %v3459_v58 = vadd.f32 %v12051_v61, %v3347_v36  ;;  %v12151_v38 = vadd.f32 %v3455_v2, %v11410_v51  ;;  %v12154_v24 = vadd.f32 %v3457_v30, %v11402_v49 }
 0x59a   :  { %v12157_v45 = vadd.f32 %v3458_v18, %v11406_v50  ;;  %v3548_v46 = vcombine.low %v12120_v56, %v12133_v48  ;;  %v3549_v44 = vcombine.low %v12139_v55, %v12142_v33  ;;  %v12167_v61 = vadd.f32 %v3460_v31, %v11454_v15 }
 0x59b   :  { %v3547_v40 = vcombine.low %v3539_v39, %v3546_v19  ;;  %v12164_v9 = vadd.f32 %v3459_v58, %v11451_v12  ;;  %v3550_v49 = vcombine.low %v12151_v38, %v12145_v52  ;;  %v12190_v47 = vsub.s32 1, %v11373_v22 }
 0x59c   :  { %v3551_v50 = vcombine.low %v12154_v24, %v12157_v45  ;;  %v3558_v51 = vrot.slane %v3548_v46, %v11376_v28  ;;  %v3565_v0 = vrot.slane %v3549_v44, %v11376_v28  ;;  %v12193_v7 = vsub.s32 2, %v11373_v22 }
 0x59d   :  { %v3615_v54 = vsel %vm447_vm3, %v3547_v40, 0.0  ;;  %v3597_v32 = vcombine.low %v12164_v9, %v12167_v61  ;;  %v3572_v12 = vrot.slane %v3550_v49, %v11376_v28  ;;  %14355 = vst [vmem:[#allocation6_spill] sm:$0xff] %v12190_v47  ;;  %v12196_v57 = vsub.s32 3, %v11373_v22 }
 0x59e   :  { %3616 = vadd.xlane.f32.xlu0 %v3615_v54  ;;  %v3579_v15 = vrot.slane %v3551_v50, %v11376_v28  ;;  %v3580_v3 = vcombine.low %v3558_v51, %v3565_v0  ;;  %14356 = vst [vmem:[#allocation7_spill] sm:$0xff] %v12193_v7  ;;  %v12199_v35 = vsub.s32 4, %v11373_v22  ;;  %v12202_v43 = vsub.s32 5, %v11373_v22 }
 0x59f   :  { %v3604_v11 = vrot.slane %v3597_v32, %v11376_v28  ;;  %14357 = vst [vmem:[#allocation8_spill] sm:$0xff] %v12196_v57  ;;  %v12205_v8 = vsub.s32 6, %v11373_v22  ;;  %v12208_v42 = vsub.s32 7, %v11373_v22 }
 0x5a0   :  { %v3581_v60 = vcombine.low %v3572_v12, %v3579_v15  ;;  %v3588_v14 = vrot.slane %v3580_v3, %v11376_v28  ;;  %14358 = vst [vmem:[#allocation9_spill] sm:$0xff] %v12199_v35  ;;  %14359 = vst [vmem:[#allocation10_spill] sm:$0xff] %v12202_v43 }
 0x5a1   :  { %v3611_v59 = vrot.slane %v3604_v11, %v11376_v28  ;;  %14360 = vst [vmem:[#allocation11_spill] sm:$0xff] %v12205_v8  ;;  %14361 = vst [vmem:[#allocation12_spill] sm:$0xff] %v12208_v42 }
 0x5a2   :  { %v3595_v21 = vrot.slane %v3581_v60, %v11376_v28 }
 0x5a3   :  { %v3622_v17 = vsel %vm3621_vm6, %v3611_v59, 0.0 }
 0x5a4   :  { %3623 = vadd.xlane.f32.xlu0 %v3622_v17  ;;  %v3596_v31 = vcombine.low %v3588_v14, %v3595_v21 }
 0x5a6   :  { %v3618_v1 = vsel %vm447_vm3, %v3596_v31, 0.0 }
 0x5a7   :  { %3619 = vadd.xlane.f32.xlu1 %v3618_v1 }
 0x627   :  { %v3617_v26 = vpop.xlane.xlu0 %3616 }
 0x628   :  { %v3626_v23 = vmul.f32 0.03125, %v3617_v26 }
 0x62a   :  { %v3635_v62 = vrot.slane %v3626_v23, %v12187_v27  ;;  %v3639_v25 = vrot.slane %v3626_v23, %v12190_v47  ;;  %v3643_v13 = vrot.slane %v3626_v23, %v12193_v7  ;;  %v3647_v34 = vrot.slane %v3626_v23, %v12196_v57 }
 0x62b   :  { %v3651_v41 = vrot.slane %v3626_v23, %v12199_v35  ;;  %v3655_v6 = vrot.slane %v3626_v23, %v12202_v43  ;;  %v3659_v36 = vrot.slane %v3626_v23, %v12205_v8  ;;  %v3663_v2 = vrot.slane %v3626_v23, %v12208_v42 }
 0x62c   :  { %v12219_v22 = vsub.f32 %v12087_v29, %v3635_v62  ;;  %v12222_v30 = vsub.f32 %v12090_v63, %v3639_v25  ;;  %v12225_v18 = vsub.f32 %v12092_v5, %v3643_v13  ;;  %v12228_v39 = vsub.f32 %v12095_v37, %v3647_v34 }
 0x62d   :  { %v3624_v19 = vpop.xlane.xlu0 %3623  ;;  %v12231_v58 = vsub.f32 %v12101_v4, %v3651_v41  ;;  %v12234_v46 = vsub.f32 %v12098_v16, %v3655_v6  ;;  %v12237_v44 = vsub.f32 %v12104_v53, %v3659_v36  ;;  %v12240_v29 = vsub.f32 %v12109_v10, %v3663_v2 }
 0x62e   :  { %v3628_v63 = vmul.f32 0.03125, %v3624_v19  ;;  %v3740_v5 = vmul.f32 %v12219_v22, %v12219_v22  ;;  %v3741_v37 = vmul.f32 %v12222_v30, %v12222_v30  ;;  %v3742_v4 = vmul.f32 %v12225_v18, %v12225_v18 }
 0x62f   :  { %v3743_v16 = vmul.f32 %v12228_v39, %v12228_v39  ;;  %v3744_v53 = vmul.f32 %v12231_v58, %v12231_v58  ;;  %v3745_v10 = vmul.f32 %v12234_v46, %v12234_v46  ;;  %v3746_v40 = vmul.f32 %v12237_v44, %v12237_v44 }
 0x630   :  { %v3699_v49 = vrot.slane %v3628_v63, %v12187_v27  ;;  %v3703_v50 = vrot.slane %v3628_v63, %v12190_v47  ;;  %v3620_v51 = vpop.xlane.xlu1 %3619  ;;  %v3747_v0 = vmul.f32 %v12240_v29, %v12240_v29  ;;  %v3776_v54 = vcombine.low %v3740_v5, %v3741_v37 }
 0x631   :  { %v3627_v32 = vmul.f32 0.03125, %v3620_v51  ;;  %v3777_v12 = vcombine.low %v3742_v4, %v3743_v16  ;;  %v3778_v15 = vcombine.low %v3744_v53, %v3745_v10 }
 0x632   :  { %v12261_v3 = vsub.f32 %v12164_v9, %v3699_v49  ;;  %v12264_v11 = vsub.f32 %v12167_v61, %v3703_v50  ;;  %v3779_v60 = vcombine.low %v3746_v40, %v3747_v0  ;;  %v3786_v59 = vrot.slane %v3776_v54, %v11376_v28 }
 0x633   :  { %v3793_v14 = vrot.slane %v3777_v12, %v11376_v28  ;;  %v3800_v21 = vrot.slane %v3778_v15, %v11376_v28  ;;  %v3667_v17 = vrot.slane %v3627_v32, %v12187_v27  ;;  %v3671_v31 = vrot.slane %v3627_v32, %v12190_v47 }
 0x634   :  { %v3756_v1 = vmul.f32 %v12261_v3, %v12261_v3  ;;  %v3757_v9 = vmul.f32 %v12264_v11, %v12264_v11  ;;  %v3807_v61 = vrot.slane %v3779_v60, %v11376_v28  ;;  %v3675_v26 = vrot.slane %v3627_v32, %v12193_v7 }
 0x635   :  { %v3808_v23 = vcombine.low %v3786_v59, %v3793_v14  ;;  %v3679_v62 = vrot.slane %v3627_v32, %v12196_v57  ;;  %v3683_v25 = vrot.slane %v3627_v32, %v12199_v35  ;;  %v3687_v13 = vrot.slane %v3627_v32, %v12202_v43 }
 0x636   :  { %v3809_v34 = vcombine.low %v3800_v21, %v3807_v61  ;;  %v3874_v41 = vcombine.low %v3756_v1, %v3757_v9  ;;  %v3691_v6 = vrot.slane %v3627_v32, %v12205_v8  ;;  %v3695_v36 = vrot.slane %v3627_v32, %v12208_v42 }
 0x637   :  { %v3816_v2 = vrot.slane %v3808_v23, %v11376_v28  ;;  %v12284_v19 = vsub.f32 %v12120_v56, %v3667_v17  ;;  %v12287_v63 = vsub.f32 %v12133_v48, %v3671_v31  ;;  %v12290_v5 = vsub.f32 %v12139_v55, %v3675_v26 }
 0x638   :  { %v3823_v37 = vrot.slane %v3809_v34, %v11376_v28  ;;  %v3881_v4 = vrot.slane %v3874_v41, %v11376_v28  ;;  %v12295_v16 = vsub.f32 %v12142_v33, %v3679_v62  ;;  %v12298_v53 = vsub.f32 %v12151_v38, %v3683_v25  ;;  %v4184_v62 = vld [vmem:[%s14306_s13 + $0x18] sm:$0xff]  ;;  %v4183_v25 = vld [vmem:[%s14306_s13 + $0x10] sm:$0xff]  ;;  %v4181_v34 = vld [vmem:[%s14306_s13] sm:$0xff] }
 0x639   :  { %v12301_v10 = vsub.f32 %v12145_v52, %v3687_v13  ;;  %v12304_v56 = vsub.f32 %v12154_v24, %v3691_v6  ;;  %v12307_v48 = vsub.f32 %v12157_v45, %v3695_v36  ;;  %v3748_v55 = vmul.f32 %v12284_v19, %v12284_v19  ;;  %10848 = vmatpush3.msra.mxu1 %v4184_v62  ;;  %v4182_v13 = vld [vmem:[%s14306_s13 + $0x8] sm:$0xff]  ;;  %v4415_v41 = vld [vmem:[%s14308_s15 + $0x18] sm:$0xff]  ;;  %v10365_v6 = vld [vmem:[%s14304_s11] ss:$0 sm:$0xff] }
 0x63a   :  { %v3824_v40 = vcombine.low %v3816_v2, %v3823_v37  ;;  %v3749_v33 = vmul.f32 %v12287_v63, %v12287_v63  ;;  %v3750_v38 = vmul.f32 %v12290_v5, %v12290_v5  ;;  %v3751_v52 = vmul.f32 %v12295_v16, %v12295_v16  ;;  %10849 = vmatprep.subr.mxu1 %v14353_v20  ;;  %v10366_v36 = vld [vmem:[%s14305_s12] ss:$0 sm:$0xff] }
 0x63b   :  { %v3752_v24 = vmul.f32 %v12298_v53, %v12298_v53  ;;  %v3753_v45 = vmul.f32 %v12301_v10, %v12301_v10  ;;  %v3754_v49 = vmul.f32 %v12304_v56, %v12304_v56  ;;  %v3888_v51 = vrot.slane %v3881_v4, %v11376_v28  ;;  %10850 = vmatpush3.msra.mxu1 %v4183_v25 }
 0x63c   :  { %v3892_v50 = vsel %vm447_vm3, %v3824_v40, 0.0  ;;  %v3755_v0 = vmul.f32 %v12307_v48, %v12307_v48  ;;  %v3825_v54 = vcombine.low %v3748_v55, %v3749_v33  ;;  %v3826_v32 = vcombine.low %v3750_v38, %v3751_v52  ;;  %10851 = vmatprep.subr.mxu1 %v14353_v20  ;;  %10865 = vmatpush3.msra.mxu0 %v4415_v41 }
 0x63d   :  { %3893 = vadd.xlane.f32.xlu1 %v3892_v50  ;;  %v3827_v12 = vcombine.low %v3752_v24, %v3753_v45  ;;  %v3898_v21 = vsel %vm3621_vm6, %v3888_v51, 0.0  ;;  %10852 = vmatpush3.msra.mxu1 %v4182_v13  ;;  %v4026_v4 = vcombine.high %v10365_v6, %v10365_v6  ;;  %v4106_v55 = vcombine.high %v10366_v36, %v10366_v36 }
 0x63e   :  { %v3828_v15 = vcombine.low %v3754_v49, %v3755_v0  ;;  %v3835_v60 = vrot.slane %v3825_v54, %v11376_v28  ;;  %v3842_v59 = vrot.slane %v3826_v32, %v11376_v28  ;;  %10853 = vmatprep.subr.mxu1 %v14353_v20  ;;  %10866 = vmatprep.subr.mxu0 %v14353_v20 }
 0x63f   :  { %v3849_v14 = vrot.slane %v3827_v12, %v11376_v28  ;;  %10854 = vmatpush3.msra.mxu1 %v4181_v34  ;;  %v4033_v52 = vrot.slane %v10365_v6, %v11376_v28  ;;  %v4040_v24 = vrot.slane %v4026_v4, %v11376_v28  ;;  %v4113_v45 = vrot.slane %v10366_v36, %v11376_v28 }
 0x640   :  { %v3856_v17 = vrot.slane %v3828_v15, %v11376_v28  ;;  %v3857_v31 = vcombine.low %v3835_v60, %v3842_v59  ;;  %10881 = vmatprep.subr.mxu1 %v14353_v20  ;;  %v4120_v49 = vrot.slane %v4106_v55, %v11376_v28 }
 0x641   :  { %3899 = vadd.xlane.f32.xlu1 %v3898_v21  ;;  %v4041_v51 = vcombine.high %v4033_v52, %v4033_v52  ;;  %v4042_v0 = vcombine.high %v4040_v24, %v4040_v24  ;;  %v4121_v54 = vcombine.high %v4113_v45, %v4113_v45  ;;  %v12366_v15 = vrot.slane %v4033_v52, %v11376_v28 }
 0x642   :  { %v3858_v1 = vcombine.low %v3849_v14, %v3856_v17  ;;  %v3865_v9 = vrot.slane %v3857_v31, %v11376_v28  ;;  %v4122_v32 = vcombine.high %v4120_v49, %v4120_v49  ;;  %v12369_v59 = vrot.slane %v4040_v24, %v11376_v28 }
 0x643   :  { %v12372_v14 = vrot.slane %v4041_v51, %v11376_v28  ;;  %v12375_v21 = vrot.slane %v4113_v45, %v11376_v28  ;;  %v12378_v17 = vrot.slane %v4042_v0, %v11376_v28  ;;  %v12381_v31 = vrot.slane %v4120_v49, %v11376_v28 }
 0x644   :  { %v3872_v61 = vrot.slane %v3858_v1, %v11376_v28  ;;  %v12384_v1 = vrot.slane %v4121_v54, %v11376_v28 }
 0x645   :  { %v12399_v62 = vcombine.high %v12372_v14, %v12372_v14  ;;  %v12403_v25 = vcombine.high %v12375_v21, %v12375_v21  ;;  %v12407_v34 = vcombine.high %v12378_v17, %v12378_v17  ;;  %v12411_v41 = vcombine.high %v12381_v31, %v12381_v31 }
 0x646   :  { %v3873_v26 = vcombine.low %v3865_v9, %v3872_v61  ;;  %v12387_v9 = vrot.slane %v4122_v32, %v11376_v28  ;;  %v12415_v6 = vcombine.high %v12384_v1, %v12384_v1 }
 0x648   :  { %v3895_v23 = vsel %vm447_vm3, %v3873_v26, 0.0  ;;  %v12391_v26 = vcombine.high %v12366_v15, %v12366_v15  ;;  %v12419_v36 = vcombine.high %v12387_v9, %v12387_v9 }
 0x649   :  { %3896 = vadd.xlane.f32.xlu0 %v3895_v23  ;;  %v12395_v23 = vcombine.high %v12369_v59, %v12369_v59 }
 0x6c6   :  { %v3894_v2 = vpop.xlane.xlu1 %3893 }
 0x6c7   :  { %v3901_v37 = vmul.f32 0.03125, %v3894_v2 }
 0x6c9   :  { %v3904_v40 = vadd.f32 1e-05, %v3901_v37 }
 0x6ca   :  { %v3900_v33 = vpop.xlane.xlu1 %3899 }
 0x6cb   :  { %11120 = vrsqrt.f32 %v3904_v40  ;;  %v3903_v38 = vmul.f32 0.03125, %v3900_v33 }
 0x6cd   :  { %v3906_v50 = vadd.f32 1e-05, %v3903_v38 }
 0x6cf   :  { %11122 = vrsqrt.f32 %v3906_v50 }
 0x6d2   :  { %v3897_v12 = vpop.xlane.xlu0 %3896 }
 0x6d3   :  { %v3902_v60 = vmul.f32 0.03125, %v3897_v12 }
 0x6d5   :  { %v3905_v61 = vadd.f32 1e-05, %v3902_v60 }
 0x6d7   :  { %11124 = vrsqrt.f32 %v3905_v61 }
 0x6d8   :  { %v11121_v13 = vpop.eup %11120 }
 0x6d9   :  { %v3916_v2 = vrot.slane %v11121_v13, %v12187_v27  ;;  %v3920_v37 = vrot.slane %v11121_v13, %v12190_v47  ;;  %v3924_v4 = vrot.slane %v11121_v13, %v12193_v7  ;;  %v3928_v55 = vrot.slane %v11121_v13, %v12196_v57 }
 0x6da   :  { %v3932_v40 = vrot.slane %v11121_v13, %v12199_v35  ;;  %v3936_v33 = vrot.slane %v11121_v13, %v12202_v43  ;;  %v3940_v38 = vrot.slane %v11121_v13, %v12205_v8  ;;  %v3944_v52 = vrot.slane %v11121_v13, %v12208_v42 }
 0x6db   :  { %v4003_v24 = vmul.f32 %v3916_v2, %v12219_v22  ;;  %v4004_v45 = vmul.f32 %v3920_v37, %v12222_v30  ;;  %v4005_v49 = vmul.f32 %v3924_v4, %v12225_v18  ;;  %v4006_v50 = vmul.f32 %v3928_v55, %v12228_v39 }
 0x6dc   :  { %v11123_v51 = vpop.eup %11122  ;;  %v4007_v0 = vmul.f32 %v3932_v40, %v12231_v58  ;;  %v4008_v54 = vmul.f32 %v3936_v33, %v12234_v46  ;;  %v4009_v32 = vmul.f32 %v3940_v38, %v12237_v44  ;;  %v4010_v12 = vmul.f32 %v3944_v52, %v12240_v29 }
 0x6dd   :  { %v3980_v60 = vrot.slane %v11123_v51, %v12187_v27  ;;  %v3984_v61 = vrot.slane %v11123_v51, %v12190_v47  ;;  %v4083_v22 = vmul.f32 %v12366_v15, %v4003_v24  ;;  %v4084_v30 = vmul.f32 %v12372_v14, %v4004_v45 }
 0x6de   :  { %v4085_v18 = vmul.f32 %v12391_v26, %v4005_v49  ;;  %v4086_v39 = vmul.f32 %v12399_v62, %v4006_v50  ;;  %v4087_v58 = vmul.f32 %v12369_v59, %v4007_v0  ;;  %v4088_v46 = vmul.f32 %v12378_v17, %v4008_v54 }
 0x6df   :  { %v4089_v44 = vmul.f32 %v12395_v23, %v4009_v32  ;;  %v4090_v29 = vmul.f32 %v12407_v34, %v4010_v12  ;;  %v12448_v13 = vadd.f32 %v12375_v21, %v4083_v22  ;;  %v12451_v2 = vadd.f32 %v12384_v1, %v4084_v30 }
 0x6e0   :  { %v12454_v37 = vadd.f32 %v12403_v25, %v4085_v18  ;;  %v12457_v4 = vadd.f32 %v12415_v6, %v4086_v39  ;;  %v12460_v55 = vadd.f32 %v12381_v31, %v4087_v58  ;;  %v12463_v40 = vadd.f32 %v12387_v9, %v4088_v46 }
 0x6e1   :  { %v12466_v33 = vadd.f32 %v12411_v41, %v4089_v44  ;;  %v12469_v38 = vadd.f32 %v12419_v36, %v4090_v29  ;;  %v4210_v52 = vcombine.low %v12448_v13, %v12451_v2  ;;  %v4019_v24 = vmul.f32 %v3980_v60, %v12261_v3 }
 0x6e2   :  { %v4211_v45 = vcombine.low %v12454_v37, %v12457_v4  ;;  %v4212_v49 = vcombine.low %v12460_v55, %v12463_v40  ;;  %v4020_v50 = vmul.f32 %v3984_v61, %v12264_v11 }
 0x6e3   :  { %v4213_v51 = vcombine.low %v12466_v33, %v12469_v38  ;;  %v4220_v0 = vrot.slane %v4210_v52, %v11376_v28  ;;  %v4099_v3 = vmul.f32 %v12366_v15, %v4019_v24 }
 0x6e4   :  { %v11125_v54 = vpop.eup %11124  ;;  %v4227_v32 = vrot.slane %v4211_v45, %v11376_v28  ;;  %v4234_v12 = vrot.slane %v4212_v49, %v11376_v28  ;;  %v4100_v60 = vmul.f32 %v12372_v14, %v4020_v50 }
 0x6e5   :  { %v4241_v22 = vrot.slane %v4213_v51, %v11376_v28  ;;  %v3948_v30 = vrot.slane %v11125_v54, %v12187_v27  ;;  %v3952_v11 = vrot.slane %v11125_v54, %v12190_v47  ;;  %v3956_v61 = vrot.slane %v11125_v54, %v12193_v7 }
 0x6e6   :  { %v4242_v18 = vcombine.low %v4220_v0, %v4227_v32  ;;  %v3960_v39 = vrot.slane %v11125_v54, %v12196_v57  ;;  %v3964_v58 = vrot.slane %v11125_v54, %v12199_v35  ;;  %v3968_v46 = vrot.slane %v11125_v54, %v12202_v43 }
 0x6e7   :  { %v4243_v44 = vcombine.low %v4234_v12, %v4241_v22  ;;  %v3972_v29 = vrot.slane %v11125_v54, %v12205_v8  ;;  %v3976_v52 = vrot.slane %v11125_v54, %v12208_v42  ;;  %v4011_v24 = vmul.f32 %v3948_v30, %v12284_v19 }
 0x6e8   :  { %v4250_v45 = vrot.slane %v4242_v18, %v11376_v28  ;;  %v4012_v49 = vmul.f32 %v3952_v11, %v12287_v63  ;;  %v4013_v50 = vmul.f32 %v3956_v61, %v12290_v5  ;;  %v4014_v51 = vmul.f32 %v3960_v39, %v12295_v16 }
 0x6e9   :  { %v4257_v0 = vrot.slane %v4243_v44, %v11376_v28  ;;  %v4015_v32 = vmul.f32 %v3964_v58, %v12298_v53  ;;  %v4016_v12 = vmul.f32 %v3968_v46, %v12301_v10  ;;  %v4017_v22 = vmul.f32 %v3972_v29, %v12304_v56 }
 0x6ea   :  { %v4018_v54 = vmul.f32 %v3976_v52, %v12307_v48  ;;  %v4091_v19 = vmul.f32 %v12366_v15, %v4011_v24  ;;  %v4092_v30 = vmul.f32 %v12372_v14, %v4012_v49  ;;  %v4093_v63 = vmul.f32 %v12391_v26, %v4013_v50  ;;  %v4413_v24 = vld [vmem:[%s14308_s15 + $0x8] sm:$0xff]  ;;  %v10367_v49 = vld [vmem:[%s14307_s14] ss:$0 sm:$0xff] }
 0x6eb   :  { %v4258_v11 = vcombine.low %v4250_v45, %v4257_v0  ;;  %v4094_v5 = vmul.f32 %v12399_v62, %v4014_v51  ;;  %v4095_v16 = vmul.f32 %v12369_v59, %v4015_v32  ;;  %v4096_v61 = vmul.f32 %v12378_v17, %v4016_v12  ;;  %v4412_v45 = vld [vmem:[%s14308_s15] sm:$0xff] }
 0x6ec   :  { %v4097_v53 = vmul.f32 %v12395_v23, %v4017_v22  ;;  %v4098_v10 = vmul.f32 %v12407_v34, %v4018_v54  ;;  %v12514_v56 = vadd.f32 %v12375_v21, %v4091_v19  ;;  %v12517_v48 = vadd.f32 %v12384_v1, %v4092_v30 }
 0x6ed   :  { %10856 = vmatmul.mubr.msk.f32.vlgmr.msra.gmra.mxu1 %vm447_vm3, %v4258_v11  ;;  %v12521_v15 = vadd.f32 %v12403_v25, %v4093_v63  ;;  %v12524_v14 = vadd.f32 %v12415_v6, %v4094_v5  ;;  %v12527_v59 = vadd.f32 %v12381_v31, %v4095_v16  ;;  %v12530_v17 = vadd.f32 %v12387_v9, %v4096_v61  ;;  %v10371_v16 = vld [vmem:[%s14309_s16] ss:$0 sm:$0xff] }
 0x6ee   :  { %10858 = vmatprep.mubr.msk.f32.mxu1 %vm11197_vm1, %v14353_v20  ;;  %v12535_v26 = vadd.f32 %v12411_v41, %v4097_v53  ;;  %v12538_v23 = vadd.f32 %v12419_v36, %v4098_v10  ;;  %v4259_v62 = vcombine.low %v12514_v56, %v12517_v48  ;;  %v12550_v41 = vadd.f32 %v12375_v21, %v4099_v3 }
 0x6ef   :  { %v4260_v25 = vcombine.low %v12521_v15, %v12524_v14  ;;  %v4261_v31 = vcombine.low %v12527_v59, %v12530_v17  ;;  %v12553_v6 = vadd.f32 %v12384_v1, %v4100_v60  ;;  %v4414_v60 = vld [vmem:[%s14308_s15 + $0x10] sm:$0xff] }
 0x6f0   :  { %v4262_v9 = vcombine.low %v12535_v26, %v12538_v23  ;;  %v4269_v34 = vrot.slane %v4259_v62, %v11376_v28  ;;  %10867 = vmatpush3.msra.mxu0 %v4414_v60 }
 0x6f1   :  { %v4276_v36 = vrot.slane %v4260_v25, %v11376_v28  ;;  %v4283_v18 = vrot.slane %v4261_v31, %v11376_v28  ;;  %v4308_v44 = vcombine.low %v12550_v41, %v12553_v6  ;;  %10868 = vmatprep.subr.mxu0 %v14353_v20 }
 0x6f2   :  { %v4290_v39 = vrot.slane %v4262_v9, %v11376_v28  ;;  %10869 = vmatpush3.msra.mxu0 %v4413_v24 }
 0x6f3   :  { %v4291_v58 = vcombine.low %v4269_v34, %v4276_v36  ;;  %v4315_v3 = vrot.slane %v4308_v44, %v11376_v28  ;;  %10870 = vmatprep.subr.mxu0 %v14353_v20 }
 0x6f4   :  { %v4292_v46 = vcombine.low %v4283_v18, %v4290_v39  ;;  %10871 = vmatpush3.msra.mxu0 %v4412_v45 }
 0x6f5   :  { %v4299_v29 = vrot.slane %v4291_v58, %v11376_v28  ;;  %v4322_v1 = vrot.slane %v4315_v3, %v11376_v28  ;;  %10898 = vmatprep.subr.mxu0 %v14353_v20 }
 0x6f6   :  { %v4306_v52 = vrot.slane %v4292_v46, %v11376_v28 }
 0x6f8   :  { %v4307_v21 = vcombine.low %v4299_v29, %v4306_v52 }
 0x6fa   :  { %10859 = vmatmul.mubr.msk.f32.gmra.mxu1 %vm447_vm3, %v4307_v21 }
 0x6fb   :  { %10861 = vmatprep.mubr.msk.f32.mxu1 %vm11197_vm1, %v14353_v20 }
 0x6fe   :  { %10862 = vmatmul.mubr.msk.f32.gmra.mxu1 %vm447_vm3, %v4322_v1 }
 0x6ff   :  { %10889 = vmatprep.mubr.msk.f32.mxu1 %vm11197_vm1, %v14353_v20 }
 0x7ad   :  { %v4395_v50 = vpop.f32.mrf.mxu1 }
 0x7ae   :  { %v4396_v51 = vadd.f32 %v10367_v49, %v4395_v50 }
 0x7af   :  { %v10857_v0 = vpop.f32.mrf.mxu1 }
 0x7b0   :  { %v4409_v32 = vmax.f32 %v4396_v51, 0.0 }
 0x7b2   :  { %10873 = vmatmul.mubr.msk.f32.vlgmr.msra.gmra.mxu0 %vm447_vm3, %v4409_v32 }
 0x7b3   :  { %10875 = vmatprep.mubr.msk.f32.mxu0 %vm11197_vm1, %v14353_v20 }
 0x7ba   :  { %v4400_v12 = vpop.f32.mrf.mxu1 }
 0x7bb   :  { %v4401_v22 = vadd.f32 %v10367_v49, %v4400_v12 }
 0x7bc   :  { %v10860_v54 = vpop.f32.mrf.mxu1 }
 0x7bd   :  { %v4410_v19 = vmax.f32 %v4401_v22, 0.0 }
 0x7be   :  { %v4405_v30 = vpop.f32.mrf.mxu1 }
 0x7bf   :  { %v4406_v63 = vadd.f32 %v10367_v49, %v4405_v30  ;;  %10876 = vmatmul.mubr.msk.f32.gmra.mxu0 %vm447_vm3, %v4410_v19 }
 0x7c0   :  { %v10863_v11 = vpop.f32.mrf.mxu1  ;;  %10878 = vmatprep.mubr.msk.f32.mxu0 %vm11197_vm1, %v14353_v20 }
 0x7c1   :  { %v4411_v5 = vmax.f32 %v4406_v63, 0.0 }
 0x7c3   :  { %10879 = vmatmul.mubr.msk.f32.gmra.mxu0 %vm447_vm3, %v4411_v5 }
 0x7c4   :  { %10906 = vmatprep.mubr.msk.f32.mxu0 %vm11197_vm1, %v14353_v20 }
 0x872   :  { %v4498_v61 = vpop.f32.mrf.mxu0 }
 0x873   :  { %v4499_v53 = vadd.f32 %v10371_v16, %v4498_v61 }
 0x874   :  { %v10874_v10 = vpop.f32.mrf.mxu0 }
 0x875   :  { %v4512_v62 = vmax.f32 %v4499_v53, 0.0 }
 0x877   :  { %v4518_v25 = vcombine.high %v4512_v62, %v4512_v62  ;;  %v4525_v31 = vrot.slane %v4512_v62, %v11376_v28 }
 0x879   :  { %v4532_v9 = vrot.slane %v4518_v25, %v11376_v28  ;;  %v4533_v34 = vcombine.high %v4525_v31, %v4525_v31  ;;  %v4541_v36 = vrot.slane %v4525_v31, %v11376_v28 }
 0x87b   :  { %v4534_v18 = vcombine.high %v4532_v9, %v4532_v9  ;;  %v4548_v39 = vrot.slane %v4532_v9, %v11376_v28  ;;  %v4555_v58 = vrot.slane %v4533_v34, %v11376_v28  ;;  %v4563_v46 = vcombine.high %v4541_v36, %v4541_v36 }
 0x87c   :  { %v12607_v3 = vadd.f32 %v4541_v36, %v12448_v13 }
 0x87d   :  { %v4562_v44 = vrot.slane %v4534_v18, %v11376_v28  ;;  %v4564_v29 = vcombine.high %v4548_v39, %v4548_v39  ;;  %v4565_v52 = vcombine.high %v4555_v58, %v4555_v58  ;;  %v12604_v21 = vadd.f32 %v4555_v58, %v12451_v2 }
 0x87e   :  { %v12610_v1 = vadd.f32 %v4563_v46, %v12454_v37  ;;  %v12616_v45 = vadd.f32 %v4548_v39, %v12460_v55 }
 0x87f   :  { %v4566_v60 = vcombine.high %v4562_v44, %v4562_v44  ;;  %v12613_v24 = vadd.f32 %v4565_v52, %v12457_v4  ;;  %v12619_v49 = vadd.f32 %v4562_v44, %v12463_v40  ;;  %v4503_v50 = vpop.f32.mrf.mxu0  ;;  %v4694_v2 = vcombine.low %v12607_v3, %v12604_v21 }
 0x880   :  { %v4504_v51 = vadd.f32 %v10371_v16, %v4503_v50  ;;  %v12624_v13 = vadd.f32 %v4564_v29, %v12466_v33 }
 0x881   :  { %v10877_v37 = vpop.f32.mrf.mxu0  ;;  %v12627_v0 = vadd.f32 %v4566_v60, %v12469_v38  ;;  %v4695_v4 = vcombine.low %v12610_v1, %v12613_v24  ;;  %v4696_v55 = vcombine.low %v12616_v45, %v12619_v49  ;;  %v4704_v22 = vrot.slane %v4694_v2, %v11376_v28 }
 0x882   :  { %v4513_v40 = vmax.f32 %v4504_v51, 0.0 }
 0x883   :  { %v4508_v32 = vpop.f32.mrf.mxu0  ;;  %v4697_v12 = vcombine.low %v12624_v13, %v12627_v0  ;;  %v4711_v33 = vrot.slane %v4695_v4, %v11376_v28  ;;  %v4718_v63 = vrot.slane %v4696_v55, %v11376_v28 }
 0x884   :  { %v4567_v54 = vcombine.high %v4513_v40, %v4513_v40  ;;  %v4574_v19 = vrot.slane %v4513_v40, %v11376_v28  ;;  %v4509_v38 = vadd.f32 %v10371_v16, %v4508_v32 }
 0x885   :  { %v10880_v30 = vpop.f32.mrf.mxu0  ;;  %v4725_v11 = vrot.slane %v4697_v12, %v11376_v28  ;;  %v4726_v5 = vcombine.low %v4704_v22, %v4711_v33 }
 0x886   :  { %v4581_v61 = vrot.slane %v4567_v54, %v11376_v28  ;;  %v4582_v53 = vcombine.high %v4574_v19, %v4574_v19  ;;  %v4590_v10 = vrot.slane %v4574_v19, %v11376_v28  ;;  %v4514_v62 = vmax.f32 %v4509_v38, 0.0 }
 0x887   :  { %v4727_v25 = vcombine.low %v4718_v63, %v4725_v11  ;;  %v4734_v18 = vrot.slane %v4726_v5, %v11376_v28 }
 0x888   :  { %v4583_v31 = vcombine.high %v4581_v61, %v4581_v61  ;;  %v4597_v9 = vrot.slane %v4581_v61, %v11376_v28  ;;  %v4604_v34 = vrot.slane %v4582_v53, %v11376_v28  ;;  %v4612_v36 = vcombine.high %v4590_v10, %v4590_v10 }
 0x889   :  { %v4622_v16 = vrot.slane %v4514_v62, %v11376_v28  ;;  %v4741_v39 = vrot.slane %v4727_v25, %v11376_v28  ;;  %v12652_v52 = vadd.f32 %v4590_v10, %v12514_v56 }
 0x88a   :  { %v4611_v58 = vrot.slane %v4583_v31, %v11376_v28  ;;  %v4613_v46 = vcombine.high %v4597_v9, %v4597_v9  ;;  %v4614_v44 = vcombine.high %v4604_v34, %v4604_v34  ;;  %v12649_v29 = vadd.f32 %v4604_v34, %v12517_v48 }
 0x88b   :  { %v12655_v60 = vadd.f32 %v4612_v36, %v12521_v15  ;;  %v4623_v50 = vcombine.high %v4622_v16, %v4622_v16  ;;  %v4630_v2 = vrot.slane %v4622_v16, %v11376_v28  ;;  %v12662_v4 = vadd.f32 %v4597_v9, %v12527_v59 }
 0x88c   :  { %v4615_v51 = vcombine.high %v4611_v58, %v4611_v58  ;;  %v12659_v37 = vadd.f32 %v4614_v44, %v12524_v14  ;;  %v12665_v55 = vadd.f32 %v4611_v58, %v12530_v17  ;;  %v4743_v56 = vcombine.low %v12652_v52, %v12649_v29 }
 0x88d   :  { %v4637_v48 = vrot.slane %v4623_v50, %v11376_v28  ;;  %v4742_v15 = vcombine.low %v4734_v18, %v4741_v39  ;;  %v12671_v40 = vadd.f32 %v4613_v46, %v12535_v26  ;;  %v4672_v17 = vadd.f32 %v4630_v2, %v12550_v41 }
 0x88e   :  { %v12674_v32 = vadd.f32 %v4615_v51, %v12538_v23  ;;  %v4744_v14 = vcombine.low %v12655_v60, %v12659_v37  ;;  %v4745_v59 = vcombine.low %v12662_v4, %v12665_v55  ;;  %v4753_v33 = vrot.slane %v4743_v56, %v11376_v28 }
 0x88f   :  { %v4810_v12 = vsel %vm447_vm3, %v4742_v15, 0.0  ;;  %v4673_v22 = vadd.f32 %v4637_v48, %v12553_v6 }
 0x890   :  { %4811 = vadd.xlane.f32.xlu0 %v4810_v12  ;;  %v4746_v26 = vcombine.low %v12671_v40, %v12674_v32  ;;  %v4760_v23 = vrot.slane %v4744_v14, %v11376_v28  ;;  %v4767_v19 = vrot.slane %v4745_v59, %v11376_v28 }
 0x891   :  { %v4792_v54 = vcombine.low %v4672_v17, %v4673_v22 }
 0x892   :  { %v4774_v38 = vrot.slane %v4746_v26, %v11376_v28  ;;  %v4775_v30 = vcombine.low %v4753_v33, %v4760_v23 }
 0x893   :  { %v4799_v41 = vrot.slane %v4792_v54, %v11376_v28 }
 0x894   :  { %v4776_v63 = vcombine.low %v4767_v19, %v4774_v38  ;;  %v4783_v6 = vrot.slane %v4775_v30, %v11376_v28 }
 0x895   :  { %v4806_v11 = vrot.slane %v4799_v41, %v11376_v28 }
 0x896   :  { %v4790_v5 = vrot.slane %v4776_v63, %v11376_v28 }
 0x897   :  { %v4816_v61 = vsel %vm3621_vm6, %v4806_v11, 0.0 }
 0x898   :  { %4817 = vadd.xlane.f32.xlu0 %v4816_v61  ;;  %v4791_v53 = vcombine.low %v4783_v6, %v4790_v5 }
 0x89a   :  { %v4813_v10 = vsel %vm447_vm3, %v4791_v53, 0.0 }
 0x89b   :  { %4814 = vadd.xlane.f32.xlu1 %v4813_v10 }
 0x919   :  { %v4812_v62 = vpop.xlane.xlu0 %4811 }
 0x91a   :  { %v4819_v25 = vmul.f32 0.03125, %v4812_v62 }
 0x91c   :  { %v4828_v31 = vrot.slane %v4819_v25, %v12187_v27  ;;  %v4832_v9 = vrot.slane %v4819_v25, %v12190_v47  ;;  %v4836_v34 = vrot.slane %v4819_v25, %v12193_v7  ;;  %v4840_v36 = vrot.slane %v4819_v25, %v12196_v57 }
 0x91d   :  { %v4844_v16 = vrot.slane %v4819_v25, %v12199_v35  ;;  %v4848_v18 = vrot.slane %v4819_v25, %v12202_v43  ;;  %v4852_v39 = vrot.slane %v4819_v25, %v12205_v8  ;;  %v4856_v58 = vrot.slane %v4819_v25, %v12208_v42 }
 0x91e   :  { %v12704_v46 = vsub.f32 %v12607_v3, %v4828_v31  ;;  %v12707_v44 = vsub.f32 %v12604_v21, %v4832_v9  ;;  %v12710_v50 = vsub.f32 %v12610_v1, %v4836_v34  ;;  %v12713_v2 = vsub.f32 %v12613_v24, %v4840_v36 }
 0x91f   :  { %v12716_v51 = vsub.f32 %v12616_v45, %v4844_v16  ;;  %v12719_v56 = vsub.f32 %v12619_v49, %v4848_v18  ;;  %v12722_v48 = vsub.f32 %v12624_v13, %v4852_v39  ;;  %v12725_v3 = vsub.f32 %v12627_v0, %v4856_v58 }
 0x920   :  { %v4933_v21 = vmul.f32 %v12704_v46, %v12704_v46  ;;  %v4934_v1 = vmul.f32 %v12707_v44, %v12707_v44  ;;  %v4935_v24 = vmul.f32 %v12710_v50, %v12710_v50  ;;  %v4936_v45 = vmul.f32 %v12713_v2, %v12713_v2 }
 0x921   :  { %v4818_v49 = vpop.xlane.xlu0 %4817  ;;  %v4937_v13 = vmul.f32 %v12716_v51, %v12716_v51  ;;  %v4938_v0 = vmul.f32 %v12719_v56, %v12719_v56  ;;  %v4939_v15 = vmul.f32 %v12722_v48, %v12722_v48  ;;  %v4940_v14 = vmul.f32 %v12725_v3, %v12725_v3 }
 0x922   :  { %v4821_v59 = vmul.f32 0.03125, %v4818_v49  ;;  %v4969_v12 = vcombine.low %v4933_v21, %v4934_v1  ;;  %v4970_v26 = vcombine.low %v4935_v24, %v4936_v45 }
 0x923   :  { %v4971_v33 = vcombine.low %v4937_v13, %v4938_v0  ;;  %v4972_v23 = vcombine.low %v4939_v15, %v4940_v14 }
 0x924   :  { %v4892_v54 = vrot.slane %v4821_v59, %v12187_v27  ;;  %v4896_v19 = vrot.slane %v4821_v59, %v12190_v47  ;;  %v4815_v38 = vpop.xlane.xlu1 %4814  ;;  %v4979_v30 = vrot.slane %v4969_v12, %v11376_v28  ;;  %v4986_v41 = vrot.slane %v4970_v26, %v11376_v28 }
 0x925   :  { %v4820_v63 = vmul.f32 0.03125, %v4815_v38  ;;  %v4993_v11 = vrot.slane %v4971_v33, %v11376_v28  ;;  %v5000_v6 = vrot.slane %v4972_v23, %v11376_v28 }
 0x926   :  { %v12749_v5 = vsub.f32 %v4672_v17, %v4892_v54  ;;  %v12751_v61 = vsub.f32 %v4673_v22, %v4896_v19  ;;  %v5001_v53 = vcombine.low %v4979_v30, %v4986_v41 }
 0x927   :  { %v5002_v10 = vcombine.low %v4993_v11, %v5000_v6  ;;  %v4860_v62 = vrot.slane %v4820_v63, %v12187_v27  ;;  %v4864_v25 = vrot.slane %v4820_v63, %v12190_v47  ;;  %v4868_v31 = vrot.slane %v4820_v63, %v12193_v7 }
 0x928   :  { %v4949_v9 = vmul.f32 %v12749_v5, %v12749_v5  ;;  %v4950_v34 = vmul.f32 %v12751_v61, %v12751_v61  ;;  %v5009_v36 = vrot.slane %v5001_v53, %v11376_v28  ;;  %v4872_v17 = vrot.slane %v4820_v63, %v12196_v57 }
 0x929   :  { %v5016_v22 = vrot.slane %v5002_v10, %v11376_v28  ;;  %v4876_v16 = vrot.slane %v4820_v63, %v12199_v35  ;;  %v4880_v18 = vrot.slane %v4820_v63, %v12202_v43  ;;  %v4884_v39 = vrot.slane %v4820_v63, %v12205_v8 }
 0x92a   :  { %v5067_v58 = vcombine.low %v4949_v9, %v4950_v34  ;;  %v4888_v21 = vrot.slane %v4820_v63, %v12208_v42  ;;  %v12768_v1 = vsub.f32 %v12652_v52, %v4860_v62  ;;  %v12771_v24 = vsub.f32 %v12649_v29, %v4864_v25  ;;  %v10389_v34 = vld [vmem:[%s14300_s7 + $0x58] sm:$0xff] }
 0x92b   :  { %v5017_v45 = vcombine.low %v5009_v36, %v5016_v22  ;;  %v12774_v49 = vsub.f32 %v12655_v60, %v4868_v31  ;;  %v12777_v13 = vsub.f32 %v12659_v37, %v4872_v17  ;;  %v12780_v0 = vsub.f32 %v12662_v4, %v4876_v16  ;;  %v10380_v36 = vld [vmem:[%s14348_s23 + $0x58] sm:$0xff]  ;;  %v10379_v17 = vld [vmem:[%s14348_s23 + $0x50] sm:$0xff]  ;;  %10899 = vmatpush3.msra.mxu0 %v10389_v34  ;;  %v10378_v16 = vld [vmem:[%s14348_s23 + $0x48] sm:$0xff] }
 0x92c   :  { %v5074_v15 = vrot.slane %v5067_v58, %v11376_v28  ;;  %v12784_v14 = vsub.f32 %v12665_v55, %v4880_v18  ;;  %v12787_v52 = vsub.f32 %v12671_v40, %v4884_v39  ;;  %v12790_v29 = vsub.f32 %v12674_v32, %v4888_v21  ;;  %10882 = vmatpush3.msra.mxu1 %v10380_v36  ;;  %v10388_v22 = vld [vmem:[%s14300_s7 + $0x50] sm:$0xff]  ;;  %v10387_v18 = vld [vmem:[%s14300_s7 + $0x48] sm:$0xff]  ;;  %v10377_v39 = vld [vmem:[%s14348_s23 + $0x40] sm:$0xff] }
 0x92d   :  { %v5085_v60 = vsel %vm447_vm3, %v5017_v45, 0.0  ;;  %v4941_v37 = vmul.f32 %v12768_v1, %v12768_v1  ;;  %v4942_v4 = vmul.f32 %v12771_v24, %v12771_v24  ;;  %v4943_v59 = vmul.f32 %v12774_v49, %v12774_v49  ;;  %10883 = vmatprep.subr.mxu1 %v14353_v20  ;;  %10900 = vmatprep.subr.mxu0 %v14353_v20  ;;  %v10386_v58 = vld [vmem:[%s14300_s7 + $0x40] sm:$0xff] }
 0x92e   :  { %5086 = vadd.xlane.f32.xlu1 %v5085_v60  ;;  %v5081_v55 = vrot.slane %v5074_v15, %v11376_v28  ;;  %v4944_v40 = vmul.f32 %v12777_v13, %v12777_v13  ;;  %v4945_v32 = vmul.f32 %v12780_v0, %v12780_v0  ;;  %v4946_v12 = vmul.f32 %v12784_v14, %v12784_v14  ;;  %v10375_v21 = vld [vmem:[%s14310_s17] ss:$0 sm:$0xff] }
 0x92f   :  { %v4947_v26 = vmul.f32 %v12787_v52, %v12787_v52  ;;  %v4948_v33 = vmul.f32 %v12790_v29, %v12790_v29  ;;  %v5018_v23 = vcombine.low %v4941_v37, %v4942_v4  ;;  %10884 = vmatpush3.msra.mxu1 %v10379_v17  ;;  %10901 = vmatpush3.msra.mxu0 %v10388_v22  ;;  %v10376_v45 = vld [vmem:[%s14311_s18] ss:$0 sm:$0xff] }
 0x930   :  { %v5019_v54 = vcombine.low %v4943_v59, %v4944_v40  ;;  %v5020_v19 = vcombine.low %v4945_v32, %v4946_v12  ;;  %v5091_v38 = vsel %vm3621_vm6, %v5081_v55, 0.0  ;;  %10885 = vmatprep.subr.mxu1 %v14353_v20  ;;  %10902 = vmatprep.subr.mxu0 %v14353_v20  ;;  %v5219_v37 = vcombine.high %v10375_v21, %v10375_v21 }
 0x931   :  { %v5021_v30 = vcombine.low %v4947_v26, %v4948_v33  ;;  %v5028_v41 = vrot.slane %v5018_v23, %v11376_v28  ;;  %10886 = vmatpush3.msra.mxu1 %v10378_v16  ;;  %10903 = vmatpush3.msra.mxu0 %v10387_v18  ;;  %v5299_v4 = vcombine.high %v10376_v45, %v10376_v45 }
 0x932   :  { %5092 = vadd.xlane.f32.xlu1 %v5091_v38  ;;  %v5035_v63 = vrot.slane %v5019_v54, %v11376_v28  ;;  %v5042_v11 = vrot.slane %v5020_v19, %v11376_v28  ;;  %10887 = vmatprep.subr.mxu1 %v14353_v20  ;;  %v5226_v40 = vrot.slane %v10375_v21, %v11376_v28 }
 0x933   :  { %v5049_v6 = vrot.slane %v5021_v30, %v11376_v28  ;;  %10904 = vmatprep.subr.mxu0 %v14353_v20  ;;  %10888 = vmatpush3.msra.mxu1 %v10377_v39  ;;  %v5306_v32 = vrot.slane %v10376_v45, %v11376_v28  ;;  %v5233_v26 = vrot.slane %v5219_v37, %v11376_v28 }
 0x934   :  { %v5050_v53 = vcombine.low %v5028_v41, %v5035_v63  ;;  %10905 = vmatpush3.msra.mxu0 %v10386_v58  ;;  %10915 = vmatprep.subr.mxu1 %v14353_v20  ;;  %v5313_v33 = vrot.slane %v5299_v4, %v11376_v28  ;;  %v5234_v54 = vcombine.high %v5226_v40, %v5226_v40 }
 0x935   :  { %v5051_v10 = vcombine.low %v5042_v11, %v5049_v6  ;;  %v5314_v19 = vcombine.high %v5306_v32, %v5306_v32  ;;  %v5235_v38 = vcombine.high %v5233_v26, %v5233_v26  ;;  %v12860_v41 = vrot.slane %v5226_v40, %v11376_v28 }
 0x936   :  { %v5058_v62 = vrot.slane %v5050_v53, %v11376_v28  ;;  %v5315_v30 = vcombine.high %v5313_v33, %v5313_v33  ;;  %v12863_v63 = vrot.slane %v5234_v54, %v11376_v28  ;;  %v12866_v11 = vrot.slane %v5306_v32, %v11376_v28 }
 0x937   :  { %v5065_v25 = vrot.slane %v5051_v10, %v11376_v28  ;;  %v12869_v6 = vrot.slane %v5314_v19, %v11376_v28  ;;  %v12872_v10 = vrot.slane %v5233_v26, %v11376_v28  ;;  %v12885_v34 = vcombine.high %v12860_v41, %v12860_v41 }
 0x938   :  { %v12889_v17 = vcombine.high %v12863_v63, %v12863_v63  ;;  %v12893_v22 = vcombine.high %v12866_v11, %v12866_v11 }
 0x939   :  { %v5066_v31 = vcombine.low %v5058_v62, %v5065_v25  ;;  %v12875_v62 = vrot.slane %v5235_v38, %v11376_v28  ;;  %v12878_v25 = vrot.slane %v5313_v33, %v11376_v28  ;;  %v12897_v16 = vcombine.high %v12869_v6, %v12869_v6 }
 0x93a   :  { %v12901_v39 = vcombine.high %v12872_v10, %v12872_v10 }
 0x93b   :  { %v5088_v9 = vsel %vm447_vm3, %v5066_v31, 0.0  ;;  %v12881_v31 = vrot.slane %v5315_v30, %v11376_v28  ;;  %v12905_v58 = vcombine.high %v12875_v62, %v12875_v62  ;;  %v12909_v21 = vcombine.high %v12878_v25, %v12878_v25 }
 0x93c   :  { %5089 = vadd.xlane.f32.xlu0 %v5088_v9 }
 0x93d   :  { %v12913_v45 = vcombine.high %v12881_v31, %v12881_v31 }
 0x9b7   :  { %v5087_v15 = vpop.xlane.xlu1 %5086 }
 0x9b8   :  { %v5094_v60 = vmul.f32 0.03125, %v5087_v15 }
 0x9ba   :  { %v5097_v59 = vadd.f32 1e-05, %v5094_v60 }
 0x9bb   :  { %v5093_v55 = vpop.xlane.xlu1 %5092 }
 0x9bc   :  { %11126 = vrsqrt.f32 %v5097_v59  ;;  %v5096_v12 = vmul.f32 0.03125, %v5093_v55 }
 0x9be   :  { %v5099_v23 = vadd.f32 1e-05, %v5096_v12 }
 0x9c0   :  { %11128 = vrsqrt.f32 %v5099_v23 }
 0x9c5   :  { %v5090_v53 = vpop.xlane.xlu0 %5089 }
 0x9c6   :  { %v5095_v9 = vmul.f32 0.03125, %v5090_v53 }
 0x9c8   :  { %v5098_v36 = vadd.f32 1e-05, %v5095_v9 }
 0x9c9   :  { %v11127_v18 = vpop.eup %11126 }
 0x9ca   :  { %11130 = vrsqrt.f32 %v5098_v36  ;;  %v5109_v15 = vrot.slane %v11127_v18, %v12187_v27  ;;  %v5113_v60 = vrot.slane %v11127_v18, %v12190_v47  ;;  %v5117_v37 = vrot.slane %v11127_v18, %v12193_v7 }
 0x9cb   :  { %v5121_v4 = vrot.slane %v11127_v18, %v12196_v57  ;;  %v5125_v59 = vrot.slane %v11127_v18, %v12199_v35  ;;  %v5129_v55 = vrot.slane %v11127_v18, %v12202_v43  ;;  %v5133_v40 = vrot.slane %v11127_v18, %v12205_v8 }
 0x9cc   :  { %v5137_v32 = vrot.slane %v11127_v18, %v12208_v42  ;;  %v5196_v12 = vmul.f32 %v5109_v15, %v12704_v46  ;;  %v5197_v26 = vmul.f32 %v5113_v60, %v12707_v44  ;;  %v5198_v33 = vmul.f32 %v5117_v37, %v12710_v50 }
 0x9cd   :  { %v11129_v23 = vpop.eup %11128  ;;  %v5199_v54 = vmul.f32 %v5121_v4, %v12713_v2  ;;  %v5200_v19 = vmul.f32 %v5125_v59, %v12716_v51  ;;  %v5201_v38 = vmul.f32 %v5129_v55, %v12719_v56  ;;  %v5202_v30 = vmul.f32 %v5133_v40, %v12722_v48 }
 0x9ce   :  { %v5173_v53 = vrot.slane %v11129_v23, %v12187_v27  ;;  %v5177_v9 = vrot.slane %v11129_v23, %v12190_v47  ;;  %v5203_v36 = vmul.f32 %v5137_v32, %v12725_v3  ;;  %v5276_v46 = vmul.f32 %v12860_v41, %v5196_v12 }
 0x9cf   :  { %v5277_v44 = vmul.f32 %v12863_v63, %v5197_v26  ;;  %v5278_v50 = vmul.f32 %v12885_v34, %v5198_v33  ;;  %v5279_v2 = vmul.f32 %v12889_v17, %v5199_v54  ;;  %v5280_v51 = vmul.f32 %v12872_v10, %v5200_v19 }
 0x9d0   :  { %v5281_v56 = vmul.f32 %v12875_v62, %v5201_v38  ;;  %v5282_v48 = vmul.f32 %v12901_v39, %v5202_v30  ;;  %v5283_v18 = vmul.f32 %v12905_v58, %v5203_v36  ;;  %v12942_v15 = vadd.f32 %v12866_v11, %v5276_v46 }
 0x9d1   :  { %v12945_v3 = vadd.f32 %v12869_v6, %v5277_v44  ;;  %v12948_v60 = vadd.f32 %v12893_v22, %v5278_v50  ;;  %v5212_v37 = vmul.f32 %v5173_v53, %v12749_v5  ;;  %v5213_v4 = vmul.f32 %v5177_v9, %v12751_v61 }
 0x9d2   :  { %v12953_v59 = vadd.f32 %v12897_v16, %v5279_v2  ;;  %v12956_v55 = vadd.f32 %v12878_v25, %v5280_v51  ;;  %v12959_v40 = vadd.f32 %v12881_v31, %v5281_v56  ;;  %v12962_v32 = vadd.f32 %v12909_v21, %v5282_v48 }
 0x9d3   :  { %v12965_v12 = vadd.f32 %v12913_v45, %v5283_v18  ;;  %v5405_v5 = vcombine.low %v12942_v15, %v12945_v3  ;;  %v5292_v38 = vmul.f32 %v12860_v41, %v5212_v37  ;;  %v5293_v30 = vmul.f32 %v12863_v63, %v5213_v4 }
 0x9d4   :  { %v5406_v61 = vcombine.low %v12948_v60, %v12953_v59  ;;  %v5407_v26 = vcombine.low %v12956_v55, %v12959_v40 }
 0x9d5   :  { %v5408_v33 = vcombine.low %v12962_v32, %v12965_v12  ;;  %v5415_v23 = vrot.slane %v5405_v5, %v11376_v28 }
 0x9d6   :  { %v5422_v54 = vrot.slane %v5406_v61, %v11376_v28  ;;  %v5429_v53 = vrot.slane %v5407_v26, %v11376_v28 }
 0x9d7   :  { %v11131_v19 = vpop.eup %11130  ;;  %v5436_v9 = vrot.slane %v5408_v33, %v11376_v28 }
 0x9d8   :  { %v5437_v36 = vcombine.low %v5415_v23, %v5422_v54  ;;  %v5141_v46 = vrot.slane %v11131_v19, %v12187_v27  ;;  %v5145_v44 = vrot.slane %v11131_v19, %v12190_v47  ;;  %v5149_v50 = vrot.slane %v11131_v19, %v12193_v7 }
 0x9d9   :  { %v5438_v2 = vcombine.low %v5429_v53, %v5436_v9  ;;  %v5153_v51 = vrot.slane %v11131_v19, %v12196_v57  ;;  %v5157_v56 = vrot.slane %v11131_v19, %v12199_v35  ;;  %v5161_v48 = vrot.slane %v11131_v19, %v12202_v43 }
 0x9da   :  { %v5445_v18 = vrot.slane %v5437_v36, %v11376_v28  ;;  %v5165_v37 = vrot.slane %v11131_v19, %v12205_v8  ;;  %v5169_v4 = vrot.slane %v11131_v19, %v12208_v42  ;;  %v5204_v5 = vmul.f32 %v5141_v46, %v12768_v1 }
 0x9db   :  { %v5452_v61 = vrot.slane %v5438_v2, %v11376_v28  ;;  %v5205_v26 = vmul.f32 %v5145_v44, %v12771_v24  ;;  %v5206_v33 = vmul.f32 %v5149_v50, %v12774_v49  ;;  %v5207_v23 = vmul.f32 %v5153_v51, %v12777_v13  ;;  %v10395_v50 = vld [vmem:[%s14302_s9 + $0x40] sm:$0xff] }
 0x9dc   :  { %v5208_v54 = vmul.f32 %v5157_v56, %v12780_v0  ;;  %v5209_v53 = vmul.f32 %v5161_v48, %v12784_v14  ;;  %v5210_v9 = vmul.f32 %v5165_v37, %v12787_v52  ;;  %v5211_v36 = vmul.f32 %v5169_v4, %v12790_v29  ;;  %v10398_v52 = vld [vmem:[%s14302_s9 + $0x58] sm:$0xff] }
 0x9dd   :  { %v12999_v8 = vcombine.low %v5445_v18, %v5452_v61  ;;  %v5284_v1 = vmul.f32 %v12860_v41, %v5204_v5  ;;  %v5285_v19 = vmul.f32 %v12863_v63, %v5205_v26  ;;  %v5286_v24 = vmul.f32 %v12885_v34, %v5206_v33  ;;  %v10417_v61 = vld [vmem:[%s14348_s23 + $0x78] sm:$0xff]  ;;  %v10416_v26 = vld [vmem:[%s14348_s23 + $0x70] sm:$0xff]  ;;  %v10415_v33 = vld [vmem:[%s14348_s23 + $0x68] sm:$0xff] }
 0x9de   :  { %v5287_v49 = vmul.f32 %v12889_v17, %v5207_v23  ;;  %v5288_v13 = vmul.f32 %v12872_v10, %v5208_v54  ;;  %v5289_v0 = vmul.f32 %v12875_v62, %v5209_v53  ;;  %v5290_v14 = vmul.f32 %v12901_v39, %v5210_v9  ;;  %v10397_v17 = vld [vmem:[%s14302_s9 + $0x50] sm:$0xff]  ;;  %v10414_v23 = vld [vmem:[%s14348_s23 + $0x60] sm:$0xff]  ;;  %v10435_v54 = vld [vmem:[%s14302_s9 + $0x78] sm:$0xff] }
 0x9df   :  { %10890 = vmatmul.mubr.msk.f32.vlgmr.msra.gmra.mxu1 %vm447_vm3, %v12999_v8  ;;  %10907 = vmatmul.mubr.msk.f32.vlgmr.msra.gmra.mxu0 %vm447_vm3, %v12999_v8  ;;  %v5291_v29 = vmul.f32 %v12905_v58, %v5211_v36  ;;  %v13017_v41 = vadd.f32 %v12866_v11, %v5284_v1  ;;  %v13020_v63 = vadd.f32 %v12869_v6, %v5285_v19  ;;  %v10434_v53 = vld [vmem:[%s14302_s9 + $0x70] sm:$0xff]  ;;  %v10433_v9 = vld [vmem:[%s14302_s9 + $0x68] sm:$0xff]  ;;  %v10432_v36 = vld [vmem:[%s14302_s9 + $0x60] sm:$0xff] }
 0x9e0   :  { %10892 = vmatprep.mubr.msk.f32.mxu1 %vm11197_vm1, %v14353_v20  ;;  %10909 = vmatprep.mubr.msk.f32.mxu0 %vm11197_vm1, %v14353_v20  ;;  %v13027_v10 = vadd.f32 %v12893_v22, %v5286_v24  ;;  %v13030_v62 = vadd.f32 %v12897_v16, %v5287_v49  ;;  %v13033_v34 = vadd.f32 %v12878_v25, %v5288_v13  ;;  %v13167_v1 = vld [vmem:[%s14299_s6 + $0x2] ss:$0 sm:$0xff] }
 0x9e1   :  { %v13039_v39 = vadd.f32 %v12881_v31, %v5289_v0  ;;  %v13042_v58 = vadd.f32 %v12909_v21, %v5290_v14  ;;  %v13045_v46 = vadd.f32 %v12913_v45, %v5291_v29  ;;  %v5454_v22 = vcombine.low %v13017_v41, %v13020_v63  ;;  %10916 = vmatpush3.msra.mxu1 %v10398_v52  ;;  %v10396_v31 = vld [vmem:[%s14302_s9 + $0x48] sm:$0xff]  ;;  %v13172_v19 = vld [vmem:[%s14301_s8 + $0x2] ss:$0 sm:$0xff] }
 0x9e2   :  { %v13050_v25 = vadd.f32 %v12866_v11, %v5292_v38  ;;  %v5455_v16 = vcombine.low %v13027_v10, %v13030_v62  ;;  %10917 = vmatprep.subr.mxu1 %v14353_v20  ;;  %v13059_v21 = vadd.f32 %v12869_v6, %v5293_v30 }
 0x9e3   :  { %v5456_v45 = vcombine.low %v13033_v34, %v13039_v39  ;;  %v5457_v44 = vcombine.low %v13042_v58, %v13045_v46  ;;  %v5464_v11 = vrot.slane %v5454_v22, %v11376_v28  ;;  %10918 = vmatpush3.msra.mxu1 %v10397_v17 }
 0x9e4   :  { %14362 = vst [vmem:[#allocation13_spill] sm:$0xff] %v13059_v21  ;;  %v5471_v38 = vrot.slane %v5455_v16, %v11376_v28  ;;  %10919 = vmatprep.subr.mxu1 %v14353_v20  ;;  %v5503_v56 = vcombine.low %v13050_v25, %v13059_v21 }
 0x9e5   :  { %v5478_v6 = vrot.slane %v5456_v45, %v11376_v28  ;;  %v5485_v30 = vrot.slane %v5457_v44, %v11376_v28  ;;  %10920 = vmatpush3.msra.mxu1 %v10396_v31 }
 0x9e6   :  { %v5486_v2 = vcombine.low %v5464_v11, %v5471_v38  ;;  %10921 = vmatprep.subr.mxu1 %v14353_v20  ;;  %v5510_v4 = vrot.slane %v5503_v56, %v11376_v28 }
 0x9e7   :  { %v5487_v51 = vcombine.low %v5478_v6, %v5485_v30  ;;  %10922 = vmatpush3.msra.mxu1 %v10395_v50 }
 0x9e8   :  { %v5494_v48 = vrot.slane %v5486_v2, %v11376_v28  ;;  %10946 = vmatprep.subr.mxu1 %v14353_v20  ;;  %v13091_v5 = vrot.slane %v5510_v4, %v11376_v28 }
 0x9e9   :  { %v5501_v18 = vrot.slane %v5487_v51, %v11376_v28 }
 0x9eb   :  { %v13079_v37 = vcombine.low %v5494_v48, %v5501_v18 }
 0x9ed   :  { %10893 = vmatmul.mubr.msk.f32.gmra.mxu1 %vm447_vm3, %v13079_v37  ;;  %10910 = vmatmul.mubr.msk.f32.gmra.mxu0 %vm447_vm3, %v13079_v37 }
 0x9ee   :  { %10895 = vmatprep.mubr.msk.f32.mxu1 %vm11197_vm1, %v14353_v20  ;;  %10912 = vmatprep.mubr.msk.f32.mxu0 %vm11197_vm1, %v14353_v20 }
 0x9f1   :  { %10896 = vmatmul.mubr.msk.f32.gmra.mxu1 %vm447_vm3, %v13091_v5  ;;  %10913 = vmatmul.mubr.msk.f32.gmra.mxu0 %vm447_vm3, %v13091_v5 }
 0x9f2   :  { %10923 = vmatprep.mubr.msk.f32.mxu1 %vm11197_vm1, %v14353_v20 }
 0x9f5   :  { %10924 = vmatmul.mubr.msk.f32.vlgmr.msra.gmra.mxu1 %vm447_vm3, %v12999_v8 }
 0x9f6   :  { %10926 = vmatprep.mubr.msk.f32.mxu1 %vm11197_vm1, %v14353_v20  ;;  %10947 = vmatpush3.msra.mxu1 %v10417_v61 }
 0x9f7   :  { %10948 = vmatprep.subr.mxu1 %v14353_v20 }
 0x9f8   :  { %10949 = vmatpush3.msra.mxu1 %v10416_v26 }
 0x9f9   :  { %10927 = vmatmul.mubr.msk.f32.gmra.mxu1 %vm447_vm3, %v13079_v37  ;;  %10950 = vmatprep.subr.mxu1 %v14353_v20 }
 0x9fa   :  { %10929 = vmatprep.mubr.msk.f32.mxu1 %vm11197_vm1, %v14353_v20  ;;  %10951 = vmatpush3.msra.mxu1 %v10415_v33 }
 0x9fb   :  { %10952 = vmatprep.subr.mxu1 %v14353_v20 }
 0x9fc   :  { %10953 = vmatpush3.msra.mxu1 %v10414_v23 }
 0x9fd   :  { %10930 = vmatmul.mubr.msk.f32.gmra.mxu1 %vm447_vm3, %v13091_v5  ;;  %10980 = vmatprep.subr.mxu1 %v14353_v20 }
 0x9fe   :  { %10954 = vmatprep.mubr.msk.f32.mxu1 %vm11197_vm1, %v14353_v20 }
 0xa01   :  { %10955 = vmatmul.mubr.msk.f32.vlgmr.msra.gmra.mxu1 %vm447_vm3, %v12999_v8 }
 0xa02   :  { %10957 = vmatprep.mubr.msk.f32.mxu1 %vm11197_vm1, %v14353_v20  ;;  %10981 = vmatpush3.msra.mxu1 %v10435_v54 }
 0xa03   :  { %10982 = vmatprep.subr.mxu1 %v14353_v20 }
 0xa04   :  { %10983 = vmatpush3.msra.mxu1 %v10434_v53 }
 0xa05   :  { %10958 = vmatmul.mubr.msk.f32.gmra.mxu1 %vm447_vm3, %v13079_v37  ;;  %10984 = vmatprep.subr.mxu1 %v14353_v20 }
 0xa06   :  { %10960 = vmatprep.mubr.msk.f32.mxu1 %vm11197_vm1, %v14353_v20  ;;  %10985 = vmatpush3.msra.mxu1 %v10433_v9 }
 0xa07   :  { %10986 = vmatprep.subr.mxu1 %v14353_v20 }
 0xa08   :  { %10987 = vmatpush3.msra.mxu1 %v10432_v36 }
 0xa09   :  { %10961 = vmatmul.mubr.msk.f32.gmra.mxu1 %vm447_vm3, %v13091_v5 }
 0xa0a   :  { %10988 = vmatprep.mubr.msk.f32.mxu1 %vm11197_vm1, %v14353_v20 }
 0xa0d   :  { %10989 = vmatmul.mubr.msk.f32.vlgmr.msra.gmra.mxu1 %vm447_vm3, %v12999_v8 }
 0xa0e   :  { %10991 = vmatprep.mubr.msk.f32.mxu1 %vm11197_vm1, %v14353_v20 }
 0xa11   :  { %10992 = vmatmul.mubr.msk.f32.gmra.mxu1 %vm447_vm3, %v13079_v37 }
 0xa12   :  { %10994 = vmatprep.mubr.msk.f32.mxu1 %vm11197_vm1, %v14353_v20 }
 0xa15   :  { %10995 = vmatmul.mubr.msk.f32.gmra.mxu1 %vm447_vm3, %v13091_v5 }
 0xa9f   :  { %v5590_v24 = vpop.f32.mrf.mxu1  ;;  %v5806_v49 = vpop.f32.mrf.mxu0 }
 0xaa0   :  { %v5591_v13 = vadd.f32 %v13167_v1, %v5590_v24  ;;  %v5807_v0 = vadd.f32 %v13172_v19, %v5806_v49 }
 0xaa1   :  { %v10891_v14 = vpop.f32.mrf.mxu1  ;;  %v10908_v52 = vpop.f32.mrf.mxu0 }
 0xaa2   :  { %v5607_v29 = vcombine.high %v5591_v13, %v5591_v13  ;;  %v5614_v17 = vrot.slane %v5591_v13, %v11376_v28  ;;  %v5823_v22 = vcombine.high %v5807_v0, %v5807_v0  ;;  %v5830_v16 = vrot.slane %v5807_v0, %v11376_v28 }
 0xaa4   :  { %v5621_v31 = vrot.slane %v5607_v29, %v11376_v28  ;;  %v5622_v45 = vcombine.high %v5614_v17, %v5614_v17  ;;  %v5837_v44 = vrot.slane %v5823_v22, %v11376_v28  ;;  %v5838_v11 = vcombine.high %v5830_v16, %v5830_v16 }
 0xaa5   :  { %v5630_v30 = vrot.slane %v5614_v17, %v11376_v28  ;;  %v5846_v33 = vrot.slane %v5830_v16, %v11376_v28 }
 0xaa6   :  { %v5623_v38 = vcombine.high %v5621_v31, %v5621_v31  ;;  %v5644_v50 = vrot.slane %v5622_v45, %v11376_v28  ;;  %v5839_v6 = vcombine.high %v5837_v44, %v5837_v44  ;;  %v5860_v2 = vrot.slane %v5838_v11, %v11376_v28 }
 0xaa7   :  { %v5637_v61 = vrot.slane %v5621_v31, %v11376_v28  ;;  %v5853_v13 = vrot.slane %v5837_v44, %v11376_v28 }
 0xaa8   :  { %v5651_v48 = vrot.slane %v5623_v38, %v11376_v28  ;;  %v6151_v26 = vcombine.low %v5630_v30, %v5644_v50  ;;  %v5867_v23 = vrot.slane %v5839_v6, %v11376_v28  ;;  %v10402_v9 = vcombine.high %v5630_v30, %v5644_v50 }
 0xaa9   :  { %v6214_v0 = vcombine.low %v5846_v33, %v5860_v2  ;;  %v10404_v14 = vcombine.high %v5846_v33, %v5860_v2 }
 0xaaa   :  { %v6153_v22 = vcombine.low %v5637_v61, %v5651_v48  ;;  %v10403_v31 = vcombine.high %v5637_v61, %v5651_v48  ;;  %v6216_v11 = vcombine.low %v5853_v13, %v5867_v23  ;;  %v10405_v38 = vcombine.high %v5853_v13, %v5867_v23 }
 0xaab   :  { %v6161_v30 = vrot.slane %v6151_v26, %v11376_v28  ;;  %v6168_v44 = vrot.slane %v10402_v9, %v11376_v28  ;;  %v6224_v2 = vrot.slane %v6214_v0, %v11376_v28  ;;  %v6231_v23 = vrot.slane %v10404_v14, %v11376_v28 }
 0xaac   :  { %v6175_v61 = vrot.slane %v6153_v22, %v11376_v28  ;;  %v6182_v33 = vrot.slane %v10403_v31, %v11376_v28  ;;  %v6238_v26 = vrot.slane %v6216_v11, %v11376_v28 }
 0xaad   :  { %v5595_v51 = vpop.f32.mrf.mxu1  ;;  %v5811_v56 = vpop.f32.mrf.mxu0 }
 0xaae   :  { %v5596_v18 = vadd.f32 %v13167_v1, %v5595_v51  ;;  %v5812_v4 = vadd.f32 %v13172_v19, %v5811_v56 }
 0xaaf   :  { %v10894_v54 = vpop.f32.mrf.mxu1  ;;  %v10911_v53 = vpop.f32.mrf.mxu0 }
 0xab0   :  { %v5656_v36 = vcombine.high %v5596_v18, %v5596_v18  ;;  %v5663_v24 = vrot.slane %v5596_v18, %v11376_v28  ;;  %v5872_v49 = vcombine.high %v5812_v4, %v5812_v4  ;;  %v5879_v52 = vrot.slane %v5812_v4, %v11376_v28 }
 0xab1   :  { %v5600_v29 = vpop.f32.mrf.mxu1  ;;  %v5816_v17 = vpop.f32.mrf.mxu0  ;;  %v6245_v53 = vrot.slane %v10405_v38, %v11376_v28  ;;  %v6246_v38 = vcombine.low %v6224_v2, %v6231_v23 }
 0xab2   :  { %v5670_v16 = vrot.slane %v5656_v36, %v11376_v28  ;;  %v5886_v45 = vrot.slane %v5872_v49, %v11376_v28  ;;  %v5671_v51 = vcombine.high %v5663_v24, %v5663_v24  ;;  %v5887_v56 = vcombine.high %v5879_v52, %v5879_v52 }
 0xab3   :  { %v10897_v50 = vpop.f32.mrf.mxu1  ;;  %v10914_v6 = vpop.f32.mrf.mxu0  ;;  %v5895_v4 = vrot.slane %v5879_v52, %v11376_v28  ;;  %v5817_v36 = vadd.f32 %v13172_v19, %v5816_v17  ;;  %v5601_v22 = vadd.f32 %v13167_v1, %v5600_v29 }
 0xab4   :  { %v5888_v18 = vcombine.high %v5886_v45, %v5886_v45  ;;  %v5672_v54 = vcombine.high %v5670_v16, %v5670_v16  ;;  %v5686_v13 = vrot.slane %v5670_v16, %v11376_v28  ;;  %v5693_v0 = vrot.slane %v5671_v51, %v11376_v28 }
 0xab5   :  { %v13198_v48 = vpop.f32.mrf.mxu1  ;;  %v5902_v52 = vrot.slane %v5886_v45, %v11376_v28  ;;  %v5909_v14 = vrot.slane %v5887_v56, %v11376_v28  ;;  %v6269_v31 = vrot.slane %v5895_v4, %v11376_v28  ;;  %v6183_v50 = vcombine.low %v6161_v30, %v6168_v44 }
 0xab6   :  { %v5916_v9 = vrot.slane %v5888_v18, %v11376_v28  ;;  %v5679_v6 = vrot.slane %v5663_v24, %v11376_v28  ;;  %v5700_v19 = vrot.slane %v5672_v54, %v11376_v28  ;;  %v5927_v16 = vrot.slane %v5817_v36, %v11376_v28 }
 0xab7   :  { %v10925_v49 = vpop.f32.mrf.mxu1  ;;  %v6247_v51 = vcombine.low %v6238_v26, %v6245_v53  ;;  %v5702_v45 = vcombine.high %v5686_v13, %v5686_v13  ;;  %v5703_v42 = vcombine.high %v5693_v0, %v5693_v0  ;;  %v5918_v1 = vcombine.high %v5902_v52, %v5902_v52 }
 0xab8   :  { %v5920_v17 = vcombine.high %v5916_v9, %v5916_v9  ;;  %v6184_v49 = vcombine.low %v6175_v61, %v6182_v33  ;;  %v13217_v29 = vrot.slane %v5601_v22, %v11376_v28  ;;  %v5919_v56 = vcombine.high %v5909_v14, %v5909_v14 }
 0xab9   :  { %v6019_v11 = vpop.f32.mrf.mxu1  ;;  %v5928_v43 = vcombine.high %v5927_v16, %v5927_v16  ;;  %v5935_v30 = vrot.slane %v5927_v16, %v11376_v28  ;;  %v6276_v24 = vrot.slane %v6269_v31, %v11376_v28  ;;  %v5701_v2 = vcombine.high %v5679_v6, %v5679_v6 }
 0xaba   :  { %v5704_v23 = vcombine.high %v5700_v19, %v5700_v19  ;;  %v6080_v54 = vcombine.high %v6019_v11, %v6019_v11  ;;  %v6191_v36 = vrot.slane %v6183_v50, %v11376_v28  ;;  %v6206_v61 = vrot.slane %v5679_v6, %v11376_v28 }
 0xabb   :  { %v10928_v18 = vpop.f32.mrf.mxu1  ;;  %v5917_v33 = vcombine.high %v5895_v4, %v5895_v4  ;;  %v6426_v26 = vcombine.low %v5920_v17, %v5935_v30  ;;  %10932 = vmatprep.subr.msk.mxu0 %vm80_vm0, %v6276_v24  ;;  %v6254_v53 = vrot.slane %v6246_v38, %v11376_v28  ;;  %v6362_v35 = vcombine.low %v5700_v19, %v5702_v45 }
 0xabc   :  { %v6361_v18 = vcombine.low %v5703_v42, %v5686_v13  ;;  %v5719_v31 = vrot.slane %v13217_v29, %v11376_v28  ;;  %10933 = vmatpush3.xpose.msk.msra.mxu0 %vm80_vm0, %v6276_v24  ;;  %v6261_v16 = vrot.slane %v6247_v51, %v11376_v28  ;;  %v6424_v57 = vcombine.low %v5919_v56, %v5902_v52 }
 0xabd   :  { %v6024_v44 = vpop.f32.mrf.mxu1  ;;  %v6425_v50 = vcombine.low %v5916_v9, %v5918_v1  ;;  %v5942_v6 = vrot.slane %v5928_v43, %v11376_v28  ;;  %v6087_v4 = vrot.slane %v6019_v11, %v11376_v28  ;;  %v6360_v30 = vcombine.low %v5693_v0, %v5701_v2 }
 0xabe   :  { %v6363_v7 = vcombine.low %v5704_v23, %v5719_v31  ;;  %v6094_v38 = vrot.slane %v6080_v54, %v11376_v28  ;;  %v6198_v42 = vrot.slane %v6184_v49, %v11376_v28  ;;  %v6213_v13 = vrot.slane %v6206_v61, %v11376_v28 }
 0xabf   :  { %v10931_v22 = vpop.f32.mrf.mxu1  ;;  %v6423_v19 = vcombine.low %v5909_v14, %v5917_v33  ;;  %v6454_v45 = vrot.slane %v6426_v26, %v11376_v28  ;;  %v6095_v24 = vcombine.high %v6087_v4, %v6087_v4  ;;  %v6377_v9 = vrot.slane %v6361_v18, %v11376_v28 }
 0xac0   :  { %v6384_v43 = vrot.slane %v6362_v35, %v11376_v28  ;;  %v6096_v52 = vcombine.high %v6094_v38, %v6094_v38  ;;  %v13238_v11 = vrot.slane %v6087_v4, %v11376_v28  ;;  %v6440_v0 = vrot.slane %v6424_v57, %v11376_v28  ;;  %v10419_v57 = vld [vmem:[%s14299_s6 + $0x3] ss:$0 sm:$0xff] }
 0xac1   :  { %v6692_v17 = vpop.f32.mrf.mxu1  ;;  %v6447_v1 = vrot.slane %v6425_v50, %v11376_v28  ;;  %v6478_v49 = vrot.slane %v5942_v6, %v11376_v28  ;;  %v6117_v14 = vrot.slane %v6095_v24, %v11376_v28  ;;  %v5712_v2 = vcombine.high %v13217_v29, %v13217_v29 }
 0xac2   :  { %v6391_v23 = vrot.slane %v6363_v7, %v11376_v28  ;;  %v13248_v35 = vrot.slane %v6096_v52, %v11376_v28  ;;  %v6125_v54 = vcombine.high %v13238_v11, %v13238_v11  ;;  %v13256_v33 = vrot.slane %v6094_v38, %v11376_v28 }
 0xac3   :  { %v10956_v51 = vpop.f32.mrf.mxu1  ;;  %v6456_v61 = vcombine.low %v6447_v1, %v6454_v45  ;;  %v6127_v26 = vcombine.high %v6117_v14, %v6117_v14  ;;  %v6262_v22 = vcombine.low %v6254_v53, %v6261_v16  ;;  %v6199_v7 = vcombine.low %v6191_v36, %v6198_v42 }
 0xac4   :  { %v13258_v29 = vcombine.low %v6117_v14, %v6125_v54  ;;  %v6128_v31 = vcombine.high %v13248_v35, %v13248_v35  ;;  %v13263_v50 = vrot.slane %v6024_v44, %v11376_v28  ;;  %v6433_v6 = vrot.slane %v6423_v19, %v11376_v28 }
 0xac5   :  { %v6697_v56 = vpop.f32.mrf.mxu1  ;;  %v13267_v4 = vcombine.low %v6127_v26, %v13256_v33  ;;  %10934 = vmatprep.subr.msk.mxu0 %vm80_vm0, %v6262_v22  ;;  %v6485_v38 = vrot.slane %v6478_v49, %v11376_v28  ;;  %v6693_v53 = vadd.f32 %v10419_v57, %v6692_v17  ;;  %v6370_v45 = vrot.slane %v6360_v30, %v11376_v28 }
 0xac6   :  { %v6393_v36 = vcombine.low %v6384_v43, %v6391_v23  ;;  %10936 = vmatprep.mubr.msk.f32.mxu0 %vm80_vm0, %v6199_v7  ;;  %v6143_v44 = vrot.slane %v13263_v50, %v11376_v28  ;;  %10935 = vmatpush3.xpose.msk.msra.mxu0 %vm80_vm0, %v6262_v22  ;;  %v5726_v42 = vrot.slane %v5712_v2, %v11376_v28 }
 0xac7   :  { %v10959_v18 = vpop.f32.mrf.mxu1  ;;  %10939 = vmatprep.subr.msk.mxu0 %vm80_vm0, %v6485_v38  ;;  %v6709_v19 = vcombine.high %v6693_v53, %v6693_v53  ;;  %v6716_v24 = vrot.slane %v6693_v53, %v11376_v28  ;;  %v6455_v51 = vcombine.low %v6433_v6, %v6440_v0  ;;  %v6470_v30 = vrot.slane %v6456_v61, %v11376_v28 }
 0xac8   :  { %v13279_v52 = vcombine.low %v6128_v31, %v6143_v44  ;;  %v6392_v43 = vcombine.low %v6370_v45, %v6377_v9  ;;  %v6407_v0 = vrot.slane %v6393_v36, %v11376_v28  ;;  %v6415_v23 = vrot.slane %v5726_v42, %v11376_v28 }
 0xac9   :  { %v6702_v16 = vpop.f32.mrf.mxu1  ;;  %10937 = vmatmul.mubr.msk.f32.vlgmr.msra.gmra.mxu0 %vm80_vm0, %v6213_v13  ;;  %v6723_v1 = vrot.slane %v6709_v19, %v11376_v28  ;;  %v6463_v49 = vrot.slane %v6455_v51, %v11376_v28  ;;  %v6724_v54 = vcombine.high %v6716_v24, %v6716_v24  ;;  %v6698_v22 = vadd.f32 %v10419_v57, %v6697_v56  ;;  %v10426_v56 = vld [vmem:[%s14300_s7 + $0x78] sm:$0xff] }
 0xaca   :  { %10940 = vmatpush3.xpose.msk.msra.mxu0 %vm80_vm0, %v6485_v38  ;;  %v6400_v2 = vrot.slane %v6392_v43, %v11376_v28  ;;  %v6703_v6 = vadd.f32 %v10419_v57, %v6702_v16  ;;  %v6422_v38 = vrot.slane %v6415_v23, %v11376_v28  ;;  %v6732_v42 = vrot.slane %v6716_v24, %v11376_v28  ;;  %v10425_v16 = vld [vmem:[%s14300_s7 + $0x70] sm:$0xff]  ;;  %v10424_v23 = vld [vmem:[%s14300_s7 + $0x68] sm:$0xff] }
 0xacb   :  { %v10962_v17 = vpop.f32.mrf.mxu1  ;;  %v6471_v26 = vcombine.low %v6463_v49, %v6470_v30  ;;  %v6725_v13 = vcombine.high %v6723_v1, %v6723_v1  ;;  %v6758_v7 = vcombine.high %v6698_v22, %v6698_v22  ;;  %v6765_v31 = vrot.slane %v6698_v22, %v11376_v28 }
 0xacc   :  { %v6408_v9 = vcombine.low %v6400_v2, %v6407_v0  ;;  %v6746_v53 = vrot.slane %v6724_v54, %v11376_v28  ;;  %v13314_v49 = vrot.slane %v6703_v6, %v11376_v28  ;;  %v6739_v24 = vrot.slane %v6723_v1, %v11376_v28  ;;  %v10423_v1 = vld [vmem:[%s14300_s7 + $0x60] sm:$0xff] }
 0xacd   :  { %v13285_v14 = vpop.f32.mrf.mxu1  ;;  %10941 = vmatprep.subr.msk.mxu0 %vm80_vm0, %v6471_v26  ;;  %v6772_v36 = vrot.slane %v6758_v7, %v11376_v28  ;;  %v6773_v44 = vcombine.high %v6765_v31, %v6765_v31  ;;  %v6753_v19 = vrot.slane %v6725_v13, %v11376_v28  ;;  %v13305_v57 = vrot.slane %v6765_v31, %v11376_v28 }
 0xace   :  { %10943 = vmatprep.mubr.msk.f32.mxu0 %vm80_vm0, %v6408_v9  ;;  %10942 = vmatpush3.xpose.msk.msra.mxu0 %vm80_vm0, %v6471_v26  ;;  %v7253_v2 = vcombine.low %v6732_v42, %v6746_v53  ;;  %v10439_v0 = vcombine.high %v6732_v42, %v6746_v53  ;;  %v6821_v6 = vrot.slane %v13314_v49, %v11376_v28 }
 0xacf   :  { %v10990_v61 = vpop.f32.mrf.mxu1  ;;  %10963 = vmatprep.subr.mxu0 %v14353_v20  ;;  %v6774_v17 = vcombine.high %v6772_v36, %v6772_v36  ;;  %v6788_v30 = vrot.slane %v6772_v36, %v11376_v28  ;;  %v6795_v43 = vrot.slane %v6773_v44, %v11376_v28  ;;  %v7255_v22 = vcombine.low %v6739_v24, %v6753_v19 }
 0xad0   :  { %v10440_v13 = vcombine.high %v6739_v24, %v6753_v19  ;;  %v6803_v7 = vcombine.high %v13305_v57, %v13305_v57  ;;  %v7270_v53 = vrot.slane %v10439_v0, %v11376_v28 }
 0xad1   :  { %v7121_v18 = vpop.f32.mrf.mxu1  ;;  %10944 = vmatmul.mubr.msk.f32.vlgmr.msra.gmra.mxu0 %vm80_vm0, %v6422_v38  ;;  %v6802_v26 = vrot.slane %v6774_v17, %v11376_v28  ;;  %v6804_v61 = vcombine.high %v6788_v30, %v6788_v30  ;;  %v6805_v9 = vcombine.high %v6795_v43, %v6795_v43  ;;  %v7263_v38 = vrot.slane %v7253_v2, %v11376_v28 }
 0xad2   :  { %10964 = vmatpush3.msra.mxu0 %v10426_v56  ;;  %10971 = vmatprep.mubr.msk.f32.mxu0 %vm11197_vm1, %v14353_v20  ;;  %v7277_v44 = vrot.slane %v7255_v22, %v11376_v28  ;;  %v7284_v42 = vrot.slane %v10440_v13, %v11376_v28  ;;  %v7462_v19 = vcombine.low %v6795_v43, %v6803_v7 }
 0xad3   :  { %v10993_v45 = vpop.f32.mrf.mxu1  ;;  %10965 = vmatprep.subr.mxu0 %v14353_v20  ;;  %v6806_v31 = vcombine.high %v6802_v26, %v6802_v26  ;;  %v7463_v56 = vcombine.low %v6805_v9, %v6788_v30  ;;  %v7182_v17 = vcombine.high %v7121_v18, %v7121_v18  ;;  %v7189_v30 = vrot.slane %v7121_v18, %v11376_v28 }
 0xad4   :  { %10966 = vmatpush3.msra.mxu0 %v10425_v16  ;;  %v7464_v45 = vcombine.low %v6802_v26, %v6804_v61  ;;  %v7285_v24 = vcombine.low %v7263_v38, %v7270_v53  ;;  %v7286_v61 = vcombine.low %v7277_v44, %v7284_v42 }
 0xad5   :  { %v7126_v51 = vpop.f32.mrf.mxu1  ;;  %10967 = vmatprep.subr.mxu0 %v14353_v20  ;;  %v7465_v36 = vcombine.low %v6806_v31, %v6821_v6  ;;  %v7479_v2 = vrot.slane %v7463_v56, %v11376_v28  ;;  %v13347_v43 = vrot.slane %v7189_v30, %v11376_v28 }
 0xad6   :  { %10968 = vmatpush3.msra.mxu0 %v10424_v23  ;;  %v7486_v0 = vrot.slane %v7464_v45, %v11376_v28  ;;  %v7196_v23 = vrot.slane %v7182_v17, %v11376_v28  ;;  %v13353_v18 = vrot.slane %v7126_v51, %v11376_v28  ;;  %v7300_v51 = vrot.slane %v7286_v61, %v11376_v28 }
 0xad7   :  { %v10996_v54 = vpop.f32.mrf.mxu1  ;;  %10969 = vmatprep.subr.mxu0 %v14353_v20  ;;  %v7493_v16 = vrot.slane %v7465_v36, %v11376_v28  ;;  %v7227_v7 = vcombine.high %v13347_v43, %v13347_v43 }
 0xad8   :  { %10970 = vmatpush3.msra.mxu0 %v10423_v1  ;;  %v7197_v54 = vcombine.high %v7189_v30, %v7189_v30  ;;  %v7198_v9 = vcombine.high %v7196_v23, %v7196_v23  ;;  %v7212_v22 = vrot.slane %v7196_v23, %v11376_v28  ;;  %v6126_v1 = vcombine.high %v13256_v33, %v13256_v33 }
 0xad9   :  { %10972 = vmatmul.mubr.msk.f32.vlgmr.msra.gmra.mxu0 %vm447_vm3, %v12999_v8  ;;  %v7472_v8 = vrot.slane %v7462_v19, %v11376_v28  ;;  %v7495_v26 = vcombine.low %v7486_v0, %v7493_v16  ;;  %v7245_v16 = vrot.slane %v13353_v18, %v11376_v28  ;;  %v8187_v23 = vrot.slane %v13279_v52, %v11376_v28 }
 0xada   :  { %10974 = vmatprep.mubr.msk.f32.mxu0 %vm11197_vm1, %v14353_v20  ;;  %v7219_v13 = vrot.slane %v7197_v54, %v11376_v28  ;;  %v7226_v6 = vrot.slane %v7198_v9, %v11376_v28  ;;  %v7228_v38 = vcombine.high %v7212_v22, %v7212_v22  ;;  %v8158_v17 = vcombine.low %v13248_v35, %v6126_v1 }
 0xadb   :  { %v7494_v31 = vcombine.low %v7472_v8, %v7479_v2  ;;  %v7509_v44 = vrot.slane %v7495_v26, %v11376_v28  ;;  %v8166_v54 = vrot.slane %v13258_v29, %v11376_v28 }
 0xadc   :  { %v7229_v53 = vcombine.high %v7219_v13, %v7219_v13  ;;  %v7862_v56 = vcombine.low %v7219_v13, %v7227_v7  ;;  %v7864_v33 = vcombine.low %v7226_v6, %v7228_v38  ;;  %v7230_v19 = vcombine.high %v7226_v6, %v7226_v6 }
 0xadd   :  { %10975 = vmatmul.mubr.msk.f32.gmra.mxu0 %vm447_vm3, %v13079_v37  ;;  %v7293_v37 = vrot.slane %v7285_v24, %v11376_v28  ;;  %v7502_v36 = vrot.slane %v7494_v31, %v11376_v28  ;;  %v8173_v24 = vrot.slane %v13267_v4, %v11376_v28  ;;  %v8180_v4 = vrot.slane %v8158_v17, %v11376_v28 }
 0xade   :  { %10977 = vmatprep.mubr.msk.f32.mxu0 %vm11197_vm1, %v14353_v20  ;;  %v7863_v42 = vcombine.low %v7229_v53, %v7212_v22  ;;  %v7865_v0 = vcombine.low %v7230_v19, %v7245_v16  ;;  %v7886_v8 = vrot.slane %v7864_v33, %v11376_v28  ;;  %v7133_v53 = vcombine.high %v13285_v14, %v13285_v14 }
 0xadf   :  { %v7301_v45 = vcombine.low %v7293_v37, %v7300_v51  ;;  %v7510_v30 = vcombine.low %v7502_v36, %v7509_v44  ;;  %v8188_v9 = vcombine.low %v8166_v54, %v8173_v24  ;;  %v8189_v22 = vcombine.low %v8180_v4, %v8187_v23 }
 0xae0   :  { %v7879_v2 = vrot.slane %v7863_v42, %v11376_v28  ;;  %v7893_v35 = vrot.slane %v7865_v0, %v11376_v28  ;;  %v6038_v36 = vrot.slane %v13198_v48, %v11376_v28  ;;  %v7147_v44 = vrot.slane %v7133_v53, %v11376_v28 }
 0xae1   :  { %10978 = vmatmul.mubr.msk.f32.gmra.mxu0 %vm447_vm3, %v13091_v5  ;;  %v7872_v5 = vrot.slane %v7862_v56, %v11376_v28  ;;  %11008 = vmatprep.mubr.msk.f32.mxu1 %vm80_vm0, %v7510_v30  ;;  %v8196_v52 = vrot.slane %v8188_v9, %v11376_v28  ;;  %v8203_v1 = vrot.slane %v8189_v22, %v11376_v28 }
 0xae2   :  { %11001 = vmatprep.mubr.msk.f32.mxu0 %vm80_vm0, %v7301_v45  ;;  %v7895_v61 = vcombine.low %v7886_v8, %v7893_v35  ;;  %v6031_v56 = vcombine.high %v13198_v48, %v13198_v48  ;;  %v7140_v45 = vrot.slane %v13285_v14, %v11376_v28  ;;  %v6046_v16 = vcombine.high %v6038_v36, %v6038_v36  ;;  %v10428_v14 = vld [vmem:[%s14301_s8 + $0x3] ss:$0 sm:$0xff] }
 0xae3   :  { %v7894_v26 = vcombine.low %v7872_v5, %v7879_v2  ;;  %v13392_v29 = vcombine.low %v8196_v52, %v8203_v1  ;;  %v7149_v17 = vcombine.high %v7147_v44, %v7147_v44  ;;  %v13429_v8 = vrot.slane %v6038_v36, %v11376_v28 }
 0xae4   :  { %v7909_v7 = vrot.slane %v7895_v61, %v11376_v28  ;;  %v6045_v42 = vrot.slane %v6031_v56, %v11376_v28  ;;  %v7148_v33 = vcombine.high %v7140_v45, %v7140_v45  ;;  %v13421_v48 = vrot.slane %v6046_v16, %v11376_v28 }
 0xae5   :  { %v7902_v13 = vrot.slane %v7894_v26, %v11376_v28  ;;  %v7156_v2 = vrot.slane %v7140_v45, %v11376_v28  ;;  %v7177_v0 = vrot.slane %v7149_v17, %v11376_v28  ;;  %v7163_v26 = vrot.slane %v7147_v44, %v11376_v28 }
 0xae6   :  { %v6047_v30 = vcombine.high %v6045_v42, %v6045_v42  ;;  %v7170_v24 = vrot.slane %v7148_v33, %v11376_v28  ;;  %v13433_v22 = vrot.slane %v6045_v42, %v11376_v28 }
 0xae7   :  { %v13390_v37 = vcombine.low %v7902_v13, %v7909_v7 }
 0xae8   :  { %v13426_v54 = vrot.slane %v6047_v30, %v11376_v28  ;;  %v7715_v4 = vcombine.low %v7156_v2, %v7170_v24  ;;  %v10451_v61 = vcombine.high %v7156_v2, %v7170_v24 }
 0xaea   :  { %v10460_v42 = vcombine.high %v13433_v22, %v13426_v54  ;;  %v13448_v16 = vrot.slane %v7715_v4, %v11376_v28  ;;  %v13451_v17 = vrot.slane %v10451_v61, %v11376_v28 }
 0xb89   :  { %v13394_v51 = vpop.f32.mrf.mxu0 }
 0xb8a   :  { %v6572_v31 = vsel %vm1500_vm4, %v13394_v51, -inf }
 0xb8b   :  { %6573 = vmax.xlane.f32.xlu1 %v6572_v31  ;;  %v13398_v6 = vpop.f32.mrf.mxu0  ;;  %v7717_v31 = vcombine.low %v7163_v26, %v7177_v0 }
 0xb8c   :  { %v6569_v38 = vsel %vm1496_vm5, %v13398_v6, -inf }
 0xb8d   :  { %6570 = vmax.xlane.f32.xlu0 %v6569_v38  ;;  %v10452_v38 = vcombine.high %v7163_v26, %v7177_v0 }
 0xb8f   :  { %v7746_v26 = vrot.slane %v10452_v38, %v11376_v28 }
 0xb91   :  { %v13412_v19 = vpop.f32.mrf.mxu0 }
 0xb93   :  { %v13415_v5 = vpop.f32.mrf.mxu0 }
 0xb99   :  { %v6908_v23 = vpop.f32.mrf.mxu0 }
 0xb9a   :  { %v6909_v35 = vadd.f32 %v10428_v14, %v6908_v23 }
 0xb9b   :  { %v10973_v9 = vpop.f32.mrf.mxu0 }
 0xb9c   :  { %v6925_v13 = vcombine.high %v6909_v35, %v6909_v35  ;;  %v6932_v7 = vrot.slane %v6909_v35, %v11376_v28  ;;  %v7739_v35 = vrot.slane %v7717_v31, %v11376_v28 }
 0xb9d   :  { %v6913_v53 = vpop.f32.mrf.mxu0 }
 0xb9e   :  { %v6939_v45 = vrot.slane %v6925_v13, %v11376_v28  ;;  %v6940_v36 = vcombine.high %v6932_v7, %v6932_v7  ;;  %v6914_v44 = vadd.f32 %v10428_v14, %v6913_v53  ;;  %v6948_v2 = vrot.slane %v6932_v7, %v11376_v28 }
 0xb9f   :  { %v10976_v30 = vpop.f32.mrf.mxu0  ;;  %v7238_v7 = vcombine.high %v13353_v18, %v13353_v18 }
 0xba0   :  { %v6941_v24 = vcombine.high %v6939_v45, %v6939_v45  ;;  %v6962_v0 = vrot.slane %v6940_v36, %v11376_v28  ;;  %v6974_v23 = vcombine.high %v6914_v44, %v6914_v44  ;;  %v6955_v9 = vrot.slane %v6939_v45, %v11376_v28 }
 0xba1   :  { %v6981_v13 = vrot.slane %v6914_v44, %v11376_v28  ;;  %v6918_v4 = vpop.f32.mrf.mxu0 }
 0xba2   :  { %v6969_v53 = vrot.slane %v6941_v24, %v11376_v28  ;;  %v7316_v61 = vcombine.low %v6948_v2, %v6962_v0  ;;  %v10441_v33 = vcombine.high %v6948_v2, %v6962_v0  ;;  %v6988_v30 = vrot.slane %v6974_v23, %v11376_v28 }
 0xba3   :  { %v6989_v36 = vcombine.high %v6981_v13, %v6981_v13  ;;  %v6997_v1 = vrot.slane %v6981_v13, %v11376_v28  ;;  %v6919_v31 = vadd.f32 %v10428_v14, %v6918_v4  ;;  %v10979_v52 = vpop.f32.mrf.mxu0 }
 0xba4   :  { %v7318_v38 = vcombine.low %v6955_v9, %v6969_v53  ;;  %v10442_v56 = vcombine.high %v6955_v9, %v6969_v53  ;;  %v7326_v45 = vrot.slane %v7316_v61, %v11376_v28  ;;  %v7333_v44 = vrot.slane %v10441_v33, %v11376_v28 }
 0xba5   :  { %v6990_v47 = vcombine.high %v6988_v30, %v6988_v30  ;;  %v7004_v24 = vrot.slane %v6988_v30, %v11376_v28  ;;  %v7011_v2 = vrot.slane %v6989_v36, %v11376_v28  ;;  %v7019_v0 = vcombine.high %v6997_v1, %v6997_v1 }
 0xba6   :  { %v7340_v23 = vrot.slane %v7318_v38, %v11376_v28  ;;  %v7347_v18 = vrot.slane %v10442_v56, %v11376_v28  ;;  %v7348_v27 = vcombine.low %v7326_v45, %v7333_v44  ;;  %v7371_v14 = vrot.slane %v6997_v1, %v11376_v28 }
 0xba7   :  { %v7770_v52 = vrot.slane %v13347_v43, %v11376_v28  ;;  %v7018_v9 = vrot.slane %v6990_v47, %v11376_v28  ;;  %v7020_v13 = vcombine.high %v7004_v24, %v7004_v24  ;;  %v7021_v33 = vcombine.high %v7011_v2, %v7011_v2 }
 0xba8   :  { %v7525_v4 = vcombine.low %v7011_v2, %v7019_v0  ;;  %v7029_v53 = vrot.slane %v6919_v31, %v11376_v28  ;;  %v7378_v61 = vrot.slane %v7371_v14, %v11376_v28  ;;  %v7349_v30 = vcombine.low %v7340_v23, %v7347_v18 }
 0xba9   :  { %v7526_v36 = vcombine.low %v7021_v33, %v7004_v24  ;;  %v7022_v38 = vcombine.high %v7018_v9, %v7018_v9  ;;  %v7356_v56 = vrot.slane %v7348_v27, %v11376_v28  ;;  %v7748_v45 = vcombine.low %v7739_v35, %v7746_v26 }
 0xbaa   :  { %v7527_v44 = vcombine.low %v7018_v9, %v7020_v13  ;;  %v7030_v1 = vcombine.high %v7029_v53, %v7029_v53  ;;  %v7037_v21 = vrot.slane %v7029_v53, %v11376_v28  ;;  %10997 = vmatprep.subr.msk.mxu0 %vm80_vm0, %v7378_v61  ;;  %v7363_v47 = vrot.slane %v7349_v30, %v11376_v28 }
 0xbab   :  { %v7308_v43 = vrot.slane %v13305_v57, %v11376_v28  ;;  %v7252_v31 = vrot.slane %v7238_v7, %v11376_v28  ;;  %v7542_v2 = vrot.slane %v7526_v36, %v11376_v28  ;;  %10998 = vmatpush3.xpose.msk.msra.mxu0 %vm80_vm0, %v7378_v61  ;;  %v7747_v27 = vcombine.low %v13448_v16, %v13451_v17 }
 0xbac   :  { %v7535_v35 = vrot.slane %v7525_v4, %v11376_v28  ;;  %v7044_v26 = vrot.slane %v7030_v1, %v11376_v28  ;;  %v7528_v24 = vcombine.low %v7022_v38, %v7037_v21  ;;  %v7364_v0 = vcombine.low %v7356_v56, %v7363_v47 }
 0xbad   :  { %v14363_v23 = vcombine.low %v13433_v22, %v13426_v54  ;;  %v8040_v7 = vrot.slane %v10460_v42, %v11376_v28  ;;  %v7777_v18 = vrot.slane %v7770_v52, %v11376_v28  ;;  %v7762_v14 = vrot.slane %v7748_v45, %v11376_v28 }
 0xbae   :  { %v7549_v9 = vrot.slane %v7527_v44, %v11376_v28  ;;  %v7556_v16 = vrot.slane %v7528_v24, %v11376_v28  ;;  %v7580_v17 = vrot.slane %v7044_v26, %v11376_v28  ;;  %10999 = vmatprep.subr.msk.mxu0 %vm80_vm0, %v7364_v0  ;;  %v7557_v21 = vcombine.low %v7535_v35, %v7542_v2 }
 0xbaf   :  { %v8033_v57 = vrot.slane %v14363_v23, %v11376_v28  ;;  %v14364_v54 = vcombine.low %v13429_v8, %v13421_v48  ;;  %v14365_v42 = vcombine.high %v13429_v8, %v13421_v48  ;;  %v7315_v13 = vrot.slane %v7308_v43, %v11376_v28  ;;  %11000 = vmatpush3.xpose.msk.msra.mxu0 %vm80_vm0, %v7364_v0 }
 0xbb0   :  { %v14366_v33 = vcombine.high %v13314_v49, %v13314_v49  ;;  %v7917_v53 = vrot.slane %v7252_v31, %v11376_v28  ;;  %v7558_v61 = vcombine.low %v7549_v9, %v7556_v16  ;;  %v7587_v30 = vrot.slane %v7580_v17, %v11376_v28  ;;  %11011 = vmatprep.subr.msk.mxu0 %vm174_vm2, %v7777_v18 }
 0xbb1   :  { %v8019_v22 = vrot.slane %v14364_v54, %v11376_v28  ;;  %v8026_v52 = vrot.slane %v14365_v42, %v11376_v28  ;;  %v7755_v36 = vrot.slane %v7747_v27, %v11376_v28  ;;  %v8064_v48 = vrot.slane %v13238_v11, %v11376_v28 }
 0xbb2   :  { %v6828_v4 = vrot.slane %v14366_v33, %v11376_v28  ;;  %v8042_v8 = vcombine.low %v8033_v57, %v8040_v7  ;;  %11004 = vmatprep.subr.msk.mxu1 %vm80_vm0, %v7587_v30  ;;  %11002 = vmatmul.mubr.msk.f32.vlgmr.msra.gmra.mxu0 %vm80_vm0, %v7315_v13  ;;  %v7565_v49 = vrot.slane %v7557_v21, %v11376_v28 }
 0xbb3   :  { %v7572_v38 = vrot.slane %v7558_v61, %v11376_v28  ;;  %v7763_v56 = vcombine.low %v7755_v36, %v7762_v14  ;;  %11005 = vmatpush3.xpose.msk.msra.mxu1 %vm80_vm0, %v7587_v30  ;;  %11012 = vmatpush3.msk.msra.mxu0 %vm174_vm2, %v7777_v18  ;;  %v13528_v11 = vrot.slane %v7917_v53, %v11376_v28 }
 0xbb4   :  { %v7517_v45 = vrot.slane %v6828_v4, %v11376_v28  ;;  %v8041_v1 = vcombine.low %v8019_v22, %v8026_v52  ;;  %v8071_v47 = vrot.slane %v8064_v48, %v11376_v28  ;;  %v8056_v43 = vrot.slane %v8042_v8, %v11376_v28 }
 0xbb5   :  { %v7573_v44 = vcombine.low %v7565_v49, %v7572_v38  ;;  %11013 = vmatprep.subr.mxu0 %v7763_v56  ;;  %v6575_v22 = vsel %vm1496_vm5, %v13415_v5, -inf }
 0xbb6   :  { %11014 = vmatpush3.msra.mxu0 %v7763_v56  ;;  %v7524_v31 = vrot.slane %v7517_v45, %v11376_v28  ;;  %v8049_v2 = vrot.slane %v8041_v1, %v11376_v28 }
 0xbb7   :  { %11006 = vmatprep.subr.msk.mxu1 %vm80_vm0, %v7573_v44  ;;  %11018 = vmatprep.subr.msk.mxu0 %vm174_vm2, %v13528_v11 }
 0xbb8   :  { %11007 = vmatpush3.xpose.msk.msra.mxu1 %vm80_vm0, %v7573_v44  ;;  %v8057_v27 = vcombine.low %v8049_v2, %v8056_v43 }
 0xbb9   :  { %11025 = vmatprep.subr.msk.mxu1 %vm174_vm2, %v8071_v47 }
 0xbbb   :  { %11009 = vmatmul.mubr.msk.f32.vlgmr.msra.gmra.mxu1 %vm80_vm0, %v7524_v31 }
 0xbbc   :  { %11026 = vmatpush3.msk.msra.mxu1 %vm174_vm2, %v8071_v47 }
 0xbbd   :  { %11027 = vmatprep.subr.mxu1 %v8057_v27 }
 0xbbe   :  { %11028 = vmatpush3.msra.mxu1 %v8057_v27 }
 0xbbf   :  { %11039 = vmatprep.subr.mxu1 %v14353_v20 }
 0xc14   :  { %v6574_v35 = vpop.xlane.xlu1 %6573 }
 0xc15   :  { %v6582_v24 = vsub.f32 %v13394_v51, %v6574_v35 }
 0xc16   :  { %v6571_v26 = vpop.xlane.xlu0 %6570 }
 0xc17   :  { %v6581_v0 = vsub.f32 %v13398_v6, %v6571_v26  ;;  %v6587_v23 = vmul.f32 1.442695, %v6582_v24  ;;  %v6578_v6 = vsel %vm1500_vm4, %v13412_v19, -inf }
 0xc19   :  { %v6585_v57 = vmul.f32 1.442695, %v6581_v0  ;;  %11132 = vpow2.f32 %v6587_v23 }
 0xc1b   :  { %11134 = vpow2.f32 %v6585_v57 }
 0xc26   :  { %v11133_v54 = vpop.eup %11132 }
 0xc27   :  { %v6596_v52 = vsel %vm1500_vm4, %v11133_v54, 0.0 }
 0xc28   :  { %v11135_v42 = vpop.eup %11134 }
 0xc29   :  { %v6593_v13 = vsel %vm1496_vm5, %v11135_v42, 0.0 }
 0xc72   :  { %v11003_v7 = vpop.f32.mrf.mxu0 }
 0xc73   :  { %v7674_v18 = vsel %vm1500_vm4, %v11003_v7, -inf }
 0xc74   :  { %7675 = vmax.xlane.f32.xlu1 %v7674_v18  ;;  %v7453_v14 = vpop.f32.mrf.mxu0 }
 0xc75   :  { %v7671_v9 = vsel %vm1496_vm5, %v7453_v14, -inf }
 0xc76   :  { %7672 = vmax.xlane.f32.xlu0 %v7671_v9 }
 0xc7b   :  { %v11010_v16 = vpop.f32.mrf.mxu1 }
 0xc7c   :  { %v7680_v17 = vsel %vm1500_vm4, %v11010_v16, -inf }
 0xc7d   :  { %7681 = vmax.xlane.f32.xlu1 %v7680_v17  ;;  %v7662_v21 = vpop.f32.mrf.mxu1 }
 0xc7e   :  { %v7677_v51 = vsel %vm1496_vm5, %v7662_v21, -inf }
 0xc7f   :  { %7678 = vmax.xlane.f32.xlu0 %v7677_v51 }
 0xc81   :  { %6579 = vmax.xlane.f32.xlu1 %v6578_v6 }
 0xc83   :  { %6576 = vmax.xlane.f32.xlu0 %v6575_v22 }
 0xc85   :  { %6597 = vadd.xlane.f32.xlu1 %v6596_v52 }
 0xc87   :  { %6594 = vadd.xlane.f32.xlu0 %v6593_v13 }
 0xcfd   :  { %v7676_v33 = vpop.xlane.xlu1 %7675 }
 0xcfe   :  { %v7684_v4 = vsub.f32 %v11003_v7, %v7676_v33  ;;  %v6136_v33 = vcombine.high %v13263_v50, %v13263_v50 }
 0xcff   :  { %v7673_v53 = vpop.xlane.xlu0 %7672 }
 0xd00   :  { %v7689_v61 = vmul.f32 1.442695, %v7684_v4  ;;  %v7683_v30 = vsub.f32 %v7453_v14, %v7673_v53 }
 0xd02   :  { %11136 = vpow2.f32 %v7689_v61  ;;  %v7687_v36 = vmul.f32 1.442695, %v7683_v30 }
 0xd04   :  { %11138 = vpow2.f32 %v7687_v36 }
 0xd06   :  { %v7682_v48 = vpop.xlane.xlu1 %7681 }
 0xd07   :  { %v7686_v8 = vsub.f32 %v11010_v16, %v7682_v48 }
 0xd08   :  { %v7679_v49 = vpop.xlane.xlu0 %7678 }
 0xd09   :  { %v7693_v38 = vmul.f32 1.442695, %v7686_v8  ;;  %v7685_v56 = vsub.f32 %v7662_v21, %v7679_v49 }
 0xd0a   :  { %v6580_v45 = vpop.xlane.xlu1 %6579 }
 0xd0b   :  { %11140 = vpow2.f32 %v7693_v38  ;;  %v7691_v44 = vmul.f32 1.442695, %v7685_v56  ;;  %v6584_v1 = vsub.f32 %v13412_v19, %v6580_v45 }
 0xd0c   :  { %v6577_v47 = vpop.xlane.xlu0 %6576 }
 0xd0d   :  { %11142 = vpow2.f32 %v7691_v44  ;;  %v6591_v43 = vmul.f32 1.442695, %v6584_v1  ;;  %v6583_v31 = vsub.f32 %v13415_v5, %v6577_v47 }
 0xd0e   :  { %v6598_v2 = vpop.xlane.xlu1 %6597 }
 0xd0f   :  { %11144 = vpow2.f32 %v6591_v43  ;;  %v6589_v27 = vmul.f32 1.442695, %v6583_v31  ;;  %v11137_v35 = vpop.eup %11136 }
 0xd10   :  { %11146 = vrcp.f32 %v6598_v2  ;;  %v6595_v26 = vpop.xlane.xlu0 %6594  ;;  %v7698_v24 = vsel %vm1500_vm4, %v11137_v35, 0.0 }
 0xd11   :  { %11148 = vpow2.f32 %v6589_v27  ;;  %v11139_v0 = vpop.eup %11138  ;;  %7699 = vadd.xlane.f32.xlu1 %v7698_v24 }
 0xd12   :  { %11150 = vrcp.f32 %v6595_v26  ;;  %v7695_v23 = vsel %vm1496_vm5, %v11139_v0, 0.0 }
 0xd13   :  { %7696 = vadd.xlane.f32.xlu0 %v7695_v23 }
 0xd18   :  { %v11141_v19 = vpop.eup %11140 }
 0xd19   :  { %v7704_v57 = vsel %vm1500_vm4, %v11141_v19, 0.0 }
 0xd1a   :  { %v11143_v7 = vpop.eup %11142  ;;  %7705 = vadd.xlane.f32.xlu1 %v7704_v57 }
 0xd1b   :  { %v7701_v5 = vsel %vm1496_vm5, %v11143_v7, 0.0 }
 0xd1c   :  { %v11145_v18 = vpop.eup %11144  ;;  %7702 = vadd.xlane.f32.xlu0 %v7701_v5 }
 0xd1d   :  { %v11147_v14 = vpop.eup %11146  ;;  %v6602_v9 = vsel %vm1500_vm4, %v11145_v18, 0.0 }
 0xd1e   :  { %v11149_v16 = vpop.eup %11148  ;;  %6603 = vadd.xlane.f32.xlu1 %v6602_v9  ;;  %v6608_v6 = vmul.f32 %v11147_v14, %v11133_v54  ;;  %v6150_v54 = vrot.slane %v6136_v33, %v11376_v28 }
 0xd1f   :  { %v11151_v17 = vpop.eup %11150  ;;  %v6599_v21 = vsel %vm1496_vm5, %v11149_v16, 0.0 }
 0xd20   :  { %6600 = vadd.xlane.f32.xlu0 %v6599_v21  ;;  %v6606_v51 = vmul.f32 %v11151_v17, %v11135_v42  ;;  %v8211_v48 = vrot.slane %v6150_v54, %v11376_v28 }
 0xd22   :  { %11029 = vmatprep.mubr.msk.f32.mxu1 %vm1496_vm5, %v6606_v51  ;;  %v8218_v50 = vrot.slane %v8211_v48, %v11376_v28 }
 0xd23   :  { %11030 = vmatmul.mubr.msk.f32.vlgmr.msra.gmra.mxu1 %vm1496_vm5, %v6608_v6 }
 0xd24   :  { %11047 = vmatprep.mubr.msk.f32.mxu1 %vm11197_vm1, %v14353_v20 }
 0xd9a   :  { %v7700_v22 = vpop.xlane.xlu1 %7699 }
 0xd9b   :  { %11152 = vrcp.f32 %v7700_v22 }
 0xd9c   :  { %v7697_v52 = vpop.xlane.xlu0 %7696 }
 0xd9d   :  { %11154 = vrcp.f32 %v7697_v52 }
 0xda3   :  { %v7706_v13 = vpop.xlane.xlu1 %7705 }
 0xda4   :  { %11156 = vrcp.f32 %v7706_v13 }
 0xda5   :  { %v7703_v4 = vpop.xlane.xlu0 %7702 }
 0xda6   :  { %11158 = vrcp.f32 %v7703_v4 }
 0xda7   :  { %v6604_v42 = vpop.xlane.xlu1 %6603 }
 0xda8   :  { %11160 = vrcp.f32 %v6604_v42  ;;  %v11153_v61 = vpop.eup %11152 }
 0xda9   :  { %v6601_v53 = vpop.xlane.xlu0 %6600  ;;  %v7710_v8 = vmul.f32 %v11153_v61, %v11137_v35 }
 0xdaa   :  { %11162 = vrcp.f32 %v6601_v53  ;;  %v11155_v30 = vpop.eup %11154 }
 0xdab   :  { %v7708_v36 = vmul.f32 %v11155_v30, %v11139_v0 }
 0xdad   :  { %11015 = vmatprep.mubr.msk.f32.mxu0 %vm1496_vm5, %v7708_v36 }
 0xdae   :  { %11016 = vmatmul.mubr.msk.f32.vlgmr.msra.gmra.mxu0 %vm1496_vm5, %v7710_v8 }
 0xdaf   :  { %11019 = vmatpush3.msk.msra.mxu0 %vm174_vm2, %v13528_v11 }
 0xdb0   :  { %11020 = vmatprep.subr.mxu0 %v13390_v37 }
 0xdb1   :  { %v11157_v49 = vpop.eup %11156  ;;  %11021 = vmatpush3.msra.mxu0 %v13390_v37  ;;  %v10468_v37 = vld [vmem:[%s14303_s10 + $0x1] ss:$0 sm:$0xff] }
 0xdb2   :  { %11032 = vmatprep.subr.msk.mxu0 %vm174_vm2, %v8218_v50  ;;  %v7714_v45 = vmul.f32 %v11157_v49, %v11141_v19  ;;  %v8458_v43 = vcombine.high %v10468_v37, %v10468_v37  ;;  %v8465_v2 = vrot.slane %v10468_v37, %v11376_v28 }
 0xdb3   :  { %v11159_v38 = vpop.eup %11158 }
 0xdb4   :  { %v7712_v56 = vmul.f32 %v11159_v38, %v11143_v7  ;;  %v8472_v27 = vrot.slane %v8458_v43, %v11376_v28  ;;  %v8473_v35 = vcombine.high %v8465_v2, %v8465_v2 }
 0xdb5   :  { %v11161_v44 = vpop.eup %11160 }
 0xdb6   :  { %11022 = vmatprep.mubr.msk.f32.mxu0 %vm1496_vm5, %v7712_v56  ;;  %v6612_v47 = vmul.f32 %v11161_v44, %v11145_v18  ;;  %v8474_v0 = vcombine.high %v8472_v27, %v8472_v27  ;;  %v13594_v19 = vrot.slane %v8473_v35, %v11376_v28  ;;  %v13598_v5 = vrot.slane %v8472_v27, %v11376_v28 }
 0xdb7   :  { %v11163_v1 = vpop.eup %11162  ;;  %11023 = vmatmul.mubr.msk.f32.vlgmr.msra.gmra.mxu0 %vm1496_vm5, %v7714_v45  ;;  %v13601_v18 = vrot.slane %v8465_v2, %v11376_v28 }
 0xdb8   :  { %11033 = vmatpush3.msk.msra.mxu0 %vm174_vm2, %v8218_v50  ;;  %v6610_v11 = vmul.f32 %v11163_v1, %v11149_v16  ;;  %v13604_v14 = vrot.slane %v8474_v0, %v11376_v28  ;;  %v8505_v6 = vcombine.high %v13594_v19, %v13594_v19  ;;  %v8504_v4 = vcombine.high %v13598_v5, %v13598_v5 }
 0xdb9   :  { %11034 = vmatprep.subr.mxu0 %v13392_v29  ;;  %v8503_v51 = vcombine.high %v13601_v18, %v13601_v18 }
 0xdba   :  { %11035 = vmatpush3.msra.mxu0 %v13392_v29  ;;  %11036 = vmatprep.mubr.msk.f32.mxu0 %vm1496_vm5, %v6610_v11  ;;  %v8506_v54 = vcombine.high %v13604_v14, %v13604_v14 }
 0xdbb   :  { %11037 = vmatmul.mubr.msk.f32.vlgmr.msra.gmra.mxu0 %vm1496_vm5, %v6612_v47  ;;  %11056 = vmatprep.subr.mxu0 %v14353_v20 }
 0xdbc   :  { %11064 = vmatprep.mubr.msk.f32.mxu0 %vm11197_vm1, %v14353_v20 }
 0xde3   :  { %v11031_v31 = vpop.f32.mrf.mxu1 }
 0xde5   :  { %v8147_v26 = vpop.f32.mrf.mxu1 }
 0xe6e   :  { %v11017_v29 = vpop.f32.mrf.mxu0 }
 0xe6f   :  { %v8153_v21 = vadd.f32 %v11031_v31, %v11017_v29 }
 0xe70   :  { %v7853_v24 = vpop.f32.mrf.mxu0 }
 0xe71   :  { %v8148_v23 = vadd.f32 %v8147_v26, %v7853_v24  ;;  %v8362_v50 = vrot.slane %v8153_v21, %v11376_v28 }
 0xe73   :  { %v8307_v57 = vcombine.high %v8148_v23, %v8148_v23  ;;  %v8314_v7 = vrot.slane %v8148_v23, %v11376_v28 }
 0xe75   :  { %v8321_v9 = vrot.slane %v8307_v57, %v11376_v28  ;;  %v8322_v16 = vcombine.high %v8314_v7, %v8314_v7  ;;  %v8330_v17 = vrot.slane %v8314_v7, %v11376_v28 }
 0xe77   :  { %v11024_v22 = vpop.f32.mrf.mxu0  ;;  %v8323_v52 = vcombine.high %v8321_v9, %v8321_v9  ;;  %v8337_v13 = vrot.slane %v8321_v9, %v11376_v28  ;;  %v8344_v33 = vrot.slane %v8322_v16, %v11376_v28  ;;  %v8352_v42 = vcombine.high %v8330_v17, %v8330_v17 }
 0xe78   :  { %v8515_v53 = vadd.f32 %v13601_v18, %v8330_v17 }
 0xe79   :  { %v8000_v61 = vpop.f32.mrf.mxu0  ;;  %v8351_v30 = vrot.slane %v8323_v52, %v11376_v28  ;;  %v8353_v36 = vcombine.high %v8337_v13, %v8337_v13  ;;  %v8354_v48 = vcombine.high %v8344_v33, %v8344_v33  ;;  %v8516_v8 = vadd.f32 %v13594_v19, %v8344_v33 }
 0xe7a   :  { %v8517_v49 = vadd.f32 %v8503_v51, %v8352_v42  ;;  %v8519_v38 = vadd.f32 %v13598_v5, %v8337_v13  ;;  %v13625_v47 = vadd.f32 %v8515_v53, %v12942_v15  ;;  %v8369_v15 = vrot.slane %v8362_v50, %v11376_v28 }
 0xe7b   :  { %v11038_v56 = vpop.f32.mrf.mxu0  ;;  %v8355_v45 = vcombine.high %v8351_v30, %v8351_v30  ;;  %v8518_v44 = vadd.f32 %v8505_v6, %v8354_v48  ;;  %v8520_v1 = vadd.f32 %v13604_v14, %v8351_v30  ;;  %v8521_v11 = vadd.f32 %v8504_v4, %v8353_v36 }
 0xe7c   :  { %v13628_v37 = vadd.f32 %v8516_v8, %v12945_v3  ;;  %v13631_v43 = vadd.f32 %v8517_v49, %v12948_v60  ;;  %v13633_v31 = vadd.f32 %v11038_v56, %v11024_v22  ;;  %v13643_v24 = vadd.f32 %v8519_v38, %v12956_v55 }
 0xe7d   :  { %v8294_v2 = vpop.f32.mrf.mxu0  ;;  %v8522_v27 = vadd.f32 %v8506_v54, %v8355_v45  ;;  %v13636_v35 = vadd.f32 %v8518_v44, %v12953_v59  ;;  %v13639_v26 = vadd.f32 %v8520_v1, %v12959_v40  ;;  %v13646_v3 = vadd.f32 %v8521_v11, %v12962_v32 }
 0xe7e   :  { %v8295_v29 = vadd.f32 %v8294_v2, %v8000_v61  ;;  %v8573_v60 = vcombine.low %v13625_v47, %v13628_v37  ;;  %v8523_v16 = vadd.f32 %v13601_v18, %v8369_v15 }
 0xe7f   :  { %v13652_v59 = vadd.f32 %v8522_v27, %v12965_v12  ;;  %v8574_v40 = vcombine.low %v13631_v43, %v13636_v35  ;;  %v8575_v57 = vcombine.low %v13643_v24, %v13639_v26 }
 0xe80   :  { %v8370_v0 = vcombine.high %v8295_v29, %v8295_v29  ;;  %v8377_v23 = vrot.slane %v8295_v29, %v11376_v28  ;;  %v8583_v17 = vrot.slane %v8573_v60, %v11376_v28  ;;  %v13676_v45 = vadd.f32 %v8523_v16, %v13017_v41 }
 0xe81   :  { %v8576_v9 = vcombine.low %v13646_v3, %v13652_v59  ;;  %v8590_v12 = vrot.slane %v8574_v40, %v11376_v28  ;;  %v8597_v42 = vrot.slane %v8575_v57, %v11376_v28 }
 0xe82   :  { %v8384_v55 = vrot.slane %v8370_v0, %v11376_v28  ;;  %v8385_v7 = vcombine.high %v8377_v23, %v8377_v23  ;;  %v8393_v32 = vrot.slane %v8377_v23, %v11376_v28 }
 0xe83   :  { %v8604_v53 = vrot.slane %v8576_v9, %v11376_v28  ;;  %v8605_v61 = vcombine.low %v8583_v17, %v8590_v12 }
 0xe84   :  { %v8386_v21 = vcombine.high %v8384_v55, %v8384_v55  ;;  %v8400_v22 = vrot.slane %v8384_v55, %v11376_v28  ;;  %v8407_v52 = vrot.slane %v8385_v7, %v11376_v28  ;;  %v8415_v13 = vcombine.high %v8393_v32, %v8393_v32 }
 0xe85   :  { %v8524_v33 = vadd.f32 %v13594_v19, %v8393_v32  ;;  %v8606_v56 = vcombine.low %v8597_v42, %v8604_v53  ;;  %v8425_v7 = vrot.slane %v13633_v31, %v11376_v28  ;;  %v14368_v42 = vld [vmem:[#allocation5_spill] sm:$0xff]  ;;  %v14369_v53 = vld [vmem:[#allocation6_spill] sm:$0xff] }
 0xe86   :  { %v8414_v30 = vrot.slane %v8386_v21, %v11376_v28  ;;  %v8416_v36 = vcombine.high %v8400_v22, %v8400_v22  ;;  %v8417_v48 = vcombine.high %v8407_v52, %v8407_v52  ;;  %v8525_v8 = vadd.f32 %v8503_v51, %v8407_v52 }
 0xe87   :  { %v8526_v50 = vadd.f32 %v8505_v6, %v8415_v13  ;;  %v8528_v49 = vadd.f32 %v13604_v14, %v8400_v22  ;;  %v13673_v38 = vadd.f32 %v8524_v33, %v13020_v63  ;;  %v8613_v63 = vrot.slane %v8605_v61, %v11376_v28  ;;  %v14367_v22 = vld [vmem:[#allocation13_spill] sm:$0xff] }
 0xe88   :  { %v8527_v44 = vadd.f32 %v13598_v5, %v8417_v48  ;;  %v8529_v1 = vadd.f32 %v8504_v4, %v8414_v30  ;;  %v8530_v11 = vadd.f32 %v8506_v54, %v8416_v36  ;;  %v13680_v2 = vadd.f32 %v8525_v8, %v13027_v10 }
 0xe89   :  { %v13683_v27 = vadd.f32 %v8526_v50, %v13030_v62  ;;  %v13686_v51 = vadd.f32 %v8528_v49, %v13039_v39  ;;  %v8620_v14 = vrot.slane %v8606_v56, %v11376_v28  ;;  %v8622_v10 = vcombine.low %v13676_v45, %v13673_v38  ;;  %v14374_v49 = vld [vmem:[#allocation11_spill] sm:$0xff] }
 0xe8a   :  { %v13691_v41 = vadd.f32 %v8527_v44, %v13033_v34  ;;  %v13694_v5 = vadd.f32 %v8529_v1, %v13042_v58  ;;  %v13697_v6 = vadd.f32 %v8530_v11, %v13045_v46  ;;  %v8418_v32 = vcombine.high %v8414_v30, %v8414_v30  ;;  %v14370_v30 = vld [vmem:[#allocation7_spill] sm:$0xff]  ;;  %v14375_v44 = vld [vmem:[#allocation12_spill] sm:$0xff] }
 0xe8b   :  { %v8623_v62 = vcombine.low %v13680_v2, %v13683_v27  ;;  %v8621_v39 = vcombine.low %v8613_v63, %v8620_v14  ;;  %v8632_v54 = vrot.slane %v8622_v10, %v11376_v28  ;;  %v8432_v9 = vrot.slane %v8425_v7, %v11376_v28 }
 0xe8c   :  { %v8624_v4 = vcombine.low %v13691_v41, %v13686_v51  ;;  %v8625_v34 = vcombine.low %v13694_v5, %v13697_v6  ;;  %v8531_v16 = vadd.f32 %v13601_v18, %v8418_v32  ;;  %v14371_v18 = vld [vmem:[#allocation8_spill] sm:$0xff] }
 0xe8d   :  { %v8639_v58 = vrot.slane %v8623_v62, %v11376_v28  ;;  %v8689_v46 = vsel %vm447_vm3, %v8621_v39, 0.0  ;;  %v8532_v17 = vadd.f32 %v13594_v19, %v8432_v9  ;;  %v14372_v19 = vld [vmem:[#allocation9_spill] sm:$0xff] }
 0xe8e   :  { %v8646_v29 = vrot.slane %v8624_v4, %v11376_v28  ;;  %v8653_v15 = vrot.slane %v8625_v34, %v11376_v28  ;;  %8690 = vadd.xlane.f32.xlu0 %v8689_v46  ;;  %v13721_v12 = vadd.f32 %v8531_v16, %v13050_v25  ;;  %v14373_v25 = vld [vmem:[#allocation10_spill] sm:$0xff] }
 0xe8f   :  { %v8654_v60 = vcombine.low %v8632_v54, %v8639_v58  ;;  %v13724_v52 = vadd.f32 %v8532_v17, %v14367_v22 }
 0xe90   :  { %v8655_v0 = vcombine.low %v8646_v29, %v8653_v15 }
 0xe91   :  { %v8662_v23 = vrot.slane %v8654_v60, %v11376_v28  ;;  %v8671_v33 = vcombine.low %v13721_v12, %v13724_v52 }
 0xe92   :  { %v8669_v40 = vrot.slane %v8655_v0, %v11376_v28 }
 0xe93   :  { %v8678_v0 = vrot.slane %v8671_v33, %v11376_v28 }
 0xe94   :  { %v8670_v57 = vcombine.low %v8662_v23, %v8669_v40 }
 0xe96   :  { %v8692_v55 = vsel %vm447_vm3, %v8670_v57, 0.0 }
 0xe97   :  { %8693 = vadd.xlane.f32.xlu1 %v8692_v55 }
 0xf17   :  { %v8691_v21 = vpop.xlane.xlu0 %8690 }
 0xf18   :  { %v8698_v13 = vmul.f32 0.03125, %v8691_v21 }
 0xf1a   :  { %v8707_v31 = vrot.slane %v8698_v13, %v14368_v42  ;;  %v8711_v61 = vrot.slane %v8698_v13, %v14369_v53  ;;  %v8715_v36 = vrot.slane %v8698_v13, %v14370_v30  ;;  %v8719_v48 = vrot.slane %v8698_v13, %v14371_v18 }
 0xf1b   :  { %v8723_v8 = vrot.slane %v8698_v13, %v14372_v19  ;;  %v8727_v50 = vrot.slane %v8698_v13, %v14373_v25  ;;  %v8731_v56 = vrot.slane %v8698_v13, %v14374_v49  ;;  %v8735_v1 = vrot.slane %v8698_v13, %v14375_v44 }
 0xf1c   :  { %v13737_v11 = vsub.f32 %v13625_v47, %v8707_v31  ;;  %v13740_v63 = vsub.f32 %v13628_v37, %v8711_v61  ;;  %v13743_v14 = vsub.f32 %v13631_v43, %v8715_v36  ;;  %v13746_v10 = vsub.f32 %v13636_v35, %v8719_v48 }
 0xf1d   :  { %v13749_v62 = vsub.f32 %v13643_v24, %v8723_v8  ;;  %v13752_v39 = vsub.f32 %v13639_v26, %v8727_v50  ;;  %v13755_v4 = vsub.f32 %v13646_v3, %v8731_v56  ;;  %v13758_v47 = vsub.f32 %v13652_v59, %v8735_v1 }
 0xf1e   :  { %v8812_v37 = vmul.f32 %v13737_v11, %v13737_v11  ;;  %v8813_v43 = vmul.f32 %v13740_v63, %v13740_v63  ;;  %v8814_v35 = vmul.f32 %v13743_v14, %v13743_v14  ;;  %v8815_v24 = vmul.f32 %v13746_v10, %v13746_v10 }
 0xf1f   :  { %v8816_v3 = vmul.f32 %v13749_v62, %v13749_v62  ;;  %v8817_v59 = vmul.f32 %v13752_v39, %v13752_v39  ;;  %v8818_v34 = vmul.f32 %v13755_v4, %v13755_v4  ;;  %v8819_v54 = vmul.f32 %v13758_v47, %v13758_v47 }
 0xf20   :  { %v8694_v26 = vpop.xlane.xlu1 %8693  ;;  %v8848_v46 = vcombine.low %v8812_v37, %v8813_v43  ;;  %v8849_v29 = vcombine.low %v8814_v35, %v8815_v24 }
 0xf21   :  { %v8699_v58 = vmul.f32 0.03125, %v8694_v26  ;;  %v8850_v15 = vcombine.low %v8816_v3, %v8817_v59  ;;  %v8851_v60 = vcombine.low %v8818_v34, %v8819_v54  ;;  %v8685_v34 = vrot.slane %v8678_v0, %v11376_v28 }
 0xf22   :  { %v8858_v23 = vrot.slane %v8848_v46, %v11376_v28  ;;  %v8865_v40 = vrot.slane %v8849_v29, %v11376_v28 }
 0xf23   :  { %v8739_v57 = vrot.slane %v8699_v58, %v14368_v42  ;;  %v8743_v55 = vrot.slane %v8699_v58, %v14369_v53  ;;  %v8872_v7 = vrot.slane %v8850_v15, %v11376_v28  ;;  %v8879_v32 = vrot.slane %v8851_v60, %v11376_v28 }
 0xf24   :  { %v8747_v9 = vrot.slane %v8699_v58, %v14370_v30  ;;  %v8751_v16 = vrot.slane %v8699_v58, %v14371_v18  ;;  %v8880_v17 = vcombine.low %v8858_v23, %v8865_v40  ;;  %v8755_v21 = vrot.slane %v8699_v58, %v14372_v19 }
 0xf25   :  { %v8759_v22 = vrot.slane %v8699_v58, %v14373_v25  ;;  %v8763_v13 = vrot.slane %v8699_v58, %v14374_v49  ;;  %v8881_v33 = vcombine.low %v8872_v7, %v8879_v32  ;;  %v8767_v31 = vrot.slane %v8699_v58, %v14375_v44 }
 0xf26   :  { %v13790_v61 = vsub.f32 %v13676_v45, %v8739_v57  ;;  %v13793_v36 = vsub.f32 %v13673_v38, %v8743_v55  ;;  %v8888_v48 = vrot.slane %v8880_v17, %v11376_v28  ;;  %v13797_v8 = vsub.f32 %v13680_v2, %v8747_v9  ;;  %v10476_v9 = vld [vmem:[%s14306_s13 + $0x38] sm:$0xff]  ;;  %v10474_v17 = vld [vmem:[%s14306_s13 + $0x28] sm:$0xff] }
 0xf27   :  { %v13800_v50 = vsub.f32 %v13683_v27, %v8751_v16  ;;  %v13803_v56 = vsub.f32 %v13691_v41, %v8755_v21  ;;  %v8895_v1 = vrot.slane %v8881_v33, %v11376_v28  ;;  %v13807_v37 = vsub.f32 %v13686_v51, %v8759_v22  ;;  %v10475_v16 = vld [vmem:[%s14306_s13 + $0x30] sm:$0xff]  ;;  %11040 = vmatpush3.msra.mxu1 %v10476_v9  ;;  %v10473_v21 = vld [vmem:[%s14306_s13 + $0x20] sm:$0xff] }
 0xf28   :  { %v13810_v45 = vsub.f32 %v13694_v5, %v8763_v13  ;;  %v13813_v38 = vsub.f32 %v13697_v6, %v8767_v31  ;;  %v8820_v2 = vmul.f32 %v13790_v61, %v13790_v61  ;;  %v8821_v27 = vmul.f32 %v13793_v36, %v13793_v36  ;;  %11041 = vmatprep.subr.mxu1 %v14353_v20  ;;  %v10471_v22 = vld [vmem:[%s14304_s11 + $0x1] ss:$0 sm:$0xff] }
 0xf29   :  { %v8822_v41 = vmul.f32 %v13797_v8, %v13797_v8  ;;  %v8823_v43 = vmul.f32 %v13800_v50, %v13800_v50  ;;  %v8896_v51 = vcombine.low %v8888_v48, %v8895_v1  ;;  %v8824_v5 = vmul.f32 %v13803_v56, %v13803_v56  ;;  %11042 = vmatpush3.msra.mxu1 %v10475_v16  ;;  %v10472_v13 = vld [vmem:[%s14305_s12 + $0x1] ss:$0 sm:$0xff] }
 0xf2a   :  { %v8825_v6 = vmul.f32 %v13807_v37, %v13807_v37  ;;  %v8826_v35 = vmul.f32 %v13810_v45, %v13810_v45  ;;  %v8827_v24 = vmul.f32 %v13813_v38, %v13813_v38  ;;  %v8897_v26 = vcombine.low %v8820_v2, %v8821_v27  ;;  %11043 = vmatprep.subr.mxu1 %v14353_v20 }
 0xf2b   :  { %v8898_v3 = vcombine.low %v8822_v41, %v8823_v43  ;;  %v8964_v59 = vsel %vm447_vm3, %v8896_v51, 0.0  ;;  %v8695_v40 = vsel %vm3621_vm6, %v8685_v34, 0.0  ;;  %11044 = vmatpush3.msra.mxu1 %v10474_v17  ;;  %v9098_v48 = vcombine.high %v10471_v22, %v10471_v22 }
 0xf2c   :  { %v8899_v54 = vcombine.low %v8824_v5, %v8825_v6  ;;  %8965 = vadd.xlane.f32.xlu0 %v8964_v59  ;;  %v8900_v58 = vcombine.low %v8826_v35, %v8827_v24  ;;  %v8907_v46 = vrot.slane %v8897_v26, %v11376_v28  ;;  %11045 = vmatprep.subr.mxu1 %v14353_v20 }
 0xf2d   :  { %v8914_v29 = vrot.slane %v8898_v3, %v11376_v28  ;;  %11046 = vmatpush3.msra.mxu1 %v10473_v21  ;;  %v9178_v1 = vcombine.high %v10472_v13, %v10472_v13  ;;  %v9105_v43 = vrot.slane %v10471_v22, %v11376_v28  ;;  %v9112_v51 = vrot.slane %v9098_v48, %v11376_v28 }
 0xf2e   :  { %v8921_v15 = vrot.slane %v8899_v54, %v11376_v28  ;;  %v8928_v60 = vrot.slane %v8900_v58, %v11376_v28  ;;  %11073 = vmatprep.subr.mxu1 %v14353_v20  ;;  %v9185_v5 = vrot.slane %v10472_v13, %v11376_v28 }
 0xf2f   :  { %v8929_v23 = vcombine.low %v8907_v46, %v8914_v29  ;;  %v9192_v6 = vrot.slane %v9178_v1, %v11376_v28  ;;  %v9113_v59 = vcombine.high %v9105_v43, %v9105_v43  ;;  %v9114_v34 = vcombine.high %v9112_v51, %v9112_v51 }
 0xf30   :  { %8696 = vadd.xlane.f32.xlu0 %v8695_v40  ;;  %v8930_v57 = vcombine.low %v8921_v15, %v8928_v60  ;;  %v9193_v54 = vcombine.high %v9185_v5, %v9185_v5 }
 0xf31   :  { %v8937_v55 = vrot.slane %v8929_v23, %v11376_v28  ;;  %v9194_v58 = vcombine.high %v9192_v6, %v9192_v6  ;;  %v13880_v23 = vrot.slane %v9105_v43, %v11376_v28  ;;  %v13886_v40 = vrot.slane %v9113_v59, %v11376_v28 }
 0xf32   :  { %v8944_v0 = vrot.slane %v8930_v57, %v11376_v28  ;;  %v13889_v57 = vrot.slane %v9114_v34, %v11376_v28 }
 0xf33   :  { %v13901_v9 = vrot.slane %v9194_v58, %v11376_v28  ;;  %v13906_v17 = vcombine.high %v13880_v23, %v13880_v23  ;;  %v13915_v13 = vcombine.high %v13886_v40, %v13886_v40 }
 0xf34   :  { %v8945_v7 = vcombine.low %v8937_v55, %v8944_v0  ;;  %v13892_v55 = vrot.slane %v9185_v5, %v11376_v28  ;;  %v13923_v48 = vcombine.high %v13889_v57, %v13889_v57 }
 0xf36   :  { %v8967_v32 = vsel %vm447_vm3, %v8945_v7, 0.0  ;;  %v13895_v7 = vrot.slane %v9192_v6, %v11376_v28 }
 0xf37   :  { %8968 = vadd.xlane.f32.xlu1 %v8967_v32  ;;  %v13898_v32 = vrot.slane %v9193_v54, %v11376_v28 }
 0xf38   :  { %v13927_v1 = vcombine.high %v13895_v7, %v13895_v7 }
 0xfb5   :  { %v8966_v33 = vpop.xlane.xlu0 %8965 }
 0xfb6   :  { %v8973_v31 = vmul.f32 0.03125, %v8966_v33  ;;  %v13919_v33 = vcombine.high %v13892_v55, %v13892_v55 }
 0xfb8   :  { %v8976_v2 = vadd.f32 1e-05, %v8973_v31 }
 0xfb9   :  { %v8697_v27 = vpop.xlane.xlu0 %8696 }
 0xfba   :  { %11164 = vrsqrt.f32 %v8976_v2  ;;  %v8700_v41 = vmul.f32 0.03125, %v8697_v27  ;;  %v13931_v2 = vcombine.high %v13898_v32, %v13898_v32  ;;  %v13935_v27 = vcombine.high %v13901_v9, %v13901_v9 }
 0xfbc   :  { %v8771_v35 = vrot.slane %v8700_v41, %v14368_v42  ;;  %v8775_v24 = vrot.slane %v8700_v41, %v14369_v53 }
 0xfbe   :  { %v13870_v26 = vsub.f32 %v13721_v12, %v8771_v35  ;;  %v13873_v3 = vsub.f32 %v13724_v52, %v8775_v24  ;;  %v13883_v12 = vrot.slane %v9112_v51, %v11376_v28 }
 0xfc0   :  { %v8828_v46 = vmul.f32 %v13870_v26, %v13870_v26  ;;  %v8829_v29 = vmul.f32 %v13873_v3, %v13873_v3  ;;  %v8969_v15 = vpop.xlane.xlu1 %8968  ;;  %v13911_v22 = vcombine.high %v13883_v12, %v13883_v12 }
 0xfc1   :  { %v8974_v60 = vmul.f32 0.03125, %v8969_v15 }
 0xfc2   :  { %v8946_v52 = vcombine.low %v8828_v46, %v8829_v29 }
 0xfc3   :  { %v8977_v0 = vadd.f32 1e-05, %v8974_v60 }
 0xfc4   :  { %v8953_v16 = vrot.slane %v8946_v52, %v11376_v28 }
 0xfc5   :  { %11166 = vrsqrt.f32 %v8977_v0 }
 0xfc6   :  { %v8960_v21 = vrot.slane %v8953_v16, %v11376_v28 }
 0xfc7   :  { %v11165_v31 = vpop.eup %11164 }
 0xfc8   :  { %v8970_v41 = vsel %vm3621_vm6, %v8960_v21, 0.0  ;;  %v8988_v43 = vrot.slane %v11165_v31, %v14368_v42  ;;  %v8992_v51 = vrot.slane %v11165_v31, %v14369_v53  ;;  %v8996_v5 = vrot.slane %v11165_v31, %v14370_v30 }
 0xfc9   :  { %8971 = vadd.xlane.f32.xlu1 %v8970_v41  ;;  %v9000_v6 = vrot.slane %v11165_v31, %v14371_v18  ;;  %v9004_v35 = vrot.slane %v11165_v31, %v14372_v19  ;;  %v9008_v24 = vrot.slane %v11165_v31, %v14373_v25  ;;  %v9012_v59 = vrot.slane %v11165_v31, %v14374_v49 }
 0xfca   :  { %v9016_v34 = vrot.slane %v11165_v31, %v14375_v44  ;;  %v9075_v54 = vmul.f32 %v8988_v43, %v13737_v11  ;;  %v9076_v58 = vmul.f32 %v8992_v51, %v13740_v63  ;;  %v9077_v46 = vmul.f32 %v8996_v5, %v13743_v14 }
 0xfcb   :  { %v9078_v29 = vmul.f32 %v9000_v6, %v13746_v10  ;;  %v9079_v15 = vmul.f32 %v9004_v35, %v13749_v62  ;;  %v9080_v60 = vmul.f32 %v9008_v24, %v13752_v39  ;;  %v9081_v52 = vmul.f32 %v9012_v59, %v13755_v4 }
 0xfcc   :  { %v9082_v0 = vmul.f32 %v9016_v34, %v13758_v47  ;;  %v9155_v16 = vmul.f32 %v13880_v23, %v9075_v54  ;;  %v9156_v21 = vmul.f32 %v13886_v40, %v9076_v58  ;;  %v9157_v11 = vmul.f32 %v13906_v17, %v9077_v46 }
 0xfcd   :  { %v9158_v63 = vmul.f32 %v13915_v13, %v9078_v29  ;;  %v9159_v14 = vmul.f32 %v13883_v12, %v9079_v15  ;;  %v9160_v10 = vmul.f32 %v13889_v57, %v9080_v60  ;;  %v9161_v62 = vmul.f32 %v13911_v22, %v9081_v52 }
 0xfce   :  { %v9162_v39 = vmul.f32 %v13923_v48, %v9082_v0  ;;  %v13963_v4 = vadd.f32 %v13892_v55, %v9155_v16  ;;  %v13966_v47 = vadd.f32 %v13898_v32, %v9156_v21  ;;  %v13969_v31 = vadd.f32 %v13919_v33, %v9157_v11 }
 0xfcf   :  { %v13972_v41 = vadd.f32 %v13931_v2, %v9158_v63  ;;  %v13975_v43 = vadd.f32 %v13895_v7, %v9159_v14  ;;  %v13978_v51 = vadd.f32 %v13901_v9, %v9160_v10  ;;  %v13981_v5 = vadd.f32 %v13927_v1, %v9161_v62 }
 0xfd0   :  { %v13984_v6 = vadd.f32 %v13935_v27, %v9162_v39  ;;  %v9284_v35 = vcombine.low %v13963_v4, %v13966_v47 }
 0xfd1   :  { %v9285_v24 = vcombine.low %v13969_v31, %v13972_v41  ;;  %v9286_v59 = vcombine.low %v13975_v43, %v13978_v51 }
 0xfd2   :  { %v11167_v34 = vpop.eup %11166  ;;  %v9287_v54 = vcombine.low %v13981_v5, %v13984_v6  ;;  %v9294_v58 = vrot.slane %v9284_v35, %v11376_v28 }
 0xfd3   :  { %v9301_v46 = vrot.slane %v9285_v24, %v11376_v28  ;;  %v9308_v29 = vrot.slane %v9286_v59, %v11376_v28  ;;  %v9020_v15 = vrot.slane %v11167_v34, %v14368_v42  ;;  %v9024_v60 = vrot.slane %v11167_v34, %v14369_v53 }
 0xfd4   :  { %v9315_v52 = vrot.slane %v9287_v54, %v11376_v28  ;;  %v9028_v0 = vrot.slane %v11167_v34, %v14370_v30  ;;  %v9032_v16 = vrot.slane %v11167_v34, %v14371_v18  ;;  %v9036_v21 = vrot.slane %v11167_v34, %v14372_v19 }
 0xfd5   :  { %v9316_v11 = vcombine.low %v9294_v58, %v9301_v46  ;;  %v9040_v63 = vrot.slane %v11167_v34, %v14373_v25  ;;  %v9044_v14 = vrot.slane %v11167_v34, %v14374_v49  ;;  %v9048_v10 = vrot.slane %v11167_v34, %v14375_v44 }
 0xfd6   :  { %v9317_v62 = vcombine.low %v9308_v29, %v9315_v52  ;;  %v9083_v39 = vmul.f32 %v9020_v15, %v13790_v61  ;;  %v9084_v35 = vmul.f32 %v9024_v60, %v13793_v36  ;;  %v9085_v24 = vmul.f32 %v9028_v0, %v13797_v8 }
 0xfd7   :  { %v9324_v59 = vrot.slane %v9316_v11, %v11376_v28  ;;  %v9086_v54 = vmul.f32 %v9032_v16, %v13800_v50  ;;  %v9087_v19 = vmul.f32 %v9036_v21, %v13803_v56  ;;  %v9088_v58 = vmul.f32 %v9040_v63, %v13807_v37  ;;  %v10485_v63 = vld [vmem:[%s14308_s15 + $0x38] sm:$0xff] }
 0xfd8   :  { %v9331_v46 = vrot.slane %v9317_v62, %v11376_v28  ;;  %v9089_v49 = vmul.f32 %v9044_v14, %v13810_v45  ;;  %v9090_v34 = vmul.f32 %v9048_v10, %v13813_v38  ;;  %v9163_v61 = vmul.f32 %v13880_v23, %v9083_v39  ;;  %11057 = vmatpush3.msra.mxu0 %v10485_v63  ;;  %v10484_v14 = vld [vmem:[%s14308_s15 + $0x30] sm:$0xff]  ;;  %v10483_v10 = vld [vmem:[%s14308_s15 + $0x28] sm:$0xff]  ;;  %v10482_v62 = vld [vmem:[%s14308_s15 + $0x20] sm:$0xff] }
 0xfd9   :  { %v9164_v36 = vmul.f32 %v13886_v40, %v9084_v35  ;;  %v9165_v8 = vmul.f32 %v13906_v17, %v9085_v24  ;;  %v9166_v29 = vmul.f32 %v13915_v13, %v9086_v54  ;;  %v9167_v50 = vmul.f32 %v13883_v12, %v9087_v19  ;;  %11058 = vmatprep.subr.mxu0 %v14353_v20 }
 0xfda   :  { %v9332_v15 = vcombine.low %v9324_v59, %v9331_v46  ;;  %v9168_v56 = vmul.f32 %v13889_v57, %v9088_v58  ;;  %v9169_v37 = vmul.f32 %v13911_v22, %v9089_v49  ;;  %v9170_v60 = vmul.f32 %v13923_v48, %v9090_v34  ;;  %11059 = vmatpush3.msra.mxu0 %v10484_v14 }
 0xfdb   :  { %v14025_v45 = vadd.f32 %v13892_v55, %v9163_v61  ;;  %v14028_v38 = vadd.f32 %v13898_v32, %v9164_v36  ;;  %v14031_v52 = vadd.f32 %v13919_v33, %v9165_v8  ;;  %v14034_v17 = vadd.f32 %v13931_v2, %v9166_v29  ;;  %11060 = vmatprep.subr.mxu0 %v14353_v20 }
 0xfdc   :  { %11048 = vmatmul.mubr.msk.f32.vlgmr.msra.gmra.mxu1 %vm447_vm3, %v9332_v15  ;;  %v14038_v19 = vadd.f32 %v13895_v7, %v9167_v50  ;;  %v14041_v49 = vadd.f32 %v13901_v9, %v9168_v56  ;;  %v14044_v12 = vadd.f32 %v13927_v1, %v9169_v37  ;;  %v14047_v57 = vadd.f32 %v13935_v27, %v9170_v60 }
 0xfdd   :  { %11050 = vmatprep.mubr.msk.f32.mxu1 %vm11197_vm1, %v14353_v20  ;;  %v9333_v22 = vcombine.low %v14025_v45, %v14028_v38  ;;  %v9334_v13 = vcombine.low %v14031_v52, %v14034_v17  ;;  %11061 = vmatpush3.msra.mxu0 %v10483_v10 }
 0xfde   :  { %v9335_v7 = vcombine.low %v14038_v19, %v14041_v49  ;;  %v9336_v9 = vcombine.low %v14044_v12, %v14047_v57  ;;  %11062 = vmatprep.subr.mxu0 %v14353_v20 }
 0xfdf   :  { %v9343_v33 = vrot.slane %v9333_v22, %v11376_v28  ;;  %v9350_v48 = vrot.slane %v9334_v13, %v11376_v28  ;;  %11063 = vmatpush3.msra.mxu0 %v10482_v62 }
 0xfe0   :  { %v9357_v1 = vrot.slane %v9335_v7, %v11376_v28  ;;  %v9364_v2 = vrot.slane %v9336_v9, %v11376_v28 }
 0xfe1   :  { %v9365_v27 = vcombine.low %v9343_v33, %v9350_v48  ;;  %v10487_v48 = vld [vmem:[%s14309_s16 + $0x1] ss:$0 sm:$0xff] }
 0xfe2   :  { %v9366_v0 = vcombine.low %v9357_v1, %v9364_v2 }
 0xfe3   :  { %v9373_v16 = vrot.slane %v9365_v27, %v11376_v28 }
 0xfe4   :  { %v9380_v21 = vrot.slane %v9366_v0, %v11376_v28 }
 0xfe6   :  { %v9381_v11 = vcombine.low %v9373_v16, %v9380_v21 }
 0xfe8   :  { %11051 = vmatmul.mubr.msk.f32.gmra.mxu1 %vm447_vm3, %v9381_v11 }
 0xfe9   :  { %11053 = vmatprep.mubr.msk.f32.mxu1 %vm11197_vm1, %v14353_v20 }
0x1052   :  { %v8972_v39 = vpop.xlane.xlu1 %8971 }
0x1053   :  { %v8975_v35 = vmul.f32 0.03125, %v8972_v39 }
0x1055   :  { %v8978_v24 = vadd.f32 1e-05, %v8975_v35 }
0x1057   :  { %11168 = vrsqrt.f32 %v8978_v24 }
0x1064   :  { %v11169_v59 = vpop.eup %11168 }
0x1065   :  { %v9052_v54 = vrot.slane %v11169_v59, %v14368_v42  ;;  %v9056_v58 = vrot.slane %v11169_v59, %v14369_v53 }
0x1067   :  { %v9091_v46 = vmul.f32 %v9052_v54, %v13870_v26  ;;  %v9092_v34 = vmul.f32 %v9056_v58, %v13873_v3  ;;  %v10478_v26 = vld [vmem:[%s14307_s14 + $0x1] ss:$0 sm:$0xff] }
0x1069   :  { %v9171_v61 = vmul.f32 %v13880_v23, %v9091_v46  ;;  %v9172_v36 = vmul.f32 %v13886_v40, %v9092_v34 }
0x106b   :  { %v9251_v8 = vadd.f32 %v13892_v55, %v9171_v61  ;;  %v9252_v29 = vadd.f32 %v13898_v32, %v9172_v36 }
0x106d   :  { %v9382_v50 = vcombine.low %v9251_v8, %v9252_v29 }
0x106f   :  { %v9389_v15 = vrot.slane %v9382_v50, %v11376_v28 }
0x1071   :  { %v9396_v56 = vrot.slane %v9389_v15, %v11376_v28 }
0x1073   :  { %11054 = vmatmul.mubr.msk.f32.gmra.mxu1 %vm447_vm3, %v9396_v56 }
0x1074   :  { %11081 = vmatprep.mubr.msk.f32.mxu1 %vm11197_vm1, %v14353_v20 }
0x109c   :  { %v9469_v3 = vpop.f32.mrf.mxu1 }
0x109d   :  { %v9470_v23 = vadd.f32 %v10478_v26, %v9469_v3 }
0x109e   :  { %v11049_v40 = vpop.f32.mrf.mxu1 }
0x109f   :  { %v9483_v55 = vmax.f32 %v9470_v23, 0.0 }
0x10a1   :  { %11065 = vmatmul.mubr.msk.f32.vlgmr.msra.gmra.mxu0 %vm447_vm3, %v9483_v55 }
0x10a2   :  { %11067 = vmatprep.mubr.msk.f32.mxu0 %vm11197_vm1, %v14353_v20 }
0x10a8   :  { %v9474_v32 = vpop.f32.mrf.mxu1 }
0x10a9   :  { %v9475_v37 = vadd.f32 %v10478_v26, %v9474_v32 }
0x10aa   :  { %v11052_v60 = vpop.f32.mrf.mxu1 }
0x10ab   :  { %v9484_v22 = vmax.f32 %v9475_v37, 0.0 }
0x10ad   :  { %11068 = vmatmul.mubr.msk.f32.gmra.mxu0 %vm447_vm3, %v9484_v22 }
0x10ae   :  { %11070 = vmatprep.mubr.msk.f32.mxu0 %vm11197_vm1, %v14353_v20 }
0x1133   :  { %v9479_v13 = vpop.f32.mrf.mxu1 }
0x1134   :  { %v9480_v7 = vadd.f32 %v10478_v26, %v9479_v13 }
0x1135   :  { %v11055_v9 = vpop.f32.mrf.mxu1 }
0x1136   :  { %v9485_v33 = vmax.f32 %v9480_v7, 0.0 }
0x1138   :  { %11071 = vmatmul.mubr.msk.f32.gmra.mxu0 %vm447_vm3, %v9485_v33 }
0x1161   :  { %v9574_v1 = vpop.f32.mrf.mxu0 }
0x1162   :  { %v9575_v2 = vadd.f32 %v10487_v48, %v9574_v1 }
0x1163   :  { %v11066_v27 = vpop.f32.mrf.mxu0 }
0x1164   :  { %v9587_v0 = vmax.f32 %v9575_v2, 0.0 }
0x1166   :  { %v9591_v16 = vcombine.high %v9587_v0, %v9587_v0  ;;  %v9598_v21 = vrot.slane %v9587_v0, %v11376_v28 }
0x1168   :  { %v9605_v11 = vrot.slane %v9591_v16, %v11376_v28  ;;  %v9606_v63 = vcombine.high %v9598_v21, %v9598_v21  ;;  %v9614_v14 = vrot.slane %v9598_v21, %v11376_v28 }
0x116a   :  { %v9607_v10 = vcombine.high %v9605_v11, %v9605_v11  ;;  %v9621_v62 = vrot.slane %v9605_v11, %v11376_v28  ;;  %v9628_v39 = vrot.slane %v9606_v63, %v11376_v28  ;;  %v9636_v35 = vcombine.high %v9614_v14, %v9614_v14 }
0x116b   :  { %v14119_v46 = vadd.f32 %v9614_v14, %v13963_v4 }
0x116c   :  { %v9635_v24 = vrot.slane %v9607_v10, %v11376_v28  ;;  %v9637_v59 = vcombine.high %v9621_v62, %v9621_v62  ;;  %v9638_v54 = vcombine.high %v9628_v39, %v9628_v39  ;;  %v14116_v58 = vadd.f32 %v9628_v39, %v13966_v47 }
0x116d   :  { %v14122_v34 = vadd.f32 %v9636_v35, %v13969_v31  ;;  %v9579_v61 = vpop.f32.mrf.mxu0  ;;  %v14128_v29 = vadd.f32 %v9621_v62, %v13975_v43 }
0x116e   :  { %v9639_v36 = vcombine.high %v9635_v24, %v9635_v24  ;;  %v14125_v8 = vadd.f32 %v9638_v54, %v13972_v41  ;;  %v14131_v50 = vadd.f32 %v9635_v24, %v13978_v51  ;;  %v9741_v47 = vcombine.low %v14119_v46, %v14116_v58 }
0x116f   :  { %v9580_v15 = vadd.f32 %v10487_v48, %v9579_v61  ;;  %v11069_v4 = vpop.f32.mrf.mxu0  ;;  %v14136_v56 = vadd.f32 %v9637_v59, %v13981_v5 }
0x1170   :  { %v14139_v31 = vadd.f32 %v9639_v36, %v13984_v6  ;;  %v9742_v41 = vcombine.low %v14122_v34, %v14125_v8  ;;  %v9743_v43 = vcombine.low %v14128_v29, %v14131_v50  ;;  %v9751_v3 = vrot.slane %v9741_v47, %v11376_v28 }
0x1171   :  { %v9588_v26 = vmax.f32 %v9580_v15, 0.0 }
0x1172   :  { %v9744_v51 = vcombine.low %v14136_v56, %v14139_v31  ;;  %v9758_v23 = vrot.slane %v9742_v41, %v11376_v28  ;;  %v9765_v6 = vrot.slane %v9743_v43, %v11376_v28 }
0x1173   :  { %v9640_v40 = vcombine.high %v9588_v26, %v9588_v26  ;;  %v9647_v5 = vrot.slane %v9588_v26, %v11376_v28 }
0x1174   :  { %v9772_v55 = vrot.slane %v9744_v51, %v11376_v28  ;;  %v9773_v32 = vcombine.low %v9751_v3, %v9758_v23 }
0x1175   :  { %v9654_v37 = vrot.slane %v9640_v40, %v11376_v28  ;;  %v9655_v60 = vcombine.high %v9647_v5, %v9647_v5  ;;  %v9663_v22 = vrot.slane %v9647_v5, %v11376_v28 }
0x1176   :  { %v9774_v13 = vcombine.low %v9765_v6, %v9772_v55  ;;  %v9781_v1 = vrot.slane %v9773_v32, %v11376_v28  ;;  %v14376_v55 = vld [vmem:[#allocation9_spill] sm:$0xff] }
0x1177   :  { %v9656_v7 = vcombine.high %v9654_v37, %v9654_v37  ;;  %v9670_v9 = vrot.slane %v9654_v37, %v11376_v28  ;;  %v9677_v33 = vrot.slane %v9655_v60, %v11376_v28  ;;  %v9685_v48 = vcombine.high %v9663_v22, %v9663_v22  ;;  %v14377_v60 = vld [vmem:[#allocation11_spill] sm:$0xff] }
0x1178   :  { %v9788_v2 = vrot.slane %v9774_v13, %v11376_v28  ;;  %v14163_v11 = vadd.f32 %v9663_v22, %v14025_v45 }
0x1179   :  { %v9684_v27 = vrot.slane %v9656_v7, %v11376_v28  ;;  %v9686_v0 = vcombine.high %v9670_v9, %v9670_v9  ;;  %v9687_v16 = vcombine.high %v9677_v33, %v9677_v33  ;;  %v14160_v21 = vadd.f32 %v9677_v33, %v14028_v38 }
0x117a   :  { %v14166_v63 = vadd.f32 %v9685_v48, %v14031_v52  ;;  %v9789_v14 = vcombine.low %v9781_v1, %v9788_v2  ;;  %v14172_v39 = vadd.f32 %v9670_v9, %v14038_v19 }
0x117b   :  { %v9688_v10 = vcombine.high %v9684_v27, %v9684_v27  ;;  %v14169_v62 = vadd.f32 %v9687_v16, %v14034_v17  ;;  %v14175_v35 = vadd.f32 %v9684_v27, %v14041_v49  ;;  %v9790_v38 = vcombine.low %v14163_v11, %v14160_v21 }
0x117c   :  { %v9841_v45 = vsel %vm447_vm3, %v9789_v14, 0.0  ;;  %v14181_v24 = vadd.f32 %v9686_v0, %v14044_v12 }
0x117d   :  { %9842 = vadd.xlane.f32.xlu0 %v9841_v45  ;;  %v14184_v52 = vadd.f32 %v9688_v10, %v14047_v57  ;;  %v9791_v17 = vcombine.low %v14166_v63, %v14169_v62  ;;  %v9792_v19 = vcombine.low %v14172_v39, %v14175_v35  ;;  %v9800_v59 = vrot.slane %v9790_v38, %v11376_v28 }
0x117f   :  { %v9793_v49 = vcombine.low %v14181_v24, %v14184_v52  ;;  %v9807_v54 = vrot.slane %v9791_v17, %v11376_v28  ;;  %v9814_v12 = vrot.slane %v9792_v19, %v11376_v28 }
0x1181   :  { %v9821_v61 = vrot.slane %v9793_v49, %v11376_v28  ;;  %v9822_v36 = vcombine.low %v9800_v59, %v9807_v54 }
0x1183   :  { %v9823_v57 = vcombine.low %v9814_v12, %v9821_v61  ;;  %v9830_v47 = vrot.slane %v9822_v36, %v11376_v28 }
0x1185   :  { %v9837_v15 = vrot.slane %v9823_v57, %v11376_v28 }
0x1187   :  { %v9838_v4 = vcombine.low %v9830_v47, %v9837_v15 }
0x1189   :  { %v9844_v41 = vsel %vm447_vm3, %v9838_v4, 0.0 }
0x118a   :  { %9845 = vadd.xlane.f32.xlu1 %v9844_v41 }
0x11f8   :  { %v9584_v43 = vpop.f32.mrf.mxu0 }
0x11fa   :  { %v11072_v26 = vpop.f32.mrf.mxu0 }
0x1206   :  { %v9843_v51 = vpop.xlane.xlu0 %9842 }
0x1207   :  { %v9847_v3 = vmul.f32 0.03125, %v9843_v51 }
0x1209   :  { %v9854_v23 = vrot.slane %v9847_v3, %v14368_v42  ;;  %v9858_v40 = vrot.slane %v9847_v3, %v14369_v53  ;;  %v9862_v5 = vrot.slane %v9847_v3, %v14370_v30  ;;  %v9866_v6 = vrot.slane %v9847_v3, %v14371_v18 }
0x120a   :  { %v9870_v32 = vrot.slane %v9847_v3, %v14376_v55  ;;  %v9874_v37 = vrot.slane %v9847_v3, %v14373_v25  ;;  %v9878_v22 = vrot.slane %v9847_v3, %v14377_v60  ;;  %v9882_v13 = vrot.slane %v9847_v3, %v14375_v44 }
0x120b   :  { %v14208_v7 = vsub.f32 %v14119_v46, %v9854_v23  ;;  %v9932_v9 = vsub.f32 %v14116_v58, %v9858_v40  ;;  %v9933_v33 = vsub.f32 %v14122_v34, %v9862_v5  ;;  %v9934_v48 = vsub.f32 %v14125_v8, %v9866_v6 }
0x120c   :  { %v9935_v1 = vsub.f32 %v14128_v29, %v9870_v32  ;;  %v9936_v2 = vsub.f32 %v14131_v50, %v9874_v37  ;;  %v9937_v27 = vsub.f32 %v14136_v56, %v9878_v22  ;;  %v9938_v0 = vsub.f32 %v14139_v31, %v9882_v13 }
0x120d   :  { %v9947_v16 = vmul.f32 %v14208_v7, %v14208_v7  ;;  %v9948_v14 = vmul.f32 %v9932_v9, %v9932_v9  ;;  %v9949_v46 = vmul.f32 %v9933_v33, %v9933_v33  ;;  %v9950_v10 = vmul.f32 %v9934_v48, %v9934_v48 }
0x120e   :  { %v9951_v38 = vmul.f32 %v9935_v1, %v9935_v1  ;;  %v9952_v58 = vmul.f32 %v9936_v2, %v9936_v2  ;;  %v9953_v45 = vmul.f32 %v9937_v27, %v9937_v27  ;;  %v9954_v34 = vmul.f32 %v9938_v0, %v9938_v0 }
0x120f   :  { %v9979_v17 = vcombine.low %v9947_v16, %v9948_v14  ;;  %v9980_v8 = vcombine.low %v9949_v46, %v9950_v10  ;;  %v10170_v10 = vld [vmem:[%s14312_s19 + $0x18] sm:$0xff] }
0x1210   :  { %v9981_v19 = vcombine.low %v9951_v38, %v9952_v58  ;;  %v9982_v29 = vcombine.low %v9953_v45, %v9954_v34  ;;  %v10169_v38 = vld [vmem:[%s14312_s19 + $0x10] sm:$0xff]  ;;  %11074 = vmatpush3.msra.mxu1 %v10170_v10  ;;  %v10168_v58 = vld [vmem:[%s14312_s19 + $0x8] sm:$0xff]  ;;  %v10167_v45 = vld [vmem:[%s14312_s19] sm:$0xff]  ;;  %s11199_s19 = smov [#allocation2]  }
0x1211   :  { %v9989_v50 = vrot.slane %v9979_v17, %v11376_v28  ;;  %v9996_v56 = vrot.slane %v9980_v8, %v11376_v28  ;;  %11075 = vmatprep.subr.mxu1 %v14353_v20  ;;  %s10275_s1 = sshll.u32 %s11199_s19, 4  ;;  %s10276_s1 = int_to_ptr.vmem [resolvable:$true] %s10275_s1 }
0x1212   :  { %v10003_v31 = vrot.slane %v9981_v19, %v11376_v28  ;;  %v10010_v49 = vrot.slane %v9982_v29, %v11376_v28  ;;  %11076 = vmatpush3.msra.mxu1 %v10169_v38  ;;  %s11174_s24 = scalar_lea.vmem %s10276_s1, 32  ;;  %p11179_p1 = scmp.lt.s32.totalorder %s10276_s1, %s10276_s1 }
0x1213   :  { %v9846_v59 = vpop.xlane.xlu1 %9845  ;;  %v10011_v54 = vcombine.low %v9989_v50, %v9996_v56  ;;  %11077 = vmatprep.subr.mxu1 %v14353_v20  ;;  %p11175_p0 = scmp.ne.s32.totalorder %s10276_s1, %s11174_s24  ;;  %p11180_p2 = scmp.lt.s32.totalorder %s11174_s24, %s11174_s24 }
0x1214   :  { %v9848_v12 = vmul.f32 0.03125, %v9846_v59  ;;  %v10012_v61 = vcombine.low %v10003_v31, %v10010_v49  ;;  %11078 = vmatpush3.msra.mxu1 %v10168_v58  ;;  %v10493_v31 = vld [vmem:[%s14310_s17 + $0x1] ss:$0 sm:$0xff] }
0x1215   :  { %v10019_v36 = vrot.slane %v10011_v54, %v11376_v28  ;;  %11079 = vmatprep.subr.mxu1 %v14353_v20  ;;  %v10494_v49 = vld [vmem:[%s14311_s18 + $0x1] ss:$0 sm:$0xff]  ;;  %v10116_v20 = vrot.slane %v10493_v31, %v11376_v28  ;;  %p11181_p3 = por %p11180_p2, %p11179_p1 }
0x1216   :  { %v10026_v57 = vrot.slane %v10012_v61, %v11376_v28  ;;  %v9886_v47 = vrot.slane %v9848_v12, %v14368_v42  ;;  %v9890_v15 = vrot.slane %v9848_v12, %v14369_v53  ;;  %v9894_v4 = vrot.slane %v9848_v12, %v14370_v30  ;;  %11080 = vmatpush3.msra.mxu1 %v10167_v45 }
0x1217   :  { %v9898_v41 = vrot.slane %v9848_v12, %v14371_v18  ;;  %v9902_v43 = vrot.slane %v9848_v12, %v14376_v55  ;;  %v9906_v26 = vrot.slane %v9848_v12, %v14373_v25  ;;  %v9910_v51 = vrot.slane %v9848_v12, %v14377_v60  ;;  %p11182_p4 = pnand %p11181_p3, %p11175_p0 }
0x1218   :  { %v10027_v3 = vcombine.low %v10019_v36, %v10026_v57  ;;  %v9914_v23 = vrot.slane %v9848_v12, %v14375_v44  ;;  %v9939_v40 = vsub.f32 %v14163_v11, %v9886_v47  ;;  %v14235_v5 = vsub.f32 %v14160_v21, %v9890_v15 }
0x1219   :  { %v9941_v6 = vsub.f32 %v14166_v63, %v9894_v4  ;;  %v9942_v30 = vsub.f32 %v14169_v62, %v9898_v41  ;;  %v9943_v18 = vsub.f32 %v14172_v39, %v9902_v43  ;;  %v9944_v55 = vsub.f32 %v14175_v35, %v9906_v26 }
0x121a   :  { %v10079_v25 = vsel %vm447_vm3, %v10027_v3, 0.0  ;;  %v9945_v32 = vsub.f32 %v14181_v24, %v9910_v51  ;;  %v9946_v37 = vsub.f32 %v14184_v52, %v9914_v23  ;;  %v9955_v44 = vmul.f32 %v9939_v40, %v9939_v40 }
0x121b   :  { %10080 = vadd.xlane.f32.xlu0 %v10079_v25  ;;  %v9956_v21 = vmul.f32 %v14235_v5, %v14235_v5  ;;  %v9957_v11 = vmul.f32 %v9941_v6, %v9941_v6  ;;  %v9958_v60 = vmul.f32 %v9942_v30, %v9942_v30  ;;  %v9959_v63 = vmul.f32 %v9943_v18, %v9943_v18 }
0x121c   :  { %v9960_v22 = vmul.f32 %v9944_v55, %v9944_v55  ;;  %v9961_v62 = vmul.f32 %v9945_v32, %v9945_v32  ;;  %v9962_v13 = vmul.f32 %v9946_v37, %v9946_v37  ;;  %v10147_v54 = vrot.slane %v10494_v49, %v11376_v28 }
0x121d   :  { %v10028_v39 = vcombine.low %v9955_v44, %v9956_v21  ;;  %v10029_v9 = vcombine.low %v9957_v11, %v9958_v60  ;;  %v10124_v12 = vcombine.high %v10116_v20, %v10116_v20  ;;  %v10123_v61 = vrot.slane %v10116_v20, %v11376_v28 }
0x121e   :  { %v10030_v35 = vcombine.low %v9959_v63, %v9960_v22  ;;  %v10031_v33 = vcombine.low %v9961_v62, %v9962_v13  ;;  %v10155_v57 = vcombine.high %v10147_v54, %v10147_v54  ;;  %v10154_v41 = vrot.slane %v10147_v54, %v11376_v28 }
0x121f   :  { %v10038_v48 = vrot.slane %v10028_v39, %v11376_v28  ;;  %v10045_v24 = vrot.slane %v10029_v9, %v11376_v28  ;;  %v10131_v15 = vrot.slane %v10124_v12, %v11376_v28 }
0x1220   :  { %v10052_v52 = vrot.slane %v10030_v35, %v11376_v28  ;;  %v10059_v1 = vrot.slane %v10031_v33, %v11376_v28  ;;  %v10162_v26 = vrot.slane %v10155_v57, %v11376_v28 }
0x1221   :  { %v10060_v2 = vcombine.low %v10038_v48, %v10045_v24 }
0x1222   :  { %v10061_v27 = vcombine.low %v10052_v52, %v10059_v1 }
0x1223   :  { %v10068_v0 = vrot.slane %v10060_v2, %v11376_v28 }
0x1224   :  { %v10075_v16 = vrot.slane %v10061_v27, %v11376_v28 }
0x1226   :  { %v10076_v14 = vcombine.low %v10068_v0, %v10075_v16 }
0x1228   :  { %v10082_v46 = vsel %vm447_vm3, %v10076_v14, 0.0 }
0x1229   :  { %10083 = vadd.xlane.f32.xlu1 %v10082_v46 }
0x12a4   :  { %v10081_v34 = vpop.xlane.xlu0 %10080 }
0x12a5   :  { %v10085_v17 = vmul.f32 0.03125, %v10081_v34 }
0x12a7   :  { %v10087_v8 = vadd.f32 1e-05, %v10085_v17 }
0x12a9   :  { %11170 = vrsqrt.f32 %v10087_v8 }
0x12b2   :  { %v10084_v19 = vpop.xlane.xlu1 %10083 }
0x12b3   :  { %v10086_v29 = vmul.f32 0.03125, %v10084_v19 }
0x12b5   :  { %v10088_v50 = vadd.f32 1e-05, %v10086_v29 }
0x12b6   :  { %v11171_v56 = vpop.eup %11170 }
0x12b7   :  { %11172 = vrsqrt.f32 %v10088_v50  ;;  %v10096_v59 = vrot.slane %v11171_v56, %v14368_v42 }
0x12b9   :  { %v10103_v36 = vmul.f32 %v10096_v59, %v14208_v7 }
0x12bb   :  { %v10134_v43 = vmul.f32 %v10123_v61, %v10103_v36 }
0x12bd   :  { %v10165_v3 = vadd.f32 %v10154_v41, %v10134_v43 }
0x12c4   :  { %v11173_v47 = vpop.eup %11172 }
0x12c5   :  { %v10100_v4 = vrot.slane %v11173_v47, %v14369_v53  ;;  %v10495_v53 = vld [vmem:[%s14313_s20] ss:$0 sm:$0xff] }
0x12c7   :  { %v10104_v42 = vmul.f32 %v10100_v4, %v14235_v5 }
0x12c9   :  { %v10135_v51 = vmul.f32 %v10131_v15, %v10104_v42 }
0x12cb   :  { %v10166_v23 = vadd.f32 %v10162_v26, %v10135_v51 }
0x12cd   :  { %v10180_v40 = vcombine.low %v10165_v3, %v10166_v23 }
0x12cf   :  { %v10187_v6 = vrot.slane %v10180_v40, %v11376_v28 }
0x12d1   :  { %v10194_v7 = vrot.slane %v10187_v6, %v11376_v28 }
0x12d3   :  { %11082 = vmatmul.mubr.msk.f32.vlgmr.msra.gmra.mxu1 %vm447_vm3, %v10194_v7 }
0x1393   :  { %v10263_v30 = vpop.f32.mrf.mxu1 }
0x1394   :  { %v10264_v18 = vadd.f32 %v10495_v53, %v10263_v30 }
0x1395   :  { %v11083_v5 = vpop.f32.mrf.mxu1 }
0x1396   :  { %10268 = vst.msk [vmem:[#allocation2] sm:$0x3] %vm10267_vm7, %v10264_v18 }
0x1397   :  { %11185 = shalt.err (!%p11182_p4)
}
0x1398   :  { %10278 = dma.vmem_to_hbm [thread:$0]  %s10276_s1, 32, %s14314_s21, [#allocation3]  }
0x1399   :  { %11194 = dma.done.wait [#allocation3], 32  }
0x139a   :  { %11195 = vsyncadd [#allocation3], 4294967264 }
0x139b   :  { %10282 = vsyncpa [#allocation3], 1 }

</bundles_post_ra>
